<compile_context>
chip_gen: v7x
topology: tpu7x:2x2x1
jax: 0.10.0
libtpu: 0.0.40
codegen_flags: <defaults>
</compile_context>

<pallas_src>
import functools
import math

import jax
import jax.numpy as jnp
from jax.experimental import pallas as pl
from jax.experimental.pallas import tpu as pltpu


# ----------------------------------------------------------------------------
# Fused forward kernel: one grid step per batch element.
# ----------------------------------------------------------------------------
def _sruc_fused_kernel(x_ref, w_in_ref, b_in_ref,
                       w_sru_ref, v_sru_ref, b_sru_ref,
                       w_band_ref, b_conv_ref,
                       w_out_ref, b_out_ref,
                       o_ref,
                       hpad_ref, pool_ref,
                       *, T, H, L, K, C, scale, pad_lo):
    f32 = jnp.float32
    x = x_ref[0]                                              # (T, F)

    # ---- input layer: tanh(x @ W_in + b_in)  (MXU) ----
    h = jnp.tanh(jnp.dot(x, w_in_ref[...], preferred_element_type=f32)
                 + b_in_ref[...])                             # (T, H)

    # ---- stacked SRU layers (inference path, dropout off) ----
    # One (T,H)@(H,3H) matmul per layer; recurrence state c stays in vregs.
    # TODO(synk): T is static & small here; for long sequences switch to a
    # lax.fori_loop / time-tiled grid with c carried across chunks.
    for l in range(L):
        u = jnp.dot(h, w_sru_ref[l], preferred_element_type=f32)   # (T, 3H)
        v_l = v_sru_ref[l]
        b_l = b_sru_ref[l]
        vf, vr = v_l[0:1, :], v_l[1:2, :]
        bf, br = b_l[0:1, :], b_l[1:2, :]
        c = jnp.zeros((1, H), f32)
        rows = []
        for t in range(T):
            u_t = u[t:t + 1, :]
            u0 = u_t[:, 0:H]
            u1 = u_t[:, H:2 * H]
            u2 = u_t[:, 2 * H:3 * H]
            x_t = h[t:t + 1, :]
            f = jax.nn.sigmoid(u1 + vf * c + bf)
            r = jax.nn.sigmoid(u2 + vr * c + br)
            c = f * c + (1.0 - f) * u0
            rows.append(r * c + (1.0 - r) * (x_t * scale))
        h = jnp.concatenate(rows, axis=0)                     # (T, H)

    # ---- Conv2d(1 -> C, KxK, SAME zero pad) + tanh, as K banded MXU matmuls.
    # Time padding lives in the hpad scratch; feature-dim padding is folded
    # into the banded weight matrix (built host-side). Output is directly in
    # the (T, H*C) h-major / c-minor layout the output Linear expects.
    hpad_ref[...] = jnp.zeros(hpad_ref.shape, f32)
    hpad_ref[pad_lo:pad_lo + T, :] = h
    acc = jnp.zeros((T, H * C), f32)
    for i in range(K):
        acc = acc + jnp.dot(hpad_ref[i:i + T, :], w_band_ref[i],
                            preferred_element_type=f32)
    conv = jnp.tanh(acc + b_conv_ref[...])                    # (T, H*C)

    # ---- MaxPool2d(3, stride=1, padding=1) over (t, h), per channel ----
    # -inf padded scratch; an h-shift of +/-1 is a lane shift of +/-C.
    pool_ref[...] = jnp.full(pool_ref.shape, -jnp.inf, f32)
    pool_ref[1:1 + T, C:C + H * C] = conv
    pooled = conv                                             # centre tap
    for dt in range(3):
        for dh in range(3):
            if dt == 1 and dh == 1:
                continue
            pooled = jnp.maximum(
                pooled, pool_ref[dt:dt + T, dh * C:dh * C + H * C])

    # ---- output layer: sigmoid(feats @ W_out + b_out); MSA: mask * inputs ----
    mask = jax.nn.sigmoid(
        jnp.dot(pooled, w_out_ref[...], preferred_element_type=f32)
        + b_out_ref[...])                                     # (T, Fout)
    o_ref[0] = (mask * x).astype(o_ref.dtype)


# ----------------------------------------------------------------------------
# Full SRUC forward (target_mode == 'MSA'): one pallas_call, grid over batch.
# ----------------------------------------------------------------------------
def sruc_forward(params, inputs):
    B, T, F = inputs.shape
    H = params["hidden_units"]
    C = params["kernel_num"]
    K = params["kernel_size"]
    L = params["hidden_layers"]
    Lc = params["left_context"]
    D = params["output_dim"]
    pad_lo = (K - 1) // 2
    Fout = params["w_out"].shape[1]

    kernel = functools.partial(
        _sruc_fused_kernel, T=T, H=H, L=L, K=K, C=C,
        scale=params["sru_scale"], pad_lo=pad_lo)

    out = pl.pallas_call(
        kernel,
        out_shape=jax.ShapeDtypeStruct((B, T, Fout), jnp.float32),
        grid=(B,),
        in_specs=[
            pl.BlockSpec((1, T, F), lambda b: (b, 0, 0)),        # inputs
            pl.BlockSpec((F, H), lambda b: (0, 0)),              # w_in
            pl.BlockSpec((1, H), lambda b: (0, 0)),              # b_in
            pl.BlockSpec((L, H, 3 * H), lambda b: (0, 0, 0)),    # w_sru
            pl.BlockSpec((L, 2, H), lambda b: (0, 0, 0)),        # v_sru
            pl.BlockSpec((L, 2, H), lambda b: (0, 0, 0)),        # b_sru
            pl.BlockSpec((K, H, H * C), lambda b: (0, 0, 0)),    # w_band
            pl.BlockSpec((1, H * C), lambda b: (0, 0)),          # b_conv
            pl.BlockSpec((H * C, Fout), lambda b: (0, 0)),       # w_out
            pl.BlockSpec((1, Fout), lambda b: (0, 0)),           # b_out
        ],
        out_specs=pl.BlockSpec((1, T, Fout), lambda b: (b, 0, 0)),
        scratch_shapes=[
            pltpu.VMEM((T + K - 1, H), jnp.float32),             # time-padded h
            pltpu.VMEM((T + 2, (H + 2) * C), jnp.float32),       # -inf pool pad
        ],
        compiler_params=pltpu.CompilerParams(
            dimension_semantics=("parallel",)),
    )(inputs,
      params["w_in"], params["b_in"],
      params["w_sru"], params["v_sru"], params["b_sru"],
      params["w_band"], params["b_conv"],
      params["w_out"], params["b_out"])

    center = out[:, :, Lc * D:(Lc + 1) * D]
    return out, center


# ----------------------------------------------------------------------------
# Host-side weight preparation (done once, outside the forward path).
# ----------------------------------------------------------------------------
def _banded_conv_weights(conv_w, *, H, K, C, pad_lo):
    """Fold the Conv2d feature-dim SAME zero padding into a banded weight so
    the conv becomes K MXU matmuls:
        conv[t, h*C + c] = sum_i (hpad[i:i+T, :] @ W[i])[t, h*C + c]
    with W[i, q, h*C + c] = conv_w[c, 0, i, q - h + pad_lo] when that tap index
    lies in [0, K), else 0."""
    w = conv_w[:, 0]                                            # (C, K, K)
    jmat = jnp.arange(H)[:, None] - jnp.arange(H)[None, :] + pad_lo  # (q, h)
    valid = (jmat >= 0) & (jmat < K)
    jc = jnp.clip(jmat, 0, K - 1)
    wt = jnp.transpose(w, (1, 2, 0))                            # (i, j, c)
    band = wt[:, jc, :]                                         # (i, q, h, c)
    band = jnp.where(valid[None, :, :, None], band, 0.0)
    return band.reshape(K, H, H * C)


def _glorot(key, shape, fan_in, fan_out):
    lim = math.sqrt(6.0 / (fan_in + fan_out))
    return jax.random.uniform(key, shape, jnp.float32, -lim, lim)


def make_params(key, *, input_dim, output_dim, left, right, hidden_units,
                hidden_layers, kernel_size, kernel_num):
    F = (left + 1 + right) * input_dim
    Fout = (left + 1 + right) * output_dim
    H, L, K, C = hidden_units, hidden_layers, kernel_size, kernel_num
    pad_lo = (K - 1) // 2
    keys = jax.random.split(key, 4 + 3 * L)

    conv_w = _glorot(keys[1], (C, 1, K, K), K * K, C)
    sru_w = jnp.stack([_glorot(keys[3 + 3 * l], (H, 3 * H), H, H)
                       for l in range(L)])                      # (L, H, 3H)
    sru_v = jnp.stack([0.1 * jax.random.normal(keys[4 + 3 * l], (2, H),
                                               jnp.float32)
                       for l in range(L)])                      # (L, 2, H)
    sru_b = jnp.zeros((L, 2, H), jnp.float32)

    return {
        "hidden_units": H, "hidden_layers": L,
        "kernel_size": K, "kernel_num": C,
        "left_context": left, "output_dim": output_dim,
        "sru_scale": math.sqrt(3.0),  # rescale=True, highway_bias=0
        "w_in": _glorot(keys[0], (F, H), F, H),
        "b_in": jnp.zeros((1, H), jnp.float32),
        "w_sru": sru_w, "v_sru": sru_v, "b_sru": sru_b,
        "w_band": _banded_conv_weights(conv_w, H=H, K=K, C=C, pad_lo=pad_lo),
        "b_conv": jnp.tile(jnp.zeros((C,), jnp.float32), H).reshape(1, H * C),
        "w_out": _glorot(keys[2], (H * C, Fout), H * C, Fout),
        "b_out": jnp.zeros((1, Fout), jnp.float32),
    }


if __name__ == "__main__":
    B, T = 2, 8
    input_dim = output_dim = 16
    left = right = 1
    hidden_units = 32
    hidden_layers = 2
    kernel_size = 6
    kernel_num = 9
    F = (left + 1 + right) * input_dim

    key = jax.random.PRNGKey(0)
    k_param, k_in = jax.random.split(key)
    params = make_params(k_param, input_dim=input_dim, output_dim=output_dim,
                         left=left, right=right, hidden_units=hidden_units,
                         hidden_layers=hidden_layers, kernel_size=kernel_size,
                         kernel_num=kernel_num)
    inputs = jax.random.uniform(k_in, (B, T, F), jnp.float32)

    outputs, center = sruc_forward(params, inputs)
    jax.block_until_ready((outputs, center))
    assert outputs.shape == (B, T, F)
    assert center.shape == (B, T, output_dim)
    print("KERNEL_OK")
</pallas_src>

<mosaic_0001>
module attributes {stable_mosaic.version = 11 : i64} {
  func.func @_sruc_fused_kernel(%arg0: i32, %arg1: memref<1x8x48xf32, #tpu.memory_space<vmem>>, %arg2: memref<48x32xf32, #tpu.memory_space<vmem>>, %arg3: memref<1x32xf32, #tpu.memory_space<vmem>>, %arg4: memref<2x32x96xf32, #tpu.memory_space<vmem>>, %arg5: memref<2x2x32xf32, #tpu.memory_space<vmem>>, %arg6: memref<2x2x32xf32, #tpu.memory_space<vmem>>, %arg7: memref<6x32x288xf32, #tpu.memory_space<vmem>>, %arg8: memref<1x288xf32, #tpu.memory_space<vmem>>, %arg9: memref<288x48xf32, #tpu.memory_space<vmem>>, %arg10: memref<1x48xf32, #tpu.memory_space<vmem>>, %arg11: memref<1x8x48xf32, #tpu.memory_space<vmem>>, %arg12: memref<13x32xf32, #tpu.memory_space<vmem>>, %arg13: memref<10x306xf32, #tpu.memory_space<vmem>>) attributes {dimension_semantics = [#tpu.dimension_semantics<parallel>], iteration_bounds = array<i64: 2>, scalar_prefetch = 0 : i64, scratch_operands = 2 : i64, tpu.core_type = #tpu.core_type<tc>, window_params = [{transform_indices = @transform_0, window_bounds = array<i64: 1, 8, 48>}, {pipeline_mode = #tpu.pipeline_mode<synchronous>, transform_indices = @transform_1, window_bounds = array<i64: 48, 32>}, {pipeline_mode = #tpu.pipeline_mode<synchronous>, transform_indices = @transform_2, window_bounds = array<i64: 1, 32>}, {pipeline_mode = #tpu.pipeline_mode<synchronous>, transform_indices = @transform_3, window_bounds = array<i64: 2, 32, 96>}, {pipeline_mode = #tpu.pipeline_mode<synchronous>, transform_indices = @transform_4, window_bounds = array<i64: 2, 2, 32>}, {pipeline_mode = #tpu.pipeline_mode<synchronous>, transform_indices = @transform_5, window_bounds = array<i64: 2, 2, 32>}, {pipeline_mode = #tpu.pipeline_mode<synchronous>, transform_indices = @transform_6, window_bounds = array<i64: 6, 32, 288>}, {pipeline_mode = #tpu.pipeline_mode<synchronous>, transform_indices = @transform_7, window_bounds = array<i64: 1, 288>}, {pipeline_mode = #tpu.pipeline_mode<synchronous>, transform_indices = @transform_8, window_bounds = array<i64: 288, 48>}, {pipeline_mode = #tpu.pipeline_mode<synchronous>, transform_indices = @transform_9, window_bounds = array<i64: 1, 48>}, {transform_indices = @transform_10, window_bounds = array<i64: 1, 8, 48>}]} {
    %c0 = arith.constant 0 : index
    %c0_0 = arith.constant 0 : index
    %c0_1 = arith.constant 0 : index
    %0 = vector.load %arg1[%c0, %c0_0, %c0_1] : memref<1x8x48xf32, #tpu.memory_space<vmem>>, vector<1x8x48xf32>
    %1 = vector.shape_cast %0 : vector<1x8x48xf32> to vector<8x48xf32>
    %c0_2 = arith.constant 0 : index
    %c0_3 = arith.constant 0 : index
    %2 = vector.load %arg2[%c0_2, %c0_3] : memref<48x32xf32, #tpu.memory_space<vmem>>, vector<48x32xf32>
    %cst = arith.constant dense<0.000000e+00> : vector<8x32xf32>
    %3 = tpu.matmul %1, %2, %cst {dimension_numbers = #tpu.dot_dimension_numbers<[1], [0], [0], [1], [0, 0, 1, 1], [], []>} : vector<8x48xf32>, vector<48x32xf32>, vector<8x32xf32> -> vector<8x32xf32>
    %c0_4 = arith.constant 0 : index
    %c0_5 = arith.constant 0 : index
    %4 = vector.load %arg3[%c0_4, %c0_5] : memref<1x32xf32, #tpu.memory_space<vmem>>, vector<1x32xf32>
    %5 = vector.broadcast %4 : vector<1x32xf32> to vector<8x32xf32>
    %6 = arith.addf %3, %5 : vector<8x32xf32>
    %7 = math.tanh %6 : vector<8x32xf32>
    %c0_6 = arith.constant 0 : index
    %c0_7 = arith.constant 0 : index
    %c0_8 = arith.constant 0 : index
    %8 = vector.load %arg4[%c0_6, %c0_7, %c0_8] : memref<2x32x96xf32, #tpu.memory_space<vmem>>, vector<1x32x96xf32>
    %9 = vector.shape_cast %8 : vector<1x32x96xf32> to vector<32x96xf32>
    %cst_9 = arith.constant dense<0.000000e+00> : vector<8x96xf32>
    %10 = tpu.matmul %7, %9, %cst_9 {dimension_numbers = #tpu.dot_dimension_numbers<[1], [0], [0], [1], [0, 0, 1, 1], [], []>} : vector<8x32xf32>, vector<32x96xf32>, vector<8x96xf32> -> vector<8x96xf32>
    %c0_10 = arith.constant 0 : index
    %c0_11 = arith.constant 0 : index
    %c0_12 = arith.constant 0 : index
    %11 = vector.load %arg5[%c0_10, %c0_11, %c0_12] : memref<2x2x32xf32, #tpu.memory_space<vmem>>, vector<1x2x32xf32>
    %12 = vector.shape_cast %11 : vector<1x2x32xf32> to vector<2x32xf32>
    %c0_13 = arith.constant 0 : index
    %c0_14 = arith.constant 0 : index
    %c0_15 = arith.constant 0 : index
    %13 = vector.load %arg6[%c0_13, %c0_14, %c0_15] : memref<2x2x32xf32, #tpu.memory_space<vmem>>, vector<1x2x32xf32>
    %14 = vector.shape_cast %13 : vector<1x2x32xf32> to vector<2x32xf32>
    %15 = vector.extract_strided_slice %12 {offsets = [0, 0], sizes = [1, 32], strides = [1, 1]} : vector<2x32xf32> to vector<1x32xf32>
    %16 = vector.extract_strided_slice %12 {offsets = [1, 0], sizes = [1, 32], strides = [1, 1]} : vector<2x32xf32> to vector<1x32xf32>
    %17 = vector.extract_strided_slice %14 {offsets = [0, 0], sizes = [1, 32], strides = [1, 1]} : vector<2x32xf32> to vector<1x32xf32>
    %18 = vector.extract_strided_slice %14 {offsets = [1, 0], sizes = [1, 32], strides = [1, 1]} : vector<2x32xf32> to vector<1x32xf32>
    %cst_16 = arith.constant 0.000000e+00 : f32
    %19 = vector.broadcast %cst_16 : f32 to vector<1x32xf32>
    %20 = vector.extract_strided_slice %10 {offsets = [0, 0], sizes = [1, 96], strides = [1, 1]} : vector<8x96xf32> to vector<1x96xf32>
    %21 = vector.extract_strided_slice %20 {offsets = [0, 0], sizes = [1, 32], strides = [1, 1]} : vector<1x96xf32> to vector<1x32xf32>
    %22 = vector.extract_strided_slice %20 {offsets = [0, 32], sizes = [1, 32], strides = [1, 1]} : vector<1x96xf32> to vector<1x32xf32>
    %23 = vector.extract_strided_slice %20 {offsets = [0, 64], sizes = [1, 32], strides = [1, 1]} : vector<1x96xf32> to vector<1x32xf32>
    %24 = vector.extract_strided_slice %7 {offsets = [0, 0], sizes = [1, 32], strides = [1, 1]} : vector<8x32xf32> to vector<1x32xf32>
    %25 = arith.mulf %15, %19 : vector<1x32xf32>
    %26 = arith.addf %22, %25 : vector<1x32xf32>
    %27 = arith.addf %26, %17 : vector<1x32xf32>
    %28 = arith.negf %27 : vector<1x32xf32>
    %29 = math.exp %28 : vector<1x32xf32>
    %cst_17 = arith.constant 1.000000e+00 : f32
    %30 = vector.broadcast %cst_17 : f32 to vector<1x32xf32>
    %31 = arith.addf %30, %29 : vector<1x32xf32>
    %32 = arith.divf %30, %31 : vector<1x32xf32>
    %33 = arith.mulf %16, %19 : vector<1x32xf32>
    %34 = arith.addf %23, %33 : vector<1x32xf32>
    %35 = arith.addf %34, %18 : vector<1x32xf32>
    %36 = arith.negf %35 : vector<1x32xf32>
    %37 = math.exp %36 : vector<1x32xf32>
    %cst_18 = arith.constant 1.000000e+00 : f32
    %38 = vector.broadcast %cst_18 : f32 to vector<1x32xf32>
    %39 = arith.addf %38, %37 : vector<1x32xf32>
    %40 = arith.divf %38, %39 : vector<1x32xf32>
    %41 = arith.mulf %32, %19 : vector<1x32xf32>
    %cst_19 = arith.constant 1.000000e+00 : f32
    %42 = vector.broadcast %cst_19 : f32 to vector<1x32xf32>
    %43 = arith.subf %42, %32 : vector<1x32xf32>
    %44 = arith.mulf %43, %21 : vector<1x32xf32>
    %45 = arith.addf %41, %44 : vector<1x32xf32>
    %46 = arith.mulf %40, %45 : vector<1x32xf32>
    %cst_20 = arith.constant 1.000000e+00 : f32
    %47 = vector.broadcast %cst_20 : f32 to vector<1x32xf32>
    %48 = arith.subf %47, %40 : vector<1x32xf32>
    %cst_21 = arith.constant 1.73205078 : f32
    %49 = vector.broadcast %cst_21 : f32 to vector<1x32xf32>
    %50 = arith.mulf %24, %49 : vector<1x32xf32>
    %51 = arith.mulf %48, %50 : vector<1x32xf32>
    %52 = arith.addf %46, %51 : vector<1x32xf32>
    %53 = vector.extract_strided_slice %10 {offsets = [1, 0], sizes = [1, 96], strides = [1, 1]} : vector<8x96xf32> to vector<1x96xf32>
    %54 = vector.extract_strided_slice %53 {offsets = [0, 0], sizes = [1, 32], strides = [1, 1]} : vector<1x96xf32> to vector<1x32xf32>
    %55 = vector.extract_strided_slice %53 {offsets = [0, 32], sizes = [1, 32], strides = [1, 1]} : vector<1x96xf32> to vector<1x32xf32>
    %56 = vector.extract_strided_slice %53 {offsets = [0, 64], sizes = [1, 32], strides = [1, 1]} : vector<1x96xf32> to vector<1x32xf32>
    %57 = vector.extract_strided_slice %7 {offsets = [1, 0], sizes = [1, 32], strides = [1, 1]} : vector<8x32xf32> to vector<1x32xf32>
    %58 = arith.mulf %15, %45 : vector<1x32xf32>
    %59 = arith.addf %55, %58 : vector<1x32xf32>
    %60 = arith.addf %59, %17 : vector<1x32xf32>
    %61 = arith.negf %60 : vector<1x32xf32>
    %62 = math.exp %61 : vector<1x32xf32>
    %cst_22 = arith.constant 1.000000e+00 : f32
    %63 = vector.broadcast %cst_22 : f32 to vector<1x32xf32>
    %64 = arith.addf %63, %62 : vector<1x32xf32>
    %65 = arith.divf %63, %64 : vector<1x32xf32>
    %66 = arith.mulf %16, %45 : vector<1x32xf32>
    %67 = arith.addf %56, %66 : vector<1x32xf32>
    %68 = arith.addf %67, %18 : vector<1x32xf32>
    %69 = arith.negf %68 : vector<1x32xf32>
    %70 = math.exp %69 : vector<1x32xf32>
    %cst_23 = arith.constant 1.000000e+00 : f32
    %71 = vector.broadcast %cst_23 : f32 to vector<1x32xf32>
    %72 = arith.addf %71, %70 : vector<1x32xf32>
    %73 = arith.divf %71, %72 : vector<1x32xf32>
    %74 = arith.mulf %65, %45 : vector<1x32xf32>
    %cst_24 = arith.constant 1.000000e+00 : f32
    %75 = vector.broadcast %cst_24 : f32 to vector<1x32xf32>
    %76 = arith.subf %75, %65 : vector<1x32xf32>
    %77 = arith.mulf %76, %54 : vector<1x32xf32>
    %78 = arith.addf %74, %77 : vector<1x32xf32>
    %79 = arith.mulf %73, %78 : vector<1x32xf32>
    %cst_25 = arith.constant 1.000000e+00 : f32
    %80 = vector.broadcast %cst_25 : f32 to vector<1x32xf32>
    %81 = arith.subf %80, %73 : vector<1x32xf32>
    %cst_26 = arith.constant 1.73205078 : f32
    %82 = vector.broadcast %cst_26 : f32 to vector<1x32xf32>
    %83 = arith.mulf %57, %82 : vector<1x32xf32>
    %84 = arith.mulf %81, %83 : vector<1x32xf32>
    %85 = arith.addf %79, %84 : vector<1x32xf32>
    %86 = vector.extract_strided_slice %10 {offsets = [2, 0], sizes = [1, 96], strides = [1, 1]} : vector<8x96xf32> to vector<1x96xf32>
    %87 = vector.extract_strided_slice %86 {offsets = [0, 0], sizes = [1, 32], strides = [1, 1]} : vector<1x96xf32> to vector<1x32xf32>
    %88 = vector.extract_strided_slice %86 {offsets = [0, 32], sizes = [1, 32], strides = [1, 1]} : vector<1x96xf32> to vector<1x32xf32>
    %89 = vector.extract_strided_slice %86 {offsets = [0, 64], sizes = [1, 32], strides = [1, 1]} : vector<1x96xf32> to vector<1x32xf32>
    %90 = vector.extract_strided_slice %7 {offsets = [2, 0], sizes = [1, 32], strides = [1, 1]} : vector<8x32xf32> to vector<1x32xf32>
    %91 = arith.mulf %15, %78 : vector<1x32xf32>
    %92 = arith.addf %88, %91 : vector<1x32xf32>
    %93 = arith.addf %92, %17 : vector<1x32xf32>
    %94 = arith.negf %93 : vector<1x32xf32>
    %95 = math.exp %94 : vector<1x32xf32>
    %cst_27 = arith.constant 1.000000e+00 : f32
    %96 = vector.broadcast %cst_27 : f32 to vector<1x32xf32>
    %97 = arith.addf %96, %95 : vector<1x32xf32>
    %98 = arith.divf %96, %97 : vector<1x32xf32>
    %99 = arith.mulf %16, %78 : vector<1x32xf32>
    %100 = arith.addf %89, %99 : vector<1x32xf32>
    %101 = arith.addf %100, %18 : vector<1x32xf32>
    %102 = arith.negf %101 : vector<1x32xf32>
    %103 = math.exp %102 : vector<1x32xf32>
    %cst_28 = arith.constant 1.000000e+00 : f32
    %104 = vector.broadcast %cst_28 : f32 to vector<1x32xf32>
    %105 = arith.addf %104, %103 : vector<1x32xf32>
    %106 = arith.divf %104, %105 : vector<1x32xf32>
    %107 = arith.mulf %98, %78 : vector<1x32xf32>
    %cst_29 = arith.constant 1.000000e+00 : f32
    %108 = vector.broadcast %cst_29 : f32 to vector<1x32xf32>
    %109 = arith.subf %108, %98 : vector<1x32xf32>
    %110 = arith.mulf %109, %87 : vector<1x32xf32>
    %111 = arith.addf %107, %110 : vector<1x32xf32>
    %112 = arith.mulf %106, %111 : vector<1x32xf32>
    %cst_30 = arith.constant 1.000000e+00 : f32
    %113 = vector.broadcast %cst_30 : f32 to vector<1x32xf32>
    %114 = arith.subf %113, %106 : vector<1x32xf32>
    %cst_31 = arith.constant 1.73205078 : f32
    %115 = vector.broadcast %cst_31 : f32 to vector<1x32xf32>
    %116 = arith.mulf %90, %115 : vector<1x32xf32>
    %117 = arith.mulf %114, %116 : vector<1x32xf32>
    %118 = arith.addf %112, %117 : vector<1x32xf32>
    %119 = vector.extract_strided_slice %10 {offsets = [3, 0], sizes = [1, 96], strides = [1, 1]} : vector<8x96xf32> to vector<1x96xf32>
    %120 = vector.extract_strided_slice %119 {offsets = [0, 0], sizes = [1, 32], strides = [1, 1]} : vector<1x96xf32> to vector<1x32xf32>
    %121 = vector.extract_strided_slice %119 {offsets = [0, 32], sizes = [1, 32], strides = [1, 1]} : vector<1x96xf32> to vector<1x32xf32>
    %122 = vector.extract_strided_slice %119 {offsets = [0, 64], sizes = [1, 32], strides = [1, 1]} : vector<1x96xf32> to vector<1x32xf32>
    %123 = vector.extract_strided_slice %7 {offsets = [3, 0], sizes = [1, 32], strides = [1, 1]} : vector<8x32xf32> to vector<1x32xf32>
    %124 = arith.mulf %15, %111 : vector<1x32xf32>
    %125 = arith.addf %121, %124 : vector<1x32xf32>
    %126 = arith.addf %125, %17 : vector<1x32xf32>
    %127 = arith.negf %126 : vector<1x32xf32>
    %128 = math.exp %127 : vector<1x32xf32>
    %cst_32 = arith.constant 1.000000e+00 : f32
    %129 = vector.broadcast %cst_32 : f32 to vector<1x32xf32>
    %130 = arith.addf %129, %128 : vector<1x32xf32>
    %131 = arith.divf %129, %130 : vector<1x32xf32>
    %132 = arith.mulf %16, %111 : vector<1x32xf32>
    %133 = arith.addf %122, %132 : vector<1x32xf32>
    %134 = arith.addf %133, %18 : vector<1x32xf32>
    %135 = arith.negf %134 : vector<1x32xf32>
    %136 = math.exp %135 : vector<1x32xf32>
    %cst_33 = arith.constant 1.000000e+00 : f32
    %137 = vector.broadcast %cst_33 : f32 to vector<1x32xf32>
    %138 = arith.addf %137, %136 : vector<1x32xf32>
    %139 = arith.divf %137, %138 : vector<1x32xf32>
    %140 = arith.mulf %131, %111 : vector<1x32xf32>
    %cst_34 = arith.constant 1.000000e+00 : f32
    %141 = vector.broadcast %cst_34 : f32 to vector<1x32xf32>
    %142 = arith.subf %141, %131 : vector<1x32xf32>
    %143 = arith.mulf %142, %120 : vector<1x32xf32>
    %144 = arith.addf %140, %143 : vector<1x32xf32>
    %145 = arith.mulf %139, %144 : vector<1x32xf32>
    %cst_35 = arith.constant 1.000000e+00 : f32
    %146 = vector.broadcast %cst_35 : f32 to vector<1x32xf32>
    %147 = arith.subf %146, %139 : vector<1x32xf32>
    %cst_36 = arith.constant 1.73205078 : f32
    %148 = vector.broadcast %cst_36 : f32 to vector<1x32xf32>
    %149 = arith.mulf %123, %148 : vector<1x32xf32>
    %150 = arith.mulf %147, %149 : vector<1x32xf32>
    %151 = arith.addf %145, %150 : vector<1x32xf32>
    %152 = vector.extract_strided_slice %10 {offsets = [4, 0], sizes = [1, 96], strides = [1, 1]} : vector<8x96xf32> to vector<1x96xf32>
    %153 = vector.extract_strided_slice %152 {offsets = [0, 0], sizes = [1, 32], strides = [1, 1]} : vector<1x96xf32> to vector<1x32xf32>
    %154 = vector.extract_strided_slice %152 {offsets = [0, 32], sizes = [1, 32], strides = [1, 1]} : vector<1x96xf32> to vector<1x32xf32>
    %155 = vector.extract_strided_slice %152 {offsets = [0, 64], sizes = [1, 32], strides = [1, 1]} : vector<1x96xf32> to vector<1x32xf32>
    %156 = vector.extract_strided_slice %7 {offsets = [4, 0], sizes = [1, 32], strides = [1, 1]} : vector<8x32xf32> to vector<1x32xf32>
    %157 = arith.mulf %15, %144 : vector<1x32xf32>
    %158 = arith.addf %154, %157 : vector<1x32xf32>
    %159 = arith.addf %158, %17 : vector<1x32xf32>
    %160 = arith.negf %159 : vector<1x32xf32>
    %161 = math.exp %160 : vector<1x32xf32>
    %cst_37 = arith.constant 1.000000e+00 : f32
    %162 = vector.broadcast %cst_37 : f32 to vector<1x32xf32>
    %163 = arith.addf %162, %161 : vector<1x32xf32>
    %164 = arith.divf %162, %163 : vector<1x32xf32>
    %165 = arith.mulf %16, %144 : vector<1x32xf32>
    %166 = arith.addf %155, %165 : vector<1x32xf32>
    %167 = arith.addf %166, %18 : vector<1x32xf32>
    %168 = arith.negf %167 : vector<1x32xf32>
    %169 = math.exp %168 : vector<1x32xf32>
    %cst_38 = arith.constant 1.000000e+00 : f32
    %170 = vector.broadcast %cst_38 : f32 to vector<1x32xf32>
    %171 = arith.addf %170, %169 : vector<1x32xf32>
    %172 = arith.divf %170, %171 : vector<1x32xf32>
    %173 = arith.mulf %164, %144 : vector<1x32xf32>
    %cst_39 = arith.constant 1.000000e+00 : f32
    %174 = vector.broadcast %cst_39 : f32 to vector<1x32xf32>
    %175 = arith.subf %174, %164 : vector<1x32xf32>
    %176 = arith.mulf %175, %153 : vector<1x32xf32>
    %177 = arith.addf %173, %176 : vector<1x32xf32>
    %178 = arith.mulf %172, %177 : vector<1x32xf32>
    %cst_40 = arith.constant 1.000000e+00 : f32
    %179 = vector.broadcast %cst_40 : f32 to vector<1x32xf32>
    %180 = arith.subf %179, %172 : vector<1x32xf32>
    %cst_41 = arith.constant 1.73205078 : f32
    %181 = vector.broadcast %cst_41 : f32 to vector<1x32xf32>
    %182 = arith.mulf %156, %181 : vector<1x32xf32>
    %183 = arith.mulf %180, %182 : vector<1x32xf32>
    %184 = arith.addf %178, %183 : vector<1x32xf32>
    %185 = vector.extract_strided_slice %10 {offsets = [5, 0], sizes = [1, 96], strides = [1, 1]} : vector<8x96xf32> to vector<1x96xf32>
    %186 = vector.extract_strided_slice %185 {offsets = [0, 0], sizes = [1, 32], strides = [1, 1]} : vector<1x96xf32> to vector<1x32xf32>
    %187 = vector.extract_strided_slice %185 {offsets = [0, 32], sizes = [1, 32], strides = [1, 1]} : vector<1x96xf32> to vector<1x32xf32>
    %188 = vector.extract_strided_slice %185 {offsets = [0, 64], sizes = [1, 32], strides = [1, 1]} : vector<1x96xf32> to vector<1x32xf32>
    %189 = vector.extract_strided_slice %7 {offsets = [5, 0], sizes = [1, 32], strides = [1, 1]} : vector<8x32xf32> to vector<1x32xf32>
    %190 = arith.mulf %15, %177 : vector<1x32xf32>
    %191 = arith.addf %187, %190 : vector<1x32xf32>
    %192 = arith.addf %191, %17 : vector<1x32xf32>
    %193 = arith.negf %192 : vector<1x32xf32>
    %194 = math.exp %193 : vector<1x32xf32>
    %cst_42 = arith.constant 1.000000e+00 : f32
    %195 = vector.broadcast %cst_42 : f32 to vector<1x32xf32>
    %196 = arith.addf %195, %194 : vector<1x32xf32>
    %197 = arith.divf %195, %196 : vector<1x32xf32>
    %198 = arith.mulf %16, %177 : vector<1x32xf32>
    %199 = arith.addf %188, %198 : vector<1x32xf32>
    %200 = arith.addf %199, %18 : vector<1x32xf32>
    %201 = arith.negf %200 : vector<1x32xf32>
    %202 = math.exp %201 : vector<1x32xf32>
    %cst_43 = arith.constant 1.000000e+00 : f32
    %203 = vector.broadcast %cst_43 : f32 to vector<1x32xf32>
    %204 = arith.addf %203, %202 : vector<1x32xf32>
    %205 = arith.divf %203, %204 : vector<1x32xf32>
    %206 = arith.mulf %197, %177 : vector<1x32xf32>
    %cst_44 = arith.constant 1.000000e+00 : f32
    %207 = vector.broadcast %cst_44 : f32 to vector<1x32xf32>
    %208 = arith.subf %207, %197 : vector<1x32xf32>
    %209 = arith.mulf %208, %186 : vector<1x32xf32>
    %210 = arith.addf %206, %209 : vector<1x32xf32>
    %211 = arith.mulf %205, %210 : vector<1x32xf32>
    %cst_45 = arith.constant 1.000000e+00 : f32
    %212 = vector.broadcast %cst_45 : f32 to vector<1x32xf32>
    %213 = arith.subf %212, %205 : vector<1x32xf32>
    %cst_46 = arith.constant 1.73205078 : f32
    %214 = vector.broadcast %cst_46 : f32 to vector<1x32xf32>
    %215 = arith.mulf %189, %214 : vector<1x32xf32>
    %216 = arith.mulf %213, %215 : vector<1x32xf32>
    %217 = arith.addf %211, %216 : vector<1x32xf32>
    %218 = vector.extract_strided_slice %10 {offsets = [6, 0], sizes = [1, 96], strides = [1, 1]} : vector<8x96xf32> to vector<1x96xf32>
    %219 = vector.extract_strided_slice %218 {offsets = [0, 0], sizes = [1, 32], strides = [1, 1]} : vector<1x96xf32> to vector<1x32xf32>
    %220 = vector.extract_strided_slice %218 {offsets = [0, 32], sizes = [1, 32], strides = [1, 1]} : vector<1x96xf32> to vector<1x32xf32>
    %221 = vector.extract_strided_slice %218 {offsets = [0, 64], sizes = [1, 32], strides = [1, 1]} : vector<1x96xf32> to vector<1x32xf32>
    %222 = vector.extract_strided_slice %7 {offsets = [6, 0], sizes = [1, 32], strides = [1, 1]} : vector<8x32xf32> to vector<1x32xf32>
    %223 = arith.mulf %15, %210 : vector<1x32xf32>
    %224 = arith.addf %220, %223 : vector<1x32xf32>
    %225 = arith.addf %224, %17 : vector<1x32xf32>
    %226 = arith.negf %225 : vector<1x32xf32>
    %227 = math.exp %226 : vector<1x32xf32>
    %cst_47 = arith.constant 1.000000e+00 : f32
    %228 = vector.broadcast %cst_47 : f32 to vector<1x32xf32>
    %229 = arith.addf %228, %227 : vector<1x32xf32>
    %230 = arith.divf %228, %229 : vector<1x32xf32>
    %231 = arith.mulf %16, %210 : vector<1x32xf32>
    %232 = arith.addf %221, %231 : vector<1x32xf32>
    %233 = arith.addf %232, %18 : vector<1x32xf32>
    %234 = arith.negf %233 : vector<1x32xf32>
    %235 = math.exp %234 : vector<1x32xf32>
    %cst_48 = arith.constant 1.000000e+00 : f32
    %236 = vector.broadcast %cst_48 : f32 to vector<1x32xf32>
    %237 = arith.addf %236, %235 : vector<1x32xf32>
    %238 = arith.divf %236, %237 : vector<1x32xf32>
    %239 = arith.mulf %230, %210 : vector<1x32xf32>
    %cst_49 = arith.constant 1.000000e+00 : f32
    %240 = vector.broadcast %cst_49 : f32 to vector<1x32xf32>
    %241 = arith.subf %240, %230 : vector<1x32xf32>
    %242 = arith.mulf %241, %219 : vector<1x32xf32>
    %243 = arith.addf %239, %242 : vector<1x32xf32>
    %244 = arith.mulf %238, %243 : vector<1x32xf32>
    %cst_50 = arith.constant 1.000000e+00 : f32
    %245 = vector.broadcast %cst_50 : f32 to vector<1x32xf32>
    %246 = arith.subf %245, %238 : vector<1x32xf32>
    %cst_51 = arith.constant 1.73205078 : f32
    %247 = vector.broadcast %cst_51 : f32 to vector<1x32xf32>
    %248 = arith.mulf %222, %247 : vector<1x32xf32>
    %249 = arith.mulf %246, %248 : vector<1x32xf32>
    %250 = arith.addf %244, %249 : vector<1x32xf32>
    %251 = vector.extract_strided_slice %10 {offsets = [7, 0], sizes = [1, 96], strides = [1, 1]} : vector<8x96xf32> to vector<1x96xf32>
    %252 = vector.extract_strided_slice %251 {offsets = [0, 0], sizes = [1, 32], strides = [1, 1]} : vector<1x96xf32> to vector<1x32xf32>
    %253 = vector.extract_strided_slice %251 {offsets = [0, 32], sizes = [1, 32], strides = [1, 1]} : vector<1x96xf32> to vector<1x32xf32>
    %254 = vector.extract_strided_slice %251 {offsets = [0, 64], sizes = [1, 32], strides = [1, 1]} : vector<1x96xf32> to vector<1x32xf32>
    %255 = vector.extract_strided_slice %7 {offsets = [7, 0], sizes = [1, 32], strides = [1, 1]} : vector<8x32xf32> to vector<1x32xf32>
    %256 = arith.mulf %15, %243 : vector<1x32xf32>
    %257 = arith.addf %253, %256 : vector<1x32xf32>
    %258 = arith.addf %257, %17 : vector<1x32xf32>
    %259 = arith.negf %258 : vector<1x32xf32>
    %260 = math.exp %259 : vector<1x32xf32>
    %cst_52 = arith.constant 1.000000e+00 : f32
    %261 = vector.broadcast %cst_52 : f32 to vector<1x32xf32>
    %262 = arith.addf %261, %260 : vector<1x32xf32>
    %263 = arith.divf %261, %262 : vector<1x32xf32>
    %264 = arith.mulf %16, %243 : vector<1x32xf32>
    %265 = arith.addf %254, %264 : vector<1x32xf32>
    %266 = arith.addf %265, %18 : vector<1x32xf32>
    %267 = arith.negf %266 : vector<1x32xf32>
    %268 = math.exp %267 : vector<1x32xf32>
    %cst_53 = arith.constant 1.000000e+00 : f32
    %269 = vector.broadcast %cst_53 : f32 to vector<1x32xf32>
    %270 = arith.addf %269, %268 : vector<1x32xf32>
    %271 = arith.divf %269, %270 : vector<1x32xf32>
    %272 = arith.mulf %263, %243 : vector<1x32xf32>
    %cst_54 = arith.constant 1.000000e+00 : f32
    %273 = vector.broadcast %cst_54 : f32 to vector<1x32xf32>
    %274 = arith.subf %273, %263 : vector<1x32xf32>
    %275 = arith.mulf %274, %252 : vector<1x32xf32>
    %276 = arith.addf %272, %275 : vector<1x32xf32>
    %277 = arith.mulf %271, %276 : vector<1x32xf32>
    %cst_55 = arith.constant 1.000000e+00 : f32
    %278 = vector.broadcast %cst_55 : f32 to vector<1x32xf32>
    %279 = arith.subf %278, %271 : vector<1x32xf32>
    %cst_56 = arith.constant 1.73205078 : f32
    %280 = vector.broadcast %cst_56 : f32 to vector<1x32xf32>
    %281 = arith.mulf %255, %280 : vector<1x32xf32>
    %282 = arith.mulf %279, %281 : vector<1x32xf32>
    %283 = arith.addf %277, %282 : vector<1x32xf32>
    %284 = tpu.concatenate %52, %85, %118, %151, %184, %217, %250, %283 in 0 : vector<1x32xf32>, vector<1x32xf32>, vector<1x32xf32>, vector<1x32xf32>, vector<1x32xf32>, vector<1x32xf32>, vector<1x32xf32>, vector<1x32xf32> -> vector<8x32xf32>
    %c1 = arith.constant 1 : index
    %c0_57 = arith.constant 0 : index
    %c0_58 = arith.constant 0 : index
    %285 = vector.load %arg4[%c1, %c0_57, %c0_58] : memref<2x32x96xf32, #tpu.memory_space<vmem>>, vector<1x32x96xf32>
    %286 = vector.shape_cast %285 : vector<1x32x96xf32> to vector<32x96xf32>
    %cst_59 = arith.constant dense<0.000000e+00> : vector<8x96xf32>
    %287 = tpu.matmul %284, %286, %cst_59 {dimension_numbers = #tpu.dot_dimension_numbers<[1], [0], [0], [1], [0, 0, 1, 1], [], []>} : vector<8x32xf32>, vector<32x96xf32>, vector<8x96xf32> -> vector<8x96xf32>
    %c1_60 = arith.constant 1 : index
    %c0_61 = arith.constant 0 : index
    %c0_62 = arith.constant 0 : index
    %288 = vector.load %arg5[%c1_60, %c0_61, %c0_62] : memref<2x2x32xf32, #tpu.memory_space<vmem>>, vector<1x2x32xf32>
    %289 = vector.shape_cast %288 : vector<1x2x32xf32> to vector<2x32xf32>
    %c1_63 = arith.constant 1 : index
    %c0_64 = arith.constant 0 : index
    %c0_65 = arith.constant 0 : index
    %290 = vector.load %arg6[%c1_63, %c0_64, %c0_65] : memref<2x2x32xf32, #tpu.memory_space<vmem>>, vector<1x2x32xf32>
    %291 = vector.shape_cast %290 : vector<1x2x32xf32> to vector<2x32xf32>
    %292 = vector.extract_strided_slice %289 {offsets = [0, 0], sizes = [1, 32], strides = [1, 1]} : vector<2x32xf32> to vector<1x32xf32>
    %293 = vector.extract_strided_slice %289 {offsets = [1, 0], sizes = [1, 32], strides = [1, 1]} : vector<2x32xf32> to vector<1x32xf32>
    %294 = vector.extract_strided_slice %291 {offsets = [0, 0], sizes = [1, 32], strides = [1, 1]} : vector<2x32xf32> to vector<1x32xf32>
    %295 = vector.extract_strided_slice %291 {offsets = [1, 0], sizes = [1, 32], strides = [1, 1]} : vector<2x32xf32> to vector<1x32xf32>
    %cst_66 = arith.constant 0.000000e+00 : f32
    %296 = vector.broadcast %cst_66 : f32 to vector<1x32xf32>
    %297 = vector.extract_strided_slice %287 {offsets = [0, 0], sizes = [1, 96], strides = [1, 1]} : vector<8x96xf32> to vector<1x96xf32>
    %298 = vector.extract_strided_slice %297 {offsets = [0, 0], sizes = [1, 32], strides = [1, 1]} : vector<1x96xf32> to vector<1x32xf32>
    %299 = vector.extract_strided_slice %297 {offsets = [0, 32], sizes = [1, 32], strides = [1, 1]} : vector<1x96xf32> to vector<1x32xf32>
    %300 = vector.extract_strided_slice %297 {offsets = [0, 64], sizes = [1, 32], strides = [1, 1]} : vector<1x96xf32> to vector<1x32xf32>
    %301 = vector.extract_strided_slice %284 {offsets = [0, 0], sizes = [1, 32], strides = [1, 1]} : vector<8x32xf32> to vector<1x32xf32>
    %302 = arith.mulf %292, %296 : vector<1x32xf32>
    %303 = arith.addf %299, %302 : vector<1x32xf32>
    %304 = arith.addf %303, %294 : vector<1x32xf32>
    %305 = arith.negf %304 : vector<1x32xf32>
    %306 = math.exp %305 : vector<1x32xf32>
    %cst_67 = arith.constant 1.000000e+00 : f32
    %307 = vector.broadcast %cst_67 : f32 to vector<1x32xf32>
    %308 = arith.addf %307, %306 : vector<1x32xf32>
    %309 = arith.divf %307, %308 : vector<1x32xf32>
    %310 = arith.mulf %293, %296 : vector<1x32xf32>
    %311 = arith.addf %300, %310 : vector<1x32xf32>
    %312 = arith.addf %311, %295 : vector<1x32xf32>
    %313 = arith.negf %312 : vector<1x32xf32>
    %314 = math.exp %313 : vector<1x32xf32>
    %cst_68 = arith.constant 1.000000e+00 : f32
    %315 = vector.broadcast %cst_68 : f32 to vector<1x32xf32>
    %316 = arith.addf %315, %314 : vector<1x32xf32>
    %317 = arith.divf %315, %316 : vector<1x32xf32>
    %318 = arith.mulf %309, %296 : vector<1x32xf32>
    %cst_69 = arith.constant 1.000000e+00 : f32
    %319 = vector.broadcast %cst_69 : f32 to vector<1x32xf32>
    %320 = arith.subf %319, %309 : vector<1x32xf32>
    %321 = arith.mulf %320, %298 : vector<1x32xf32>
    %322 = arith.addf %318, %321 : vector<1x32xf32>
    %323 = arith.mulf %317, %322 : vector<1x32xf32>
    %cst_70 = arith.constant 1.000000e+00 : f32
    %324 = vector.broadcast %cst_70 : f32 to vector<1x32xf32>
    %325 = arith.subf %324, %317 : vector<1x32xf32>
    %cst_71 = arith.constant 1.73205078 : f32
    %326 = vector.broadcast %cst_71 : f32 to vector<1x32xf32>
    %327 = arith.mulf %301, %326 : vector<1x32xf32>
    %328 = arith.mulf %325, %327 : vector<1x32xf32>
    %329 = arith.addf %323, %328 : vector<1x32xf32>
    %330 = vector.extract_strided_slice %287 {offsets = [1, 0], sizes = [1, 96], strides = [1, 1]} : vector<8x96xf32> to vector<1x96xf32>
    %331 = vector.extract_strided_slice %330 {offsets = [0, 0], sizes = [1, 32], strides = [1, 1]} : vector<1x96xf32> to vector<1x32xf32>
    %332 = vector.extract_strided_slice %330 {offsets = [0, 32], sizes = [1, 32], strides = [1, 1]} : vector<1x96xf32> to vector<1x32xf32>
    %333 = vector.extract_strided_slice %330 {offsets = [0, 64], sizes = [1, 32], strides = [1, 1]} : vector<1x96xf32> to vector<1x32xf32>
    %334 = vector.extract_strided_slice %284 {offsets = [1, 0], sizes = [1, 32], strides = [1, 1]} : vector<8x32xf32> to vector<1x32xf32>
    %335 = arith.mulf %292, %322 : vector<1x32xf32>
    %336 = arith.addf %332, %335 : vector<1x32xf32>
    %337 = arith.addf %336, %294 : vector<1x32xf32>
    %338 = arith.negf %337 : vector<1x32xf32>
    %339 = math.exp %338 : vector<1x32xf32>
    %cst_72 = arith.constant 1.000000e+00 : f32
    %340 = vector.broadcast %cst_72 : f32 to vector<1x32xf32>
    %341 = arith.addf %340, %339 : vector<1x32xf32>
    %342 = arith.divf %340, %341 : vector<1x32xf32>
    %343 = arith.mulf %293, %322 : vector<1x32xf32>
    %344 = arith.addf %333, %343 : vector<1x32xf32>
    %345 = arith.addf %344, %295 : vector<1x32xf32>
    %346 = arith.negf %345 : vector<1x32xf32>
    %347 = math.exp %346 : vector<1x32xf32>
    %cst_73 = arith.constant 1.000000e+00 : f32
    %348 = vector.broadcast %cst_73 : f32 to vector<1x32xf32>
    %349 = arith.addf %348, %347 : vector<1x32xf32>
    %350 = arith.divf %348, %349 : vector<1x32xf32>
    %351 = arith.mulf %342, %322 : vector<1x32xf32>
    %cst_74 = arith.constant 1.000000e+00 : f32
    %352 = vector.broadcast %cst_74 : f32 to vector<1x32xf32>
    %353 = arith.subf %352, %342 : vector<1x32xf32>
    %354 = arith.mulf %353, %331 : vector<1x32xf32>
    %355 = arith.addf %351, %354 : vector<1x32xf32>
    %356 = arith.mulf %350, %355 : vector<1x32xf32>
    %cst_75 = arith.constant 1.000000e+00 : f32
    %357 = vector.broadcast %cst_75 : f32 to vector<1x32xf32>
    %358 = arith.subf %357, %350 : vector<1x32xf32>
    %cst_76 = arith.constant 1.73205078 : f32
    %359 = vector.broadcast %cst_76 : f32 to vector<1x32xf32>
    %360 = arith.mulf %334, %359 : vector<1x32xf32>
    %361 = arith.mulf %358, %360 : vector<1x32xf32>
    %362 = arith.addf %356, %361 : vector<1x32xf32>
    %363 = vector.extract_strided_slice %287 {offsets = [2, 0], sizes = [1, 96], strides = [1, 1]} : vector<8x96xf32> to vector<1x96xf32>
    %364 = vector.extract_strided_slice %363 {offsets = [0, 0], sizes = [1, 32], strides = [1, 1]} : vector<1x96xf32> to vector<1x32xf32>
    %365 = vector.extract_strided_slice %363 {offsets = [0, 32], sizes = [1, 32], strides = [1, 1]} : vector<1x96xf32> to vector<1x32xf32>
    %366 = vector.extract_strided_slice %363 {offsets = [0, 64], sizes = [1, 32], strides = [1, 1]} : vector<1x96xf32> to vector<1x32xf32>
    %367 = vector.extract_strided_slice %284 {offsets = [2, 0], sizes = [1, 32], strides = [1, 1]} : vector<8x32xf32> to vector<1x32xf32>
    %368 = arith.mulf %292, %355 : vector<1x32xf32>
    %369 = arith.addf %365, %368 : vector<1x32xf32>
    %370 = arith.addf %369, %294 : vector<1x32xf32>
    %371 = arith.negf %370 : vector<1x32xf32>
    %372 = math.exp %371 : vector<1x32xf32>
    %cst_77 = arith.constant 1.000000e+00 : f32
    %373 = vector.broadcast %cst_77 : f32 to vector<1x32xf32>
    %374 = arith.addf %373, %372 : vector<1x32xf32>
    %375 = arith.divf %373, %374 : vector<1x32xf32>
    %376 = arith.mulf %293, %355 : vector<1x32xf32>
    %377 = arith.addf %366, %376 : vector<1x32xf32>
    %378 = arith.addf %377, %295 : vector<1x32xf32>
    %379 = arith.negf %378 : vector<1x32xf32>
    %380 = math.exp %379 : vector<1x32xf32>
    %cst_78 = arith.constant 1.000000e+00 : f32
    %381 = vector.broadcast %cst_78 : f32 to vector<1x32xf32>
    %382 = arith.addf %381, %380 : vector<1x32xf32>
    %383 = arith.divf %381, %382 : vector<1x32xf32>
    %384 = arith.mulf %375, %355 : vector<1x32xf32>
    %cst_79 = arith.constant 1.000000e+00 : f32
    %385 = vector.broadcast %cst_79 : f32 to vector<1x32xf32>
    %386 = arith.subf %385, %375 : vector<1x32xf32>
    %387 = arith.mulf %386, %364 : vector<1x32xf32>
    %388 = arith.addf %384, %387 : vector<1x32xf32>
    %389 = arith.mulf %383, %388 : vector<1x32xf32>
    %cst_80 = arith.constant 1.000000e+00 : f32
    %390 = vector.broadcast %cst_80 : f32 to vector<1x32xf32>
    %391 = arith.subf %390, %383 : vector<1x32xf32>
    %cst_81 = arith.constant 1.73205078 : f32
    %392 = vector.broadcast %cst_81 : f32 to vector<1x32xf32>
    %393 = arith.mulf %367, %392 : vector<1x32xf32>
    %394 = arith.mulf %391, %393 : vector<1x32xf32>
    %395 = arith.addf %389, %394 : vector<1x32xf32>
    %396 = vector.extract_strided_slice %287 {offsets = [3, 0], sizes = [1, 96], strides = [1, 1]} : vector<8x96xf32> to vector<1x96xf32>
    %397 = vector.extract_strided_slice %396 {offsets = [0, 0], sizes = [1, 32], strides = [1, 1]} : vector<1x96xf32> to vector<1x32xf32>
    %398 = vector.extract_strided_slice %396 {offsets = [0, 32], sizes = [1, 32], strides = [1, 1]} : vector<1x96xf32> to vector<1x32xf32>
    %399 = vector.extract_strided_slice %396 {offsets = [0, 64], sizes = [1, 32], strides = [1, 1]} : vector<1x96xf32> to vector<1x32xf32>
    %400 = vector.extract_strided_slice %284 {offsets = [3, 0], sizes = [1, 32], strides = [1, 1]} : vector<8x32xf32> to vector<1x32xf32>
    %401 = arith.mulf %292, %388 : vector<1x32xf32>
    %402 = arith.addf %398, %401 : vector<1x32xf32>
    %403 = arith.addf %402, %294 : vector<1x32xf32>
    %404 = arith.negf %403 : vector<1x32xf32>
    %405 = math.exp %404 : vector<1x32xf32>
    %cst_82 = arith.constant 1.000000e+00 : f32
    %406 = vector.broadcast %cst_82 : f32 to vector<1x32xf32>
    %407 = arith.addf %406, %405 : vector<1x32xf32>
    %408 = arith.divf %406, %407 : vector<1x32xf32>
    %409 = arith.mulf %293, %388 : vector<1x32xf32>
    %410 = arith.addf %399, %409 : vector<1x32xf32>
    %411 = arith.addf %410, %295 : vector<1x32xf32>
    %412 = arith.negf %411 : vector<1x32xf32>
    %413 = math.exp %412 : vector<1x32xf32>
    %cst_83 = arith.constant 1.000000e+00 : f32
    %414 = vector.broadcast %cst_83 : f32 to vector<1x32xf32>
    %415 = arith.addf %414, %413 : vector<1x32xf32>
    %416 = arith.divf %414, %415 : vector<1x32xf32>
    %417 = arith.mulf %408, %388 : vector<1x32xf32>
    %cst_84 = arith.constant 1.000000e+00 : f32
    %418 = vector.broadcast %cst_84 : f32 to vector<1x32xf32>
    %419 = arith.subf %418, %408 : vector<1x32xf32>
    %420 = arith.mulf %419, %397 : vector<1x32xf32>
    %421 = arith.addf %417, %420 : vector<1x32xf32>
    %422 = arith.mulf %416, %421 : vector<1x32xf32>
    %cst_85 = arith.constant 1.000000e+00 : f32
    %423 = vector.broadcast %cst_85 : f32 to vector<1x32xf32>
    %424 = arith.subf %423, %416 : vector<1x32xf32>
    %cst_86 = arith.constant 1.73205078 : f32
    %425 = vector.broadcast %cst_86 : f32 to vector<1x32xf32>
    %426 = arith.mulf %400, %425 : vector<1x32xf32>
    %427 = arith.mulf %424, %426 : vector<1x32xf32>
    %428 = arith.addf %422, %427 : vector<1x32xf32>
    %429 = vector.extract_strided_slice %287 {offsets = [4, 0], sizes = [1, 96], strides = [1, 1]} : vector<8x96xf32> to vector<1x96xf32>
    %430 = vector.extract_strided_slice %429 {offsets = [0, 0], sizes = [1, 32], strides = [1, 1]} : vector<1x96xf32> to vector<1x32xf32>
    %431 = vector.extract_strided_slice %429 {offsets = [0, 32], sizes = [1, 32], strides = [1, 1]} : vector<1x96xf32> to vector<1x32xf32>
    %432 = vector.extract_strided_slice %429 {offsets = [0, 64], sizes = [1, 32], strides = [1, 1]} : vector<1x96xf32> to vector<1x32xf32>
    %433 = vector.extract_strided_slice %284 {offsets = [4, 0], sizes = [1, 32], strides = [1, 1]} : vector<8x32xf32> to vector<1x32xf32>
    %434 = arith.mulf %292, %421 : vector<1x32xf32>
    %435 = arith.addf %431, %434 : vector<1x32xf32>
    %436 = arith.addf %435, %294 : vector<1x32xf32>
    %437 = arith.negf %436 : vector<1x32xf32>
    %438 = math.exp %437 : vector<1x32xf32>
    %cst_87 = arith.constant 1.000000e+00 : f32
    %439 = vector.broadcast %cst_87 : f32 to vector<1x32xf32>
    %440 = arith.addf %439, %438 : vector<1x32xf32>
    %441 = arith.divf %439, %440 : vector<1x32xf32>
    %442 = arith.mulf %293, %421 : vector<1x32xf32>
    %443 = arith.addf %432, %442 : vector<1x32xf32>
    %444 = arith.addf %443, %295 : vector<1x32xf32>
    %445 = arith.negf %444 : vector<1x32xf32>
    %446 = math.exp %445 : vector<1x32xf32>
    %cst_88 = arith.constant 1.000000e+00 : f32
    %447 = vector.broadcast %cst_88 : f32 to vector<1x32xf32>
    %448 = arith.addf %447, %446 : vector<1x32xf32>
    %449 = arith.divf %447, %448 : vector<1x32xf32>
    %450 = arith.mulf %441, %421 : vector<1x32xf32>
    %cst_89 = arith.constant 1.000000e+00 : f32
    %451 = vector.broadcast %cst_89 : f32 to vector<1x32xf32>
    %452 = arith.subf %451, %441 : vector<1x32xf32>
    %453 = arith.mulf %452, %430 : vector<1x32xf32>
    %454 = arith.addf %450, %453 : vector<1x32xf32>
    %455 = arith.mulf %449, %454 : vector<1x32xf32>
    %cst_90 = arith.constant 1.000000e+00 : f32
    %456 = vector.broadcast %cst_90 : f32 to vector<1x32xf32>
    %457 = arith.subf %456, %449 : vector<1x32xf32>
    %cst_91 = arith.constant 1.73205078 : f32
    %458 = vector.broadcast %cst_91 : f32 to vector<1x32xf32>
    %459 = arith.mulf %433, %458 : vector<1x32xf32>
    %460 = arith.mulf %457, %459 : vector<1x32xf32>
    %461 = arith.addf %455, %460 : vector<1x32xf32>
    %462 = vector.extract_strided_slice %287 {offsets = [5, 0], sizes = [1, 96], strides = [1, 1]} : vector<8x96xf32> to vector<1x96xf32>
    %463 = vector.extract_strided_slice %462 {offsets = [0, 0], sizes = [1, 32], strides = [1, 1]} : vector<1x96xf32> to vector<1x32xf32>
    %464 = vector.extract_strided_slice %462 {offsets = [0, 32], sizes = [1, 32], strides = [1, 1]} : vector<1x96xf32> to vector<1x32xf32>
    %465 = vector.extract_strided_slice %462 {offsets = [0, 64], sizes = [1, 32], strides = [1, 1]} : vector<1x96xf32> to vector<1x32xf32>
    %466 = vector.extract_strided_slice %284 {offsets = [5, 0], sizes = [1, 32], strides = [1, 1]} : vector<8x32xf32> to vector<1x32xf32>
    %467 = arith.mulf %292, %454 : vector<1x32xf32>
    %468 = arith.addf %464, %467 : vector<1x32xf32>
    %469 = arith.addf %468, %294 : vector<1x32xf32>
    %470 = arith.negf %469 : vector<1x32xf32>
    %471 = math.exp %470 : vector<1x32xf32>
    %cst_92 = arith.constant 1.000000e+00 : f32
    %472 = vector.broadcast %cst_92 : f32 to vector<1x32xf32>
    %473 = arith.addf %472, %471 : vector<1x32xf32>
    %474 = arith.divf %472, %473 : vector<1x32xf32>
    %475 = arith.mulf %293, %454 : vector<1x32xf32>
    %476 = arith.addf %465, %475 : vector<1x32xf32>
    %477 = arith.addf %476, %295 : vector<1x32xf32>
    %478 = arith.negf %477 : vector<1x32xf32>
    %479 = math.exp %478 : vector<1x32xf32>
    %cst_93 = arith.constant 1.000000e+00 : f32
    %480 = vector.broadcast %cst_93 : f32 to vector<1x32xf32>
    %481 = arith.addf %480, %479 : vector<1x32xf32>
    %482 = arith.divf %480, %481 : vector<1x32xf32>
    %483 = arith.mulf %474, %454 : vector<1x32xf32>
    %cst_94 = arith.constant 1.000000e+00 : f32
    %484 = vector.broadcast %cst_94 : f32 to vector<1x32xf32>
    %485 = arith.subf %484, %474 : vector<1x32xf32>
    %486 = arith.mulf %485, %463 : vector<1x32xf32>
    %487 = arith.addf %483, %486 : vector<1x32xf32>
    %488 = arith.mulf %482, %487 : vector<1x32xf32>
    %cst_95 = arith.constant 1.000000e+00 : f32
    %489 = vector.broadcast %cst_95 : f32 to vector<1x32xf32>
    %490 = arith.subf %489, %482 : vector<1x32xf32>
    %cst_96 = arith.constant 1.73205078 : f32
    %491 = vector.broadcast %cst_96 : f32 to vector<1x32xf32>
    %492 = arith.mulf %466, %491 : vector<1x32xf32>
    %493 = arith.mulf %490, %492 : vector<1x32xf32>
    %494 = arith.addf %488, %493 : vector<1x32xf32>
    %495 = vector.extract_strided_slice %287 {offsets = [6, 0], sizes = [1, 96], strides = [1, 1]} : vector<8x96xf32> to vector<1x96xf32>
    %496 = vector.extract_strided_slice %495 {offsets = [0, 0], sizes = [1, 32], strides = [1, 1]} : vector<1x96xf32> to vector<1x32xf32>
    %497 = vector.extract_strided_slice %495 {offsets = [0, 32], sizes = [1, 32], strides = [1, 1]} : vector<1x96xf32> to vector<1x32xf32>
    %498 = vector.extract_strided_slice %495 {offsets = [0, 64], sizes = [1, 32], strides = [1, 1]} : vector<1x96xf32> to vector<1x32xf32>
    %499 = vector.extract_strided_slice %284 {offsets = [6, 0], sizes = [1, 32], strides = [1, 1]} : vector<8x32xf32> to vector<1x32xf32>
    %500 = arith.mulf %292, %487 : vector<1x32xf32>
    %501 = arith.addf %497, %500 : vector<1x32xf32>
    %502 = arith.addf %501, %294 : vector<1x32xf32>
    %503 = arith.negf %502 : vector<1x32xf32>
    %504 = math.exp %503 : vector<1x32xf32>
    %cst_97 = arith.constant 1.000000e+00 : f32
    %505 = vector.broadcast %cst_97 : f32 to vector<1x32xf32>
    %506 = arith.addf %505, %504 : vector<1x32xf32>
    %507 = arith.divf %505, %506 : vector<1x32xf32>
    %508 = arith.mulf %293, %487 : vector<1x32xf32>
    %509 = arith.addf %498, %508 : vector<1x32xf32>
    %510 = arith.addf %509, %295 : vector<1x32xf32>
    %511 = arith.negf %510 : vector<1x32xf32>
    %512 = math.exp %511 : vector<1x32xf32>
    %cst_98 = arith.constant 1.000000e+00 : f32
    %513 = vector.broadcast %cst_98 : f32 to vector<1x32xf32>
    %514 = arith.addf %513, %512 : vector<1x32xf32>
    %515 = arith.divf %513, %514 : vector<1x32xf32>
    %516 = arith.mulf %507, %487 : vector<1x32xf32>
    %cst_99 = arith.constant 1.000000e+00 : f32
    %517 = vector.broadcast %cst_99 : f32 to vector<1x32xf32>
    %518 = arith.subf %517, %507 : vector<1x32xf32>
    %519 = arith.mulf %518, %496 : vector<1x32xf32>
    %520 = arith.addf %516, %519 : vector<1x32xf32>
    %521 = arith.mulf %515, %520 : vector<1x32xf32>
    %cst_100 = arith.constant 1.000000e+00 : f32
    %522 = vector.broadcast %cst_100 : f32 to vector<1x32xf32>
    %523 = arith.subf %522, %515 : vector<1x32xf32>
    %cst_101 = arith.constant 1.73205078 : f32
    %524 = vector.broadcast %cst_101 : f32 to vector<1x32xf32>
    %525 = arith.mulf %499, %524 : vector<1x32xf32>
    %526 = arith.mulf %523, %525 : vector<1x32xf32>
    %527 = arith.addf %521, %526 : vector<1x32xf32>
    %528 = vector.extract_strided_slice %287 {offsets = [7, 0], sizes = [1, 96], strides = [1, 1]} : vector<8x96xf32> to vector<1x96xf32>
    %529 = vector.extract_strided_slice %528 {offsets = [0, 0], sizes = [1, 32], strides = [1, 1]} : vector<1x96xf32> to vector<1x32xf32>
    %530 = vector.extract_strided_slice %528 {offsets = [0, 32], sizes = [1, 32], strides = [1, 1]} : vector<1x96xf32> to vector<1x32xf32>
    %531 = vector.extract_strided_slice %528 {offsets = [0, 64], sizes = [1, 32], strides = [1, 1]} : vector<1x96xf32> to vector<1x32xf32>
    %532 = vector.extract_strided_slice %284 {offsets = [7, 0], sizes = [1, 32], strides = [1, 1]} : vector<8x32xf32> to vector<1x32xf32>
    %533 = arith.mulf %292, %520 : vector<1x32xf32>
    %534 = arith.addf %530, %533 : vector<1x32xf32>
    %535 = arith.addf %534, %294 : vector<1x32xf32>
    %536 = arith.negf %535 : vector<1x32xf32>
    %537 = math.exp %536 : vector<1x32xf32>
    %cst_102 = arith.constant 1.000000e+00 : f32
    %538 = vector.broadcast %cst_102 : f32 to vector<1x32xf32>
    %539 = arith.addf %538, %537 : vector<1x32xf32>
    %540 = arith.divf %538, %539 : vector<1x32xf32>
    %541 = arith.mulf %293, %520 : vector<1x32xf32>
    %542 = arith.addf %531, %541 : vector<1x32xf32>
    %543 = arith.addf %542, %295 : vector<1x32xf32>
    %544 = arith.negf %543 : vector<1x32xf32>
    %545 = math.exp %544 : vector<1x32xf32>
    %cst_103 = arith.constant 1.000000e+00 : f32
    %546 = vector.broadcast %cst_103 : f32 to vector<1x32xf32>
    %547 = arith.addf %546, %545 : vector<1x32xf32>
    %548 = arith.divf %546, %547 : vector<1x32xf32>
    %549 = arith.mulf %540, %520 : vector<1x32xf32>
    %cst_104 = arith.constant 1.000000e+00 : f32
    %550 = vector.broadcast %cst_104 : f32 to vector<1x32xf32>
    %551 = arith.subf %550, %540 : vector<1x32xf32>
    %552 = arith.mulf %551, %529 : vector<1x32xf32>
    %553 = arith.addf %549, %552 : vector<1x32xf32>
    %554 = arith.mulf %548, %553 : vector<1x32xf32>
    %cst_105 = arith.constant 1.000000e+00 : f32
    %555 = vector.broadcast %cst_105 : f32 to vector<1x32xf32>
    %556 = arith.subf %555, %548 : vector<1x32xf32>
    %cst_106 = arith.constant 1.73205078 : f32
    %557 = vector.broadcast %cst_106 : f32 to vector<1x32xf32>
    %558 = arith.mulf %532, %557 : vector<1x32xf32>
    %559 = arith.mulf %556, %558 : vector<1x32xf32>
    %560 = arith.addf %554, %559 : vector<1x32xf32>
    %561 = tpu.concatenate %329, %362, %395, %428, %461, %494, %527, %560 in 0 : vector<1x32xf32>, vector<1x32xf32>, vector<1x32xf32>, vector<1x32xf32>, vector<1x32xf32>, vector<1x32xf32>, vector<1x32xf32>, vector<1x32xf32> -> vector<8x32xf32>
    %cst_107 = arith.constant 0.000000e+00 : f32
    %562 = vector.broadcast %cst_107 : f32 to vector<13x32xf32>
    %c0_108 = arith.constant 0 : index
    %c0_109 = arith.constant 0 : index
    %563 = vector.load %arg12[%c0_108, %c0_109] : memref<13x32xf32, #tpu.memory_space<vmem>>, vector<13x32xf32>
    tpu.vector_store %arg12[%c0_108, %c0_109], %562 {strides = array<i32>} : memref<13x32xf32, #tpu.memory_space<vmem>>, vector<13x32xf32>,
    %c2 = arith.constant 2 : index
    %c0_110 = arith.constant 0 : index
    %564 = vector.load %arg12[%c2, %c0_110] : memref<13x32xf32, #tpu.memory_space<vmem>>, vector<8x32xf32>
    tpu.vector_store %arg12[%c2, %c0_110], %561 {strides = array<i32>} : memref<13x32xf32, #tpu.memory_space<vmem>>, vector<8x32xf32>,
    %cst_111 = arith.constant 0.000000e+00 : f32
    %565 = vector.broadcast %cst_111 : f32 to vector<8x288xf32>
    %c0_112 = arith.constant 0 : index
    %c0_113 = arith.constant 0 : index
    %566 = vector.load %arg12[%c0_112, %c0_113] : memref<13x32xf32, #tpu.memory_space<vmem>>, vector<8x32xf32>
    %c0_114 = arith.constant 0 : index
    %c0_115 = arith.constant 0 : index
    %c0_116 = arith.constant 0 : index
    %567 = vector.load %arg7[%c0_114, %c0_115, %c0_116] : memref<6x32x288xf32, #tpu.memory_space<vmem>>, vector<1x32x288xf32>
    %568 = vector.shape_cast %567 : vector<1x32x288xf32> to vector<32x288xf32>
    %cst_117 = arith.constant dense<0.000000e+00> : vector<8x288xf32>
    %569 = tpu.matmul %566, %568, %cst_117 {dimension_numbers = #tpu.dot_dimension_numbers<[1], [0], [0], [1], [0, 0, 1, 1], [], []>} : vector<8x32xf32>, vector<32x288xf32>, vector<8x288xf32> -> vector<8x288xf32>
    %570 = arith.addf %565, %569 : vector<8x288xf32>
    %c1_118 = arith.constant 1 : index
    %c0_119 = arith.constant 0 : index
    %571 = vector.load %arg12[%c1_118, %c0_119] : memref<13x32xf32, #tpu.memory_space<vmem>>, vector<8x32xf32>
    %c1_120 = arith.constant 1 : index
    %c0_121 = arith.constant 0 : index
    %c0_122 = arith.constant 0 : index
    %572 = vector.load %arg7[%c1_120, %c0_121, %c0_122] : memref<6x32x288xf32, #tpu.memory_space<vmem>>, vector<1x32x288xf32>
    %573 = vector.shape_cast %572 : vector<1x32x288xf32> to vector<32x288xf32>
    %cst_123 = arith.constant dense<0.000000e+00> : vector<8x288xf32>
    %574 = tpu.matmul %571, %573, %cst_123 {dimension_numbers = #tpu.dot_dimension_numbers<[1], [0], [0], [1], [0, 0, 1, 1], [], []>} : vector<8x32xf32>, vector<32x288xf32>, vector<8x288xf32> -> vector<8x288xf32>
    %575 = arith.addf %570, %574 : vector<8x288xf32>
    %c2_124 = arith.constant 2 : index
    %c0_125 = arith.constant 0 : index
    %576 = vector.load %arg12[%c2_124, %c0_125] : memref<13x32xf32, #tpu.memory_space<vmem>>, vector<8x32xf32>
    %c2_126 = arith.constant 2 : index
    %c0_127 = arith.constant 0 : index
    %c0_128 = arith.constant 0 : index
    %577 = vector.load %arg7[%c2_126, %c0_127, %c0_128] : memref<6x32x288xf32, #tpu.memory_space<vmem>>, vector<1x32x288xf32>
    %578 = vector.shape_cast %577 : vector<1x32x288xf32> to vector<32x288xf32>
    %cst_129 = arith.constant dense<0.000000e+00> : vector<8x288xf32>
    %579 = tpu.matmul %576, %578, %cst_129 {dimension_numbers = #tpu.dot_dimension_numbers<[1], [0], [0], [1], [0, 0, 1, 1], [], []>} : vector<8x32xf32>, vector<32x288xf32>, vector<8x288xf32> -> vector<8x288xf32>
    %580 = arith.addf %575, %579 : vector<8x288xf32>
    %c3 = arith.constant 3 : index
    %c0_130 = arith.constant 0 : index
    %581 = vector.load %arg12[%c3, %c0_130] : memref<13x32xf32, #tpu.memory_space<vmem>>, vector<8x32xf32>
    %c3_131 = arith.constant 3 : index
    %c0_132 = arith.constant 0 : index
    %c0_133 = arith.constant 0 : index
    %582 = vector.load %arg7[%c3_131, %c0_132, %c0_133] : memref<6x32x288xf32, #tpu.memory_space<vmem>>, vector<1x32x288xf32>
    %583 = vector.shape_cast %582 : vector<1x32x288xf32> to vector<32x288xf32>
    %cst_134 = arith.constant dense<0.000000e+00> : vector<8x288xf32>
    %584 = tpu.matmul %581, %583, %cst_134 {dimension_numbers = #tpu.dot_dimension_numbers<[1], [0], [0], [1], [0, 0, 1, 1], [], []>} : vector<8x32xf32>, vector<32x288xf32>, vector<8x288xf32> -> vector<8x288xf32>
    %585 = arith.addf %580, %584 : vector<8x288xf32>
    %c4 = arith.constant 4 : index
    %c0_135 = arith.constant 0 : index
    %586 = vector.load %arg12[%c4, %c0_135] : memref<13x32xf32, #tpu.memory_space<vmem>>, vector<8x32xf32>
    %c4_136 = arith.constant 4 : index
    %c0_137 = arith.constant 0 : index
    %c0_138 = arith.constant 0 : index
    %587 = vector.load %arg7[%c4_136, %c0_137, %c0_138] : memref<6x32x288xf32, #tpu.memory_space<vmem>>, vector<1x32x288xf32>
    %588 = vector.shape_cast %587 : vector<1x32x288xf32> to vector<32x288xf32>
    %cst_139 = arith.constant dense<0.000000e+00> : vector<8x288xf32>
    %589 = tpu.matmul %586, %588, %cst_139 {dimension_numbers = #tpu.dot_dimension_numbers<[1], [0], [0], [1], [0, 0, 1, 1], [], []>} : vector<8x32xf32>, vector<32x288xf32>, vector<8x288xf32> -> vector<8x288xf32>
    %590 = arith.addf %585, %589 : vector<8x288xf32>
    %c5 = arith.constant 5 : index
    %c0_140 = arith.constant 0 : index
    %591 = vector.load %arg12[%c5, %c0_140] : memref<13x32xf32, #tpu.memory_space<vmem>>, vector<8x32xf32>
    %c5_141 = arith.constant 5 : index
    %c0_142 = arith.constant 0 : index
    %c0_143 = arith.constant 0 : index
    %592 = vector.load %arg7[%c5_141, %c0_142, %c0_143] : memref<6x32x288xf32, #tpu.memory_space<vmem>>, vector<1x32x288xf32>
    %593 = vector.shape_cast %592 : vector<1x32x288xf32> to vector<32x288xf32>
    %cst_144 = arith.constant dense<0.000000e+00> : vector<8x288xf32>
    %594 = tpu.matmul %591, %593, %cst_144 {dimension_numbers = #tpu.dot_dimension_numbers<[1], [0], [0], [1], [0, 0, 1, 1], [], []>} : vector<8x32xf32>, vector<32x288xf32>, vector<8x288xf32> -> vector<8x288xf32>
    %595 = arith.addf %590, %594 : vector<8x288xf32>
    %c0_145 = arith.constant 0 : index
    %c0_146 = arith.constant 0 : index
    %596 = vector.load %arg8[%c0_145, %c0_146] : memref<1x288xf32, #tpu.memory_space<vmem>>, vector<1x288xf32>
    %597 = vector.broadcast %596 : vector<1x288xf32> to vector<8x288xf32>
    %598 = arith.addf %595, %597 : vector<8x288xf32>
    %599 = math.tanh %598 : vector<8x288xf32>
    %cst_147 = arith.constant 0xFF800000 : f32
    %600 = vector.broadcast %cst_147 : f32 to vector<10x306xf32>
    %c0_148 = arith.constant 0 : index
    %c0_149 = arith.constant 0 : index
    %601 = vector.load %arg13[%c0_148, %c0_149] : memref<10x306xf32, #tpu.memory_space<vmem>>, vector<10x306xf32>
    tpu.vector_store %arg13[%c0_148, %c0_149], %600 {strides = array<i32>} : memref<10x306xf32, #tpu.memory_space<vmem>>, vector<10x306xf32>,
    %c1_150 = arith.constant 1 : index
    %c9 = arith.constant 9 : index
    %602 = vector.load %arg13[%c1_150, %c9] : memref<10x306xf32, #tpu.memory_space<vmem>>, vector<8x288xf32>
    tpu.vector_store %arg13[%c1_150, %c9], %599 {strides = array<i32>} : memref<10x306xf32, #tpu.memory_space<vmem>>, vector<8x288xf32>,
    %c0_151 = arith.constant 0 : index
    %c0_152 = arith.constant 0 : index
    %603 = vector.load %arg13[%c0_151, %c0_152] : memref<10x306xf32, #tpu.memory_space<vmem>>, vector<8x288xf32>
    %604 = arith.maximumf %599, %603 : vector<8x288xf32>
    %c0_153 = arith.constant 0 : index
    %c9_154 = arith.constant 9 : index
    %605 = vector.load %arg13[%c0_153, %c9_154] : memref<10x306xf32, #tpu.memory_space<vmem>>, vector<8x288xf32>
    %606 = arith.maximumf %604, %605 : vector<8x288xf32>
    %c0_155 = arith.constant 0 : index
    %c18 = arith.constant 18 : index
    %607 = vector.load %arg13[%c0_155, %c18] : memref<10x306xf32, #tpu.memory_space<vmem>>, vector<8x288xf32>
    %608 = arith.maximumf %606, %607 : vector<8x288xf32>
    %c1_156 = arith.constant 1 : index
    %c0_157 = arith.constant 0 : index
    %609 = vector.load %arg13[%c1_156, %c0_157] : memref<10x306xf32, #tpu.memory_space<vmem>>, vector<8x288xf32>
    %610 = arith.maximumf %608, %609 : vector<8x288xf32>
    %c1_158 = arith.constant 1 : index
    %c18_159 = arith.constant 18 : index
    %611 = vector.load %arg13[%c1_158, %c18_159] : memref<10x306xf32, #tpu.memory_space<vmem>>, vector<8x288xf32>
    %612 = arith.maximumf %610, %611 : vector<8x288xf32>
    %c2_160 = arith.constant 2 : index
    %c0_161 = arith.constant 0 : index
    %613 = vector.load %arg13[%c2_160, %c0_161] : memref<10x306xf32, #tpu.memory_space<vmem>>, vector<8x288xf32>
    %614 = arith.maximumf %612, %613 : vector<8x288xf32>
    %c2_162 = arith.constant 2 : index
    %c9_163 = arith.constant 9 : index
    %615 = vector.load %arg13[%c2_162, %c9_163] : memref<10x306xf32, #tpu.memory_space<vmem>>, vector<8x288xf32>
    %616 = arith.maximumf %614, %615 : vector<8x288xf32>
    %c2_164 = arith.constant 2 : index
    %c18_165 = arith.constant 18 : index
    %617 = vector.load %arg13[%c2_164, %c18_165] : memref<10x306xf32, #tpu.memory_space<vmem>>, vector<8x288xf32>
    %618 = arith.maximumf %616, %617 : vector<8x288xf32>
    %c0_166 = arith.constant 0 : index
    %c0_167 = arith.constant 0 : index
    %619 = vector.load %arg9[%c0_166, %c0_167] : memref<288x48xf32, #tpu.memory_space<vmem>>, vector<288x48xf32>
    %cst_168 = arith.constant dense<0.000000e+00> : vector<8x48xf32>
    %620 = tpu.matmul %618, %619, %cst_168 {dimension_numbers = #tpu.dot_dimension_numbers<[1], [0], [0], [1], [0, 0, 1, 1], [], []>} : vector<8x288xf32>, vector<288x48xf32>, vector<8x48xf32> -> vector<8x48xf32>
    %c0_169 = arith.constant 0 : index
    %c0_170 = arith.constant 0 : index
    %621 = vector.load %arg10[%c0_169, %c0_170] : memref<1x48xf32, #tpu.memory_space<vmem>>, vector<1x48xf32>
    %622 = vector.broadcast %621 : vector<1x48xf32> to vector<8x48xf32>
    %623 = arith.addf %620, %622 : vector<8x48xf32>
    %624 = arith.negf %623 : vector<8x48xf32>
    %625 = math.exp %624 : vector<8x48xf32>
    %cst_171 = arith.constant 1.000000e+00 : f32
    %626 = vector.broadcast %cst_171 : f32 to vector<8x48xf32>
    %627 = arith.addf %626, %625 : vector<8x48xf32>
    %628 = arith.divf %626, %627 : vector<8x48xf32>
    %629 = arith.mulf %628, %1 : vector<8x48xf32>
    %c0_172 = arith.constant 0 : index
    %c0_173 = arith.constant 0 : index
    %c0_174 = arith.constant 0 : index
    %630 = vector.load %arg11[%c0_172, %c0_173, %c0_174] : memref<1x8x48xf32, #tpu.memory_space<vmem>>, vector<1x8x48xf32>
    %631 = vector.shape_cast %630 : vector<1x8x48xf32> to vector<8x48xf32>
    %632 = vector.shape_cast %629 : vector<8x48xf32> to vector<1x8x48xf32>
    tpu.vector_store %arg11[%c0_172, %c0_173, %c0_174], %632 {strides = array<i32>} : memref<1x8x48xf32, #tpu.memory_space<vmem>>, vector<1x8x48xf32>,
    return
  }
  func.func @transform_0(%arg0: i32) -> (i32, i32, i32) {
    %c0_i32 = arith.constant 0 : i32
    %c0_i32_0 = arith.constant 0 : i32
    %c0_i32_1 = arith.constant 0 : i32
    return %arg0, %c0_i32, %c0_i32_0 : i32, i32, i32
  }
  func.func @transform_1(%arg0: i32) -> (i32, i32) {
    %c0_i32 = arith.constant 0 : i32
    %c0_i32_0 = arith.constant 0 : i32
    %c0_i32_1 = arith.constant 0 : i32
    return %c0_i32, %c0_i32_0 : i32, i32
  }
  func.func @transform_2(%arg0: i32) -> (i32, i32) {
    %c0_i32 = arith.constant 0 : i32
    %c0_i32_0 = arith.constant 0 : i32
    %c0_i32_1 = arith.constant 0 : i32
    return %c0_i32, %c0_i32_0 : i32, i32
  }
  func.func @transform_3(%arg0: i32) -> (i32, i32, i32) {
    %c0_i32 = arith.constant 0 : i32
    %c0_i32_0 = arith.constant 0 : i32
    %c0_i32_1 = arith.constant 0 : i32
    %c0_i32_2 = arith.constant 0 : i32
    return %c0_i32, %c0_i32_0, %c0_i32_1 : i32, i32, i32
  }
  func.func @transform_4(%arg0: i32) -> (i32, i32, i32) {
    %c0_i32 = arith.constant 0 : i32
    %c0_i32_0 = arith.constant 0 : i32
    %c0_i32_1 = arith.constant 0 : i32
    %c0_i32_2 = arith.constant 0 : i32
    return %c0_i32, %c0_i32_0, %c0_i32_1 : i32, i32, i32
  }
  func.func @transform_5(%arg0: i32) -> (i32, i32, i32) {
    %c0_i32 = arith.constant 0 : i32
    %c0_i32_0 = arith.constant 0 : i32
    %c0_i32_1 = arith.constant 0 : i32
    %c0_i32_2 = arith.constant 0 : i32
    return %c0_i32, %c0_i32_0, %c0_i32_1 : i32, i32, i32
  }
  func.func @transform_6(%arg0: i32) -> (i32, i32, i32) {
    %c0_i32 = arith.constant 0 : i32
    %c0_i32_0 = arith.constant 0 : i32
    %c0_i32_1 = arith.constant 0 : i32
    %c0_i32_2 = arith.constant 0 : i32
    return %c0_i32, %c0_i32_0, %c0_i32_1 : i32, i32, i32
  }
  func.func @transform_7(%arg0: i32) -> (i32, i32) {
    %c0_i32 = arith.constant 0 : i32
    %c0_i32_0 = arith.constant 0 : i32
    %c0_i32_1 = arith.constant 0 : i32
    return %c0_i32, %c0_i32_0 : i32, i32
  }
  func.func @transform_8(%arg0: i32) -> (i32, i32) {
    %c0_i32 = arith.constant 0 : i32
    %c0_i32_0 = arith.constant 0 : i32
    %c0_i32_1 = arith.constant 0 : i32
    return %c0_i32, %c0_i32_0 : i32, i32
  }
  func.func @transform_9(%arg0: i32) -> (i32, i32) {
    %c0_i32 = arith.constant 0 : i32
    %c0_i32_0 = arith.constant 0 : i32
    %c0_i32_1 = arith.constant 0 : i32
    return %c0_i32, %c0_i32_0 : i32, i32
  }
  func.func @transform_10(%arg0: i32) -> (i32, i32, i32) {
    %c0_i32 = arith.constant 0 : i32
    %c0_i32_0 = arith.constant 0 : i32
    %c0_i32_1 = arith.constant 0 : i32
    return %arg0, %c0_i32, %c0_i32_0 : i32, i32, i32
  }
}

</mosaic_0001>

<bundles_post_ra>
// kernel: tpu_custom_call.1
= control target key start
LH: loop header
LB: loop body
LE: loop exit
PB: predicated region body
PF: predicated region fallthrough
CT: control target
= control target key end

     0   :  { %s4636_s0 = inlined_call_operand.vmem [shape: f32[2,8,48], index: 0, kind: input, shape index: {}]   ;;  %s4637_s1 = inlined_call_operand.vmem [shape: f32[48,32], index: 1, kind: input, shape index: {}]   ;;  %s4638_s2 = inlined_call_operand.vmem [shape: f32[1,32], index: 2, kind: input, shape index: {}]   ;;  %s4639_s3 = inlined_call_operand.vmem [shape: f32[2,32,96], index: 3, kind: input, shape index: {}]   ;;  %s4640_s4 = inlined_call_operand.vmem [shape: f32[2,2,32], index: 4, kind: input, shape index: {}]   ;;  %s4641_s5 = inlined_call_operand.vmem [shape: f32[2,2,32], index: 5, kind: input, shape index: {}]   ;;  %s4642_s6 = inlined_call_operand.hbm [shape: f32[6,32,288], index: 6, kind: input, shape index: {}]   ;;  %s4643_s7 = inlined_call_operand.vmem [shape: f32[1,288], index: 7, kind: input, shape index: {}]   ;;  %s4644_s8 = inlined_call_operand.vmem [shape: f32[288,48], index: 8, kind: input, shape index: {}]   ;;  %s4645_s9 = inlined_call_operand.vmem [shape: f32[1,48], index: 9, kind: input, shape index: {}]   ;;  %s4646_s10 = inlined_call_operand.hbm [shape: f32[2,8,48], index: 10, kind: output, shape index: {}]  }
   0x1   :  { %4652 = sst [smem:[#allocation10_spill]] %s4636_s0 }
   0x2   :  { %15 = vsyncpa [#allocation5], 0 }
   0x3   :  { %16 = vsyncpa [#allocation6], 0 }
   0x4   :  { %18 = vsyncpa [#allocation6 + $0x1], 0  ;;  %s3792_s13 = smov 0   ;;  %s3794_s14 = smov 0  }
   0x5   :  { %s3796_s15 = smov 0   ;;  %s3798_s16 = smov 0  }
   0x6 LB: > { %s3813_s17 = sadd.s32 4294967295, %s3721_s16   ;;  %s2976_s18 = sadd.s32 4294967294, %s3721_s16   ;;  %s3721_s16 = sphi %s3798_s16, %s4667_s16   ;;  %s3717_s15 = sphi %s3796_s15, %s4666_s15   ;;  %s3713_s14 = sphi %s3794_s14, %s4665_s14   ;;  %s3709_s13 = sphi %s3792_s13, %s4664_s13  }
   0x7   : > { %s3817_s19 = sadd.s32 1, %s3721_s16   ;;  %s246_s20 = sadd.s32 1, %s3717_s15 }
   0x8   : > { %s243_s21 = ssub.s32 %s3721_s16, %s3817_s19  ;;  %p256_p0 = scmp.ne.s32.totalorder %s3717_s15, %s3713_s14 }
   0x9   : > { %p244_p1 = scmp.eq.s32.totalorder %s243_s21, 0  ;;  %p257_p2 = scmp.eq.s32.totalorder %s3813_s17, 1 }
   0xa   : > { %p262_p3 = scmp.ne.s32.totalorder %s3713_s14, %s3709_s13  ;;  %p263_p4 = scmp.eq.s32.totalorder %s2976_s18, 1 }
   0xb   : > { %s3828_s22 = scalar_select %p244_p1, %s3717_s15, %s246_s20  }
   0xc   : > { %p3830_p5 = por %p257_p2, %p256_p0  ;;  %p3834_p6 = por %p263_p4, %p262_p3 }
   0xd   : > { %p2977_p7 = scmp.ge.s32.totalorder %s3721_s16, 1  ;;  %p270_p8 = scmp.lt.s32.totalorder %s3721_s16, 3 }
   0xe   : > { %s4653_s23 = scalar_select %p3830_p5, 1, 0 }
   0xf   : > { %s4654_s24 = scalar_select %p3834_p6, 1, 0 }
  0x10   : > { %p4647_p9 = scmp.eq.s32.totalorder %s3813_s17, 0  ;;  %p3841_p10 = pnand %p2977_p7, %p270_p8 }
  0x11   : > { %s3723_s26 = smov [#allocation4]   ;;  %s3627_s11 = scalar_lea.hbm %s4642_s6, 9216 }
  0x12   : > { %s4655_s25 = scalar_select %p3841_p10, 1, 0 }
  0x13   : > { %s297_s27 = sshll.u32 %s3723_s26, 4  ;;  %p3405_p11 = pneg %p3841_p10  ;;  %s298_s27 = int_to_ptr.vmem [resolvable:$true] %s297_s27 }
  0x14   : > { %p3628_p13 = scmp.ne.s32.totalorder %s4642_s6, %s3627_s11  ;;  %p3634_p3 = scmp.lt.u32.totalorder %s3627_s11, %s4642_s6 }
  0x15   : > { %p3849_p12 = pnand %p4647_p9, %p3405_p11 }
  0x17   : > { %p3629_p0 = pneg %p3849_p12 }
  0x19   : > { %p3630_p1 = pnand %p3629_p0, %p3628_p13 }
  0x1b   : > { %p3631_p2 = pneg %p3630_p1 }
  0x1d   : > { %p3636_p4 = pnand %p3634_p3, %p3631_p2 }
  0x1f   : > { %3639 = shalt.err (!%p3636_p4)
}
  0x20   : > { %s3640_s26 = scalar_lea.vmem %s298_s27, 9216  ;;  %p3648_p9 = scmp.lt.s32.totalorder %s298_s27, %s298_s27 }
  0x21   : > { %p3641_p7 = scmp.ne.s32.totalorder %s298_s27, %s3640_s26  ;;  %p3649_p6 = scmp.lt.s32.totalorder %s3640_s26, %s3640_s26 }
  0x23   : > { %p3643_p8 = pnand %p3641_p7, %p3629_p0  ;;  %p3650_p5 = por %p3649_p6, %p3648_p9 }
  0x25   : > { %p3644_p11 = pneg %p3643_p8 }
  0x27   : > { %p3651_p10 = pnand %p3650_p5, %p3644_p11 }
  0x29   : > { %3654 = shalt.err (!%p3651_p10)
}
  0x2a   : > { %s3724_s29 = smov 384   ;;  %s3725_s30 = smov 24  }
  0x2b   : > { %3408 = dma.hbm_to_vmem [thread:$0]  (!%p3849_p12), %s4642_s6, 9216, %s298_s27, [#allocation5], %s3724_s29, %s3724_s29, %s3725_s30  }
  0x2c   : > { %p4657_p13 = scmp.ne.s32.totalorder %s4655_s25, 0 }
  0x2d   : > { %p4658_p1 = scmp.eq.s32.totalorder (!%p4657_p13), %s3813_s17, 0 }
  0x2e   : > { %329 = sbr.rel (%p4657_p13) target bundleno = 6033 (0x1791), region = 60 }
  0x35   : > { %3700 = dma.done.wait (%p4658_p1), [#allocation5], 9216   ;;  %p4659_p0 = pmov %p4658_p1 }
  0x36   : > { %v3726_v0 = vmov 0.0|0.0   ;;  %vm3727_vm0 = vmmov 0   ;;  %v3728_v1 = vmov 0.0   ;;  %p366_p5 = scmp.lt.s32.totalorder %s3813_s17, 1  ;;  %v371_v2 = vld [vmem:[%s4637_s1] sm:$0xff]  ;;  %v372_v3 = vld [vmem:[%s4637_s1 + $0x8] sm:$0xff] }
  0x37   : > { %3702 = vsyncadd (%p4659_p0), [#allocation5], 4294958080  ;;  %3246 = vmatprep.subr.bf16.mxu1 %v3726_v0  ;;  %3144 = vmatprep.mubr.msk.f32.mxu1 %vm3727_vm0, %v3728_v1  ;;  %v373_v4 = vld [vmem:[%s4637_s1 + $0x10] sm:$0xff]  ;;  %v3247_v5 = vpack.c.bf16 %v372_v3, %v371_v2  ;;  %v374_v6 = vld [vmem:[%s4637_s1 + $0x18] sm:$0xff]  ;;  %s4660_s0 = sld [smem:[#allocation10_spill]]  ;;  %vm384_vm1 = vcmask 392192  }
  0x38   : > { %1638 = vmatprep.mubr.f32.mxu0 %v3728_v1  ;;  %s367_s30 = scalar_select %p366_p5, %s3813_s17, 1  ;;  %v3250_v7 = vpack.c.bf16 %v374_v6, %v373_v4  ;;  %v375_v8 = vld [vmem:[%s4637_s1 + $0x20] sm:$0xff]  ;;  %v376_v9 = vld [vmem:[%s4637_s1 + $0x28] sm:$0xff]  ;;  %v461_v14 = vld [vmem:[%s4639_s3 + $0x10] sm:$0xff]  ;;  %vm463_vm2 = vcmask 261120   ;;  %vm987_vm3 = vcmask 1040384  }
  0x39   : > { %3248 = vmatpush3.bf16.msra.mxu1 %v3247_v5  ;;  %v3253_v10 = vpack.c.bf16 %v376_v9, %v375_v8  ;;  %v459_v12 = vld [vmem:[%s4639_s3] sm:$0xff]  ;;  %v460_v13 = vld [vmem:[%s4639_s3 + $0x8] sm:$0xff]  ;;  %v462_v16 = vld [vmem:[%s4639_s3 + $0x18] sm:$0xff]  ;;  %1536 = vst.msk [vmem:[#allocation2] sm:$0xff] %vm463_vm2, %v3728_v1  ;;  %s3729_s26 = smov 32   ;;  %s4650_s25 = smov 96  }
  0x3a   : > { %3249 = vmatprep.subr.bf16.mxu1 %v3726_v0  ;;  %s2983_s28 = sshll.u32 %s367_s30, 3  ;;  %v3256_v15 = vpack.c.bf16 %v460_v13, %v459_v12  ;;  %v3259_v17 = vpack.c.bf16 %v462_v16, %v461_v14  ;;  %v3930_v18 = vld [vmem:[%s4640_s4] sm:$0x3]  ;;  %s3731_s27 = smov 64   ;;  %vm989_vm4 = vcmask 1041408   ;;  %vm991_vm5 = vcmask 1042432  }
  0x3b   : > { %v3933_v19 = vmul.f32 0.0, %v3930_v18  ;;  %v3940_v20 = vld [vmem:[%s4641_s5] sm:$0x3]  ;;  %vm993_vm6 = vcmask 1043456   ;;  %vm995_vm7 = vcmask 1044480   ;;  %vm997_vm8 = vcmask 1045504  }
  0x3c   : > { %v2984_v21 = vld [vmem:[%s4638_s2] ss:$0 sm:$0xff]  ;;  %v603_v41 = vrot.slane %v3940_v20, 7  ;;  %v658_v59 = vrot.slane %v3940_v20, 6  ;;  %vm999_vm9 = vcmask 1046528   ;;  %s4661_s29 = smov 96  }
  0x3d   : > { %3251 = vmatpush3.bf16.msra.mxu1 %v3250_v7  ;;  %s3904_s21 = scalar_lea.vmem %s4660_s0, %s2983_s28  ;;  %541 = vrot.lane.b32.xlu0 %v3933_v19, %s3729_s26  ;;  %vm1537_vm10 = vcmask 258048   ;;  %vm2528_vm11 = vcmask 408576   ;;  %vm2532_vm12 = vcmask 402432   ;;  %s3733_s30 = smov 9   ;;  %vm2552_vm13 = vcmask 1047625  }
  0x3e   : > { %3252 = vmatprep.subr.bf16.mxu1 %v3726_v0  ;;  %v370_v11 = vld [vmem:[%s3904_s21] sm:$0xff]  ;;  %1538 = vst.msk [vmem:[#allocation2 + $0x8] sm:$0x1f] %vm1537_vm10, %v3728_v1  ;;  %vm2557_vm14 = vcmask 1040456   ;;  %vm2546_vm15 = vcmask 72704   ;;  %s3734_s12 = smov 119  }
  0x3f   : > { %s3735_s20 = smov 110   ;;  %s363_s18 = sand.u32 1, %s3713_s14  }
  0x40   : > { %s3042_s28 = sshll.u32 %s3813_s17, 7  ;;  %p4662_p9 = scmp.ne.s32.totalorder %s4653_s23, 0 }
  0x41   : > { %3254 = vmatpush3.bf16.msra.mxu1 %v3253_v10  ;;  %546 = vrot.lane.b32.xlu0 %v3940_v20, %s3729_s26  ;;  %s3736_s17 = smov [#allocation7]  }
  0x42   : > { %3255 = vmatprep.subr.bf16.mxu1 %v3726_v0 }
  0x44   : > { %3145 = vmatmul.mubr.msk.f32.vlgmr.msra.gmra.mrb[0].mxu1 %vm384_vm1, %v370_v11 }
  0x45   : > { %3155 = vmatprep.mubr.msk.f32.mxu1 %vm3727_vm0, %v3728_v1  ;;  %3257 = vmatpush3.bf16.msra.mxu1 %v3256_v15  ;;  %v714_v15 = vrot.slane %v3940_v20, 5 }
  0x46   : > { %3258 = vmatprep.subr.bf16.mxu1 %v3726_v0 }
  0x49   : > { %3260 = vmatpush3.bf16.msra.mxu1 %v3259_v17 }
  0x4a   : > { %3261 = vmatprep.subr.bf16.mxu1 %v3726_v0 }
  0xaf   : > { %v542_v28 = vpop.permute.xlu0 %541 }
  0xb3   : > { %v547_v30 = vpop.permute.xlu0 %546 }
 0x117   : > { %v454_v22 = vpop.f32.mrb[0].mxu1 }
 0x118   : > { %v455_v23 = vadd.f32 %v2984_v21, %v454_v22  ;;  %v3146_v24 = vpop.f32.mrb[1].mxu1 }
 0x11a   : > { %3486 = vtanh.f32 %v455_v23 }
 0x124   : > { %v3947_v25 = vpop.eup %3486 }
 0x125   : > { %3156 = vmatmul.mubr.msk.f32.vlgmr.msra.gmra.mrb[2].mxu1 %vm463_vm2, %v3947_v25 }
 0x126   : > { %3166 = vmatprep.mubr.msk.f32.mxu1 %vm3727_vm0, %v3728_v1 }
 0x1f8   : > { %v3953_v26 = vpop.f32.mrb[2].mxu1 }
 0x1f9   : > { %575 = vrot.lane.b32.xlu1 %v3953_v26, %s3729_s26  ;;  %v3157_v27 = vpop.f32.mrb[3].mxu1  ;;  %v544_v29 = vadd.f32 %v542_v28, %v3953_v26 }
 0x1fb   : > { %v549_v31 = vadd.f32 %v547_v30, %v544_v29 }
 0x1fd   : > { %v2987_v32 = vmul.f32 -1.442695, %v549_v31 }
 0x1ff   : > { %3488 = vpow2.f32 %v2987_v32 }
 0x209   : > { %v3489_v33 = vpop.eup %3488 }
 0x20a   : > { %v553_v34 = vadd.f32 1.0, %v3489_v33 }
 0x20c   : > { %3490 = vrcp.f32 %v553_v34 }
 0x216   : > { %v3491_v35 = vpop.eup %3490 }
 0x217   : > { %v573_v36 = vsub.f32 1.0, %v3491_v35  ;;  %v572_v38 = vmul.f32 0.0, %v3491_v35 }
 0x26b   : > { %v3958_v37 = vpop.permute.xlu1 %575 }
 0x26c   : > { %v578_v39 = vmul.f32 %v3958_v37, %v573_v36 }
 0x26e   : > { %v3961_v40 = vadd.f32 %v578_v39, %v572_v38  ;;  %v771_v39 = vrot.slane %v3940_v20, 4 }
 0x270   : > { %593 = vrot.lane.b32.xlu1 %v3961_v40, %s4650_s25  ;;  %v614_v53 = vrot.slane %v3961_v40, 7 }
 0x274   : > { %604 = vrot.lane.b32.xlu1 %v603_v41, %s3729_s26 }
 0x2e2   : > { %v594_v42 = vpop.permute.xlu1 %593 }
 0x2e3   : > { %v596_v43 = vmul.f32 %v594_v42, %v3930_v18 }
 0x2e5   : > { %v598_v44 = vrot.slane %v596_v43, 7 }
 0x2e6   : > { %v605_v46 = vpop.permute.xlu1 %604 }
 0x2e7   : > { %599 = vrot.lane.b32.xlu0 %v598_v44, %s3729_s26 }
 0x359   : > { %v600_v45 = vpop.permute.xlu0 %599 }
 0x35a   : > { %v602_v47 = vadd.f32 %v600_v45, %v3953_v26 }
 0x35c   : > { %v607_v48 = vadd.f32 %v605_v46, %v602_v47 }
 0x35e   : > { %v2989_v49 = vmul.f32 -1.442695, %v607_v48 }
 0x360   : > { %3492 = vpow2.f32 %v2989_v49 }
 0x36a   : > { %v3493_v50 = vpop.eup %3492 }
 0x36b   : > { %v611_v51 = vadd.f32 1.0, %v3493_v50 }
 0x36d   : > { %3494 = vrcp.f32 %v611_v51 }
 0x377   : > { %v3495_v52 = vpop.eup %3494 }
 0x378   : > { %v636_v54 = vsub.f32 1.0, %v3495_v52  ;;  %v635_v55 = vmul.f32 %v3495_v52, %v614_v53 }
 0x37a   : > { %v637_v56 = vmul.f32 %v636_v54, %v3958_v37 }
 0x37c   : > { %v3976_v57 = vadd.f32 %v637_v56, %v635_v55 }
 0x37e   : > { %v647_v58 = vrot.slane %v3976_v57, 1  ;;  %v689_v9 = vrot.slane %v3976_v57, 7 }
 0x380   : > { %648 = vrot.lane.b32.xlu0 %v647_v58, %s4650_s25 }
 0x384   : > { %659 = vrot.lane.b32.xlu0 %v658_v59, %s3729_s26 }
 0x3f2   : > { %v649_v60 = vpop.permute.xlu0 %648 }
 0x3f3   : > { %v651_v61 = vmul.f32 %v649_v60, %v3930_v18 }
 0x3f5   : > { %v653_v62 = vrot.slane %v651_v61, 6 }
 0x3f6   : > { %v660_v2 = vpop.permute.xlu0 %659 }
 0x3f7   : > { %654 = vrot.lane.b32.xlu1 %v653_v62, %s3729_s26  ;;  %v828_v62 = vrot.slane %v3940_v20, 3 }
 0x469   : > { %v655_v63 = vpop.permute.xlu1 %654 }
 0x46a   : > { %v657_v3 = vadd.f32 %v655_v63, %v3953_v26 }
 0x46c   : > { %v662_v4 = vadd.f32 %v660_v2, %v657_v3 }
 0x46e   : > { %v2991_v5 = vmul.f32 -1.442695, %v662_v4 }
 0x470   : > { %3496 = vpow2.f32 %v2991_v5 }
 0x47a   : > { %v3497_v6 = vpop.eup %3496 }
 0x47b   : > { %v666_v7 = vadd.f32 1.0, %v3497_v6 }
 0x47d   : > { %3498 = vrcp.f32 %v666_v7 }
 0x487   : > { %v3499_v8 = vpop.eup %3498 }
 0x488   : > { %v692_v10 = vsub.f32 1.0, %v3499_v8  ;;  %v691_v11 = vmul.f32 %v3499_v8, %v689_v9 }
 0x48a   : > { %v693_v12 = vmul.f32 %v692_v10, %v3958_v37 }
 0x48c   : > { %v3989_v13 = vadd.f32 %v693_v12, %v691_v11 }
 0x48e   : > { %v703_v14 = vrot.slane %v3989_v13, 2  ;;  %v746_v32 = vrot.slane %v3989_v13, 7 }
 0x490   : > { %704 = vrot.lane.b32.xlu1 %v703_v14, %s4650_s25 }
 0x494   : > { %715 = vrot.lane.b32.xlu1 %v714_v15, %s3729_s26 }
 0x502   : > { %v705_v16 = vpop.permute.xlu1 %704 }
 0x503   : > { %v707_v17 = vmul.f32 %v705_v16, %v3930_v18 }
 0x505   : > { %v709_v21 = vrot.slane %v707_v17, 5 }
 0x506   : > { %v716_v23 = vpop.permute.xlu1 %715 }
 0x507   : > { %710 = vrot.lane.b32.xlu0 %v709_v21, %s3729_s26 }
 0x579   : > { %v711_v22 = vpop.permute.xlu0 %710 }
 0x57a   : > { %v713_v24 = vadd.f32 %v711_v22, %v3953_v26 }
 0x57c   : > { %v718_v27 = vadd.f32 %v716_v23, %v713_v24  ;;  %v885_v23 = vrot.slane %v3940_v20, 2  ;;  %v725_v24 = vrot.slane %v3989_v13, 1 }
 0x57e   : > { %v2993_v28 = vmul.f32 -1.442695, %v718_v27 }
 0x580   : > { %3500 = vpow2.f32 %v2993_v28 }
 0x58a   : > { %v3501_v29 = vpop.eup %3500 }
 0x58b   : > { %v722_v30 = vadd.f32 1.0, %v3501_v29 }
 0x58d   : > { %3502 = vrcp.f32 %v722_v30 }
 0x597   : > { %v3503_v31 = vpop.eup %3502 }
 0x598   : > { %v749_v33 = vsub.f32 1.0, %v3503_v31  ;;  %v748_v34 = vmul.f32 %v3503_v31, %v746_v32 }
 0x59a   : > { %v750_v35 = vmul.f32 %v749_v33, %v3958_v37 }
 0x59c   : > { %v4002_v36 = vadd.f32 %v750_v35, %v748_v34 }
 0x59e   : > { %v760_v38 = vrot.slane %v4002_v36, 3  ;;  %v803_v54 = vrot.slane %v4002_v36, 7 }
 0x5a0   : > { %761 = vrot.lane.b32.xlu0 %v760_v38, %s4650_s25 }
 0x5a4   : > { %772 = vrot.lane.b32.xlu0 %v771_v39, %s3729_s26 }
 0x612   : > { %v762_v42 = vpop.permute.xlu0 %761 }
 0x613   : > { %v764_v43 = vmul.f32 %v762_v42, %v3930_v18 }
 0x615   : > { %v766_v44 = vrot.slane %v764_v43, 4 }
 0x616   : > { %v773_v46 = vpop.permute.xlu0 %772 }
 0x617   : > { %767 = vrot.lane.b32.xlu1 %v766_v44, %s3729_s26 }
 0x689   : > { %v768_v45 = vpop.permute.xlu1 %767 }
 0x68a   : > { %v770_v47 = vadd.f32 %v768_v45, %v3953_v26 }
 0x68c   : > { %v775_v48 = vadd.f32 %v773_v46, %v770_v47 }
 0x68e   : > { %v2995_v49 = vmul.f32 -1.442695, %v775_v48 }
 0x690   : > { %3504 = vpow2.f32 %v2995_v49 }
 0x69a   : > { %v3505_v50 = vpop.eup %3504 }
 0x69b   : > { %v779_v51 = vadd.f32 1.0, %v3505_v50  ;;  %v782_v50 = vrot.slane %v4002_v36, 2 }
 0x69d   : > { %3506 = vrcp.f32 %v779_v51 }
 0x6a7   : > { %v3507_v52 = vpop.eup %3506 }
 0x6a8   : > { %v806_v55 = vsub.f32 1.0, %v3507_v52  ;;  %v805_v56 = vmul.f32 %v3507_v52, %v803_v54 }
 0x6aa   : > { %v807_v58 = vmul.f32 %v806_v55, %v3958_v37  ;;  %v556_v55 = vrot.slane %v3933_v19, 1 }
 0x6ac   : > { %v4015_v60 = vadd.f32 %v807_v58, %v805_v56 }
 0x6ae   : > { %v817_v61 = vrot.slane %v4015_v60, 4  ;;  %v860_v12 = vrot.slane %v4015_v60, 7  ;;  %v839_v27 = vrot.slane %v4015_v60, 3 }
 0x6b0   : > { %818 = vrot.lane.b32.xlu1 %v817_v61, %s4650_s25 }
 0x6b4   : > { %829 = vrot.lane.b32.xlu1 %v828_v62, %s3729_s26 }
 0x722   : > { %v819_v63 = vpop.permute.xlu1 %818 }
 0x723   : > { %v821_v2 = vmul.f32 %v819_v63, %v3930_v18 }
 0x725   : > { %v823_v3 = vrot.slane %v821_v2, 3 }
 0x726   : > { %v830_v5 = vpop.permute.xlu1 %829 }
 0x727   : > { %824 = vrot.lane.b32.xlu0 %v823_v3, %s3729_s26 }
 0x799   : > { %v825_v4 = vpop.permute.xlu0 %824 }
 0x79a   : > { %v827_v6 = vadd.f32 %v825_v4, %v3953_v26 }
 0x79c   : > { %v832_v7 = vadd.f32 %v830_v5, %v827_v6 }
 0x79e   : > { %v2997_v8 = vmul.f32 -1.442695, %v832_v7 }
 0x7a0   : > { %3508 = vpow2.f32 %v2997_v8 }
 0x7aa   : > { %v3509_v9 = vpop.eup %3508 }
 0x7ab   : > { %v836_v10 = vadd.f32 1.0, %v3509_v9 }
 0x7ad   : > { %3510 = vrcp.f32 %v836_v10 }
 0x7b7   : > { %v3511_v11 = vpop.eup %3510 }
 0x7b8   : > { %v863_v14 = vsub.f32 1.0, %v3511_v11  ;;  %v862_v16 = vmul.f32 %v3511_v11, %v860_v12  ;;  %v586_v11 = vmul.f32 1.7320508, %v3947_v25 }
 0x7ba   : > { %v864_v17 = vmul.f32 %v863_v14, %v3958_v37 }
 0x7bc   : > { %v865_v21 = vadd.f32 %v864_v17, %v862_v16 }
 0x7be   : > { %v874_v22 = vrot.slane %v865_v21, 5  ;;  %v917_v44 = vrot.slane %v865_v21, 7  ;;  %v896_v51 = vrot.slane %v865_v21, 4 }
 0x7c0   : > { %875 = vrot.lane.b32.xlu0 %v874_v22, %s4650_s25 }
 0x7c4   : > { %886 = vrot.lane.b32.xlu0 %v885_v23, %s3729_s26 }
 0x7c8   : > { %669 = vrot.lane.b32.xlu0 %v3976_v57, %s4650_s25 }
 0x7cc   : > { %726 = vrot.lane.b32.xlu0 %v725_v24, %s4650_s25  ;;  %v3006_v24 = vld [vmem:[%s4639_s3 + $0x38] sm:$0xff] }
 0x7d0   : > { %840 = vrot.lane.b32.xlu0 %v839_v27, %s4650_s25 }
 0x832   : > { %v876_v28 = vpop.permute.xlu0 %875 }
 0x833   : > { %v878_v29 = vmul.f32 %v876_v28, %v3930_v18 }
 0x835   : > { %v880_v30 = vrot.slane %v878_v29, 2 }
 0x836   : > { %v887_v33 = vpop.permute.xlu0 %886 }
 0x837   : > { %881 = vrot.lane.b32.xlu1 %v880_v30, %s3729_s26 }
 0x83a   : > { %v670_v54 = vpop.permute.xlu0 %669 }
 0x83b   : > { %v672_v56 = vmul.f32 %v670_v54, %v3930_v18 }
 0x83e   : > { %v727_v58 = vpop.permute.xlu0 %726 }
 0x842   : > { %v841_v63 = vpop.permute.xlu0 %840 }
 0x843   : > { %v843_v3 = vmul.f32 %v841_v63, %v3930_v18 }
 0x845   : > { %v845_v5 = vrot.slane %v843_v3, 4 }
 0x8a9   : > { %v882_v31 = vpop.permute.xlu1 %881 }
 0x8aa   : > { %v884_v32 = vadd.f32 %v882_v31, %v3953_v26 }
 0x8ac   : > { %v889_v34 = vadd.f32 %v887_v33, %v884_v32 }
 0x8ae   : > { %v2999_v35 = vmul.f32 -1.442695, %v889_v34 }
 0x8b0   : > { %3512 = vpow2.f32 %v2999_v35 }
 0x8ba   : > { %v3513_v38 = vpop.eup %3512 }
 0x8bb   : > { %v893_v42 = vadd.f32 1.0, %v3513_v38 }
 0x8bd   : > { %3514 = vrcp.f32 %v893_v42 }
 0x8c7   : > { %v3515_v43 = vpop.eup %3514 }
 0x8c8   : > { %v920_v45 = vsub.f32 1.0, %v3515_v43  ;;  %v919_v46 = vmul.f32 %v3515_v43, %v917_v44 }
 0x8ca   : > { %v921_v47 = vmul.f32 %v920_v45, %v3958_v37 }
 0x8cc   : > { %v4043_v48 = vadd.f32 %v921_v47, %v919_v46 }
 0x8ce   : > { %v931_v49 = vrot.slane %v4043_v48, 6  ;;  %v952_v52 = vrot.slane %v4043_v48, 5  ;;  %v973_v27 = vrot.slane %v4043_v48, 7 }
 0x8d0   : > { %932 = vrot.lane.b32.xlu1 %v931_v49, %s4650_s25 }
 0x8d4   : > { %615 = vrot.lane.b32.xlu1 %v614_v53, %s4650_s25  ;;  %v674_v53 = vrot.slane %v672_v56, 7 }
 0x8d8   : > { %783 = vrot.lane.b32.xlu1 %v782_v50, %s4650_s25 }
 0x8dc   : > { %897 = vrot.lane.b32.xlu1 %v896_v51, %s4650_s25 }
 0x8e0   : > { %953 = vrot.lane.b32.xlu1 %v952_v52, %s4650_s25  ;;  %s2982_s25 = sshll.u32 %s363_s18, 3 }
 0x8e1   : > { %s365_s11 = scalar_lea.vmem [#allocation7], %s2982_s25 }
 0x8e4   : > { %557 = vrot.lane.b32.xlu1 %v556_v55, %s3731_s27 }
 0x8e8   : > { %675 = vrot.lane.b32.xlu1 %v674_v53, %s3731_s27 }
 0x8ec   : > { %624 = vrot.lane.b32.xlu1 %v3940_v20, %s3731_s27 }
 0x8f0   : > { %679 = vrot.lane.b32.xlu1 %v603_v41, %s3731_s27 }
 0x8f4   : > { %736 = vrot.lane.b32.xlu1 %v658_v59, %s3731_s27 }
 0x8f8   : > { %793 = vrot.lane.b32.xlu1 %v714_v15, %s3731_s27  ;;  %v561_v15 = vrot.slane %v3940_v20, 1 }
 0x8fc   : > { %850 = vrot.lane.b32.xlu1 %v771_v39, %s3731_s27 }
 0x900   : > { %907 = vrot.lane.b32.xlu1 %v828_v62, %s3731_s27 }
 0x904   : > { %581 = vrot.lane.b32.xlu1 %v3961_v40, %s3729_s26 }
 0x908   : > { %640 = vrot.lane.b32.xlu1 %v3976_v57, %s3729_s26  ;;  %v729_v57 = vmul.f32 %v727_v58, %v3930_v18 }
 0x90a   : > { %v731_v61 = vrot.slane %v729_v57, 6 }
 0x90c   : > { %753 = vrot.lane.b32.xlu1 %v4002_v36, %s3729_s26 }
 0x910   : > { %867 = vrot.lane.b32.xlu1 %v865_v21, %s3729_s26  ;;  %v3005_v21 = vld [vmem:[%s4639_s3 + $0x30] sm:$0xff] }
 0x911   : > { %v3265_v29 = vpack.c.bf16 %v3006_v24, %v3005_v21 }
 0x942   : > { %v933_v19 = vpop.permute.xlu1 %932 }
 0x943   : > { %v935_v41 = vmul.f32 %v933_v19, %v3930_v18 }
 0x945   : > { %v937_v59 = vrot.slane %v935_v41, 1 }
 0x946   : > { %v616_v39 = vpop.permute.xlu1 %615 }
 0x947   : > { %938 = vrot.lane.b32.xlu0 %v937_v59, %s3729_s26  ;;  %v618_v40 = vmul.f32 %v616_v39, %v3930_v18 }
 0x94a   : > { %v784_v36 = vpop.permute.xlu1 %783 }
 0x94b   : > { %942 = vrot.lane.b32.xlu0 %v561_v15, %s3729_s26  ;;  %v786_v62 = vmul.f32 %v784_v36, %v3930_v18 }
 0x94d   : > { %v788_v4 = vrot.slane %v786_v62, 5 }
 0x94e   : > { %v898_v2 = vpop.permute.xlu1 %897 }
 0x94f   : > { %620 = vrot.lane.b32.xlu0 %v618_v40, %s3731_s27  ;;  %v900_v6 = vmul.f32 %v898_v2, %v3930_v18 }
 0x951   : > { %v902_v8 = vrot.slane %v900_v6, 3 }
 0x952   : > { %v954_v7 = vpop.permute.xlu1 %953 }
 0x953   : > { %562 = vrot.lane.b32.xlu0 %v561_v15, %s3731_s27  ;;  %v956_v9 = vmul.f32 %v954_v7, %v3930_v18 }
 0x955   : > { %v958_v10 = vrot.slane %v956_v9, 2 }
 0x956   : > { %v558_v33 = vpop.permute.xlu1 %557 }
 0x957   : > { %732 = vrot.lane.b32.xlu0 %v731_v61, %s3731_s27  ;;  %v560_v49 = vadd.f32 %v558_v33, %v3953_v26 }
 0x95a   : > { %v676_v35 = vpop.permute.xlu1 %675 }
 0x95b   : > { %789 = vrot.lane.b32.xlu0 %v788_v4, %s3731_s27  ;;  %v678_v55 = vadd.f32 %v676_v35, %v3953_v26 }
 0x95e   : > { %v625_v42 = vpop.permute.xlu1 %624 }
 0x95f   : > { %846 = vrot.lane.b32.xlu0 %v845_v5, %s3731_s27 }
 0x962   : > { %v680_v44 = vpop.permute.xlu1 %679 }
 0x963   : > { %903 = vrot.lane.b32.xlu0 %v902_v8, %s3731_s27  ;;  %v682_v41 = vadd.f32 %v680_v44, %v678_v55 }
 0x965   : > { %v2992_v62 = vmul.f32 -1.442695, %v682_v41  ;;  %v4140_v41 = vld [vmem:[%s4640_s4 + $0x2] sm:$0x3] }
 0x966   : > { %v737_v46 = vpop.permute.xlu1 %736 }
 0x967   : > { %959 = vrot.lane.b32.xlu0 %v958_v10, %s3731_s27 }
 0x96b   : > { %963 = vrot.lane.b32.xlu0 %v885_v23, %s3731_s27 }
 0x96f   : > { %588 = vrot.lane.b32.xlu0 %v586_v11, %s3731_s27 }
 0x973   : > { %696 = vrot.lane.b32.xlu0 %v3989_v13, %s3729_s26  ;;  %v3003_v13 = vld [vmem:[%s4639_s3 + $0x20] sm:$0xff] }
 0x977   : > { %810 = vrot.lane.b32.xlu0 %v4015_v60, %s3729_s26  ;;  %v3004_v60 = vld [vmem:[%s4639_s3 + $0x28] sm:$0xff] }
 0x978   : > { %v3262_v23 = vpack.c.bf16 %v3004_v60, %v3003_v13 }
 0x97a   : > { %3263 = vmatpush3.bf16.msra.mxu1 %v3262_v23 }
 0x97b   : > { %924 = vrot.lane.b32.xlu0 %v4043_v48, %s3729_s26  ;;  %3264 = vmatprep.subr.bf16.mxu1 %v3726_v0  ;;  %v794_v48 = vpop.permute.xlu1 %793 }
 0x97e   : > { %3266 = vmatpush3.bf16.msra.mxu1 %v3265_v29 }
 0x97f   : > { %3275 = vmatprep.subr.bf16.mxu1 %v3726_v0  ;;  %v851_v51 = vpop.permute.xlu1 %850 }
 0x983   : > { %v908_v57 = vpop.permute.xlu1 %907 }
 0x987   : > { %v582_v24 = vpop.permute.xlu1 %581 }
 0x9b9   : > { %v939_v18 = vpop.permute.xlu0 %938 }
 0x9ba   : > { %v941_v12 = vadd.f32 %v939_v18, %v3953_v26 }
 0x9bd   : > { %v943_v14 = vpop.permute.xlu0 %942 }
 0x9be   : > { %v945_v16 = vadd.f32 %v943_v14, %v941_v12 }
 0x9c0   : > { %v3001_v20 = vmul.f32 -1.442695, %v945_v16 }
 0x9c1   : > { %v621_v34 = vpop.permute.xlu0 %620 }
 0x9c2   : > { %3516 = vpow2.f32 %v3001_v20  ;;  %v623_v50 = vadd.f32 %v621_v34, %v3953_v26 }
 0x9c4   : > { %v627_v53 = vadd.f32 %v625_v42, %v623_v50 }
 0x9c5   : > { %v563_v38 = vpop.permute.xlu0 %562 }
 0x9c6   : > { %v565_v52 = vadd.f32 %v563_v38, %v560_v49  ;;  %v2990_v36 = vmul.f32 -1.442695, %v627_v53 }
 0x9c8   : > { %v2988_v39 = vmul.f32 -1.442695, %v565_v52 }
 0x9c9   : > { %v733_v43 = vpop.permute.xlu0 %732 }
 0x9ca   : > { %v735_v54 = vadd.f32 %v733_v43, %v3953_v26 }
 0x9cc   : > { %v3517_v17 = vpop.eup %3516  ;;  %v739_v40 = vadd.f32 %v737_v46, %v735_v54 }
 0x9cd   : > { %v949_v25 = vadd.f32 1.0, %v3517_v17  ;;  %v790_v45 = vpop.permute.xlu0 %789 }
 0x9ce   : > { %v792_v56 = vadd.f32 %v790_v45, %v3953_v26  ;;  %v2994_v2 = vmul.f32 -1.442695, %v739_v40  ;;  %v4143_v40 = vmul.f32 0.0, %v4140_v41 }
 0x9cf   : > { %3518 = vrcp.f32 %v949_v25 }
 0x9d0   : > { %v796_v58 = vadd.f32 %v794_v48, %v792_v56  ;;  %3520 = vpow2.f32 %v2988_v39 }
 0x9d1   : > { %v847_v47 = vpop.permute.xlu0 %846  ;;  %3522 = vpow2.f32 %v2990_v36 }
 0x9d2   : > { %v849_v19 = vadd.f32 %v847_v47, %v3953_v26  ;;  %v2996_v3 = vmul.f32 -1.442695, %v796_v58  ;;  %3524 = vpow2.f32 %v2992_v62 }
 0x9d3   : > { %3526 = vpow2.f32 %v2994_v2 }
 0x9d4   : > { %v853_v61 = vadd.f32 %v851_v51, %v849_v19  ;;  %3528 = vpow2.f32 %v2996_v3 }
 0x9d6   : > { %v2998_v5 = vmul.f32 -1.442695, %v853_v61 }
 0x9d8   : > { %3530 = vpow2.f32 %v2998_v5 }
 0x9d9   : > { %v3519_v22 = vpop.eup %3518 }
 0x9da   : > { %v976_v28 = vsub.f32 1.0, %v3519_v22  ;;  %v975_v30 = vmul.f32 %v3519_v22, %v973_v27  ;;  %v3521_v10 = vpop.eup %3520 }
 0x9db   : > { %v3523_v11 = vpop.eup %3522  ;;  %v569_v12 = vadd.f32 1.0, %v3521_v10 }
 0x9dc   : > { %v977_v31 = vmul.f32 %v976_v28, %v3958_v37  ;;  %v904_v37 = vpop.permute.xlu0 %903  ;;  %v3525_v18 = vpop.eup %3524  ;;  %v631_v20 = vadd.f32 1.0, %v3523_v11 }
 0x9dd   : > { %v906_v59 = vadd.f32 %v904_v37, %v3953_v26  ;;  %v3527_v14 = vpop.eup %3526  ;;  %v686_v25 = vadd.f32 1.0, %v3525_v18 }
 0x9de   : > { %v978_v32 = vadd.f32 %v977_v31, %v975_v30  ;;  %v3529_v16 = vpop.eup %3528  ;;  %v641_v31 = vpop.permute.xlu1 %640 }
 0x9df   : > { %v910_v63 = vadd.f32 %v908_v57, %v906_v59  ;;  %v800_v60 = vadd.f32 1.0, %v3529_v16 }
 0x9e0   : > { %980 = vrot.lane.b32.xlu1 %v978_v32, %s3729_s26  ;;  %v960_v15 = vpop.permute.xlu0 %959 }
 0x9e1   : > { %v962_v6 = vadd.f32 %v960_v15, %v3953_v26  ;;  %v3000_v7 = vmul.f32 -1.442695, %v910_v63  ;;  %v743_v26 = vadd.f32 1.0, %v3527_v14 }
 0x9e2   : > { %v3531_v17 = vpop.eup %3530  ;;  %v754_v47 = vpop.permute.xlu1 %753 }
 0x9e3   : > { %3532 = vpow2.f32 %v3000_v7  ;;  %v857_v21 = vadd.f32 1.0, %v3531_v17 }
 0x9e4   : > { %v964_v4 = vpop.permute.xlu0 %963  ;;  %1087 = vrot.lane.b32.xlu1 %v4143_v40, %s3729_s26 }
 0x9e5   : > { %v966_v8 = vadd.f32 %v964_v4, %v962_v6 }
 0x9e6   : > { %v868_v61 = vpop.permute.xlu1 %867 }
 0x9e7   : > { %v3002_v9 = vmul.f32 -1.442695, %v966_v8 }
 0x9e8   : > { %v589_v27 = vpop.permute.xlu0 %588 }
 0x9e9   : > { %3534 = vpow2.f32 %v3002_v9 }
 0x9ea   : > { %3536 = vrcp.f32 %v569_v12 }
 0x9eb   : > { %3538 = vrcp.f32 %v631_v20 }
 0x9ec   : > { %3540 = vrcp.f32 %v686_v25  ;;  %v697_v34 = vpop.permute.xlu0 %696 }
 0x9ed   : > { %v3533_v13 = vpop.eup %3532  ;;  %3542 = vrcp.f32 %v743_v26 }
 0x9ee   : > { %v914_v22 = vadd.f32 1.0, %v3533_v13  ;;  %3544 = vrcp.f32 %v800_v60 }
 0x9ef   : > { %3546 = vrcp.f32 %v857_v21  ;;  %v4161_v21 = vld [vmem:[%s4641_s5 + $0x2] sm:$0x3] }
 0x9f0   : > { %3548 = vrcp.f32 %v914_v22  ;;  %v811_v50 = vpop.permute.xlu0 %810 }
 0x9f3   : > { %v3535_v23 = vpop.eup %3534 }
 0x9f4   : > { %v970_v28 = vadd.f32 1.0, %v3535_v23  ;;  %v3537_v29 = vpop.eup %3536  ;;  %v925_v5 = vpop.permute.xlu0 %924 }
 0x9f5   : > { %v3539_v30 = vpop.eup %3538  ;;  %v585_v33 = vsub.f32 1.0, %v3537_v29  ;;  %v584_v37 = vmul.f32 %v3537_v29, %v582_v24 }
 0x9f6   : > { %3550 = vrcp.f32 %v970_v28  ;;  %v3541_v32 = vpop.eup %3540  ;;  %v644_v42 = vsub.f32 1.0, %v3539_v30  ;;  %v643_v53 = vmul.f32 %v3539_v30, %v641_v31 }
 0x9f7   : > { %v3543_v35 = vpop.eup %3542  ;;  %v591_v45 = vmul.f32 %v589_v27, %v585_v33  ;;  %v700_v52 = vsub.f32 1.0, %v3541_v32  ;;  %v699_v54 = vmul.f32 %v3541_v32, %v697_v34 }
 0x9f8   : > { %v3545_v38 = vpop.eup %3544  ;;  %v757_v46 = vsub.f32 1.0, %v3543_v35  ;;  %v645_v49 = vmul.f32 %v644_v42, %v589_v27  ;;  %v756_v57 = vmul.f32 %v3543_v35, %v754_v47 }
 0x9f9   : > { %v3547_v43 = vpop.eup %3546  ;;  %v814_v48 = vsub.f32 1.0, %v3545_v38  ;;  %v592_v56 = vadd.f32 %v591_v45, %v584_v37  ;;  %v701_v15 = vmul.f32 %v700_v52, %v589_v27  ;;  %v813_v63 = vmul.f32 %v3545_v38, %v811_v50 }
 0x9fa   : > { %v3549_v44 = vpop.eup %3548  ;;  %v871_v51 = vsub.f32 1.0, %v3547_v43  ;;  %v758_v19 = vmul.f32 %v757_v46, %v589_v27  ;;  %v646_v58 = vadd.f32 %v645_v49, %v643_v53  ;;  %v870_v7 = vmul.f32 %v3547_v43, %v868_v61 }
 0x9fb   : > { %v928_v55 = vsub.f32 1.0, %v3549_v44  ;;  %v815_v39 = vmul.f32 %v814_v48, %v589_v27  ;;  %v702_v62 = vadd.f32 %v701_v15, %v699_v54  ;;  %v927_v9 = vmul.f32 %v3549_v44, %v925_v5 }
 0x9fc   : > { %v872_v36 = vmul.f32 %v871_v51, %v589_v27  ;;  %v988_v3 = vsel %vm987_vm3, %v592_v56, %v646_v58  ;;  %v759_v4 = vadd.f32 %v758_v19, %v756_v57  ;;  %v1145_v45 = vrot.slane %v4161_v21, 7 }
 0x9fd   : > { %v929_v2 = vmul.f32 %v928_v55, %v589_v27  ;;  %v816_v8 = vadd.f32 %v815_v39, %v813_v63  ;;  %v990_v11 = vsel %vm989_vm4, %v988_v3, %v702_v62  ;;  %v1200_v57 = vrot.slane %v4161_v21, 6 }
 0x9fe   : > { %v873_v10 = vadd.f32 %v872_v36, %v870_v7  ;;  %v992_v14 = vsel %vm991_vm5, %v990_v11, %v759_v4 }
 0x9ff   : > { %v930_v18 = vadd.f32 %v929_v2, %v927_v9  ;;  %v994_v17 = vsel %vm993_vm6, %v992_v14, %v816_v8 }
 0xa00   : > { %v3551_v59 = vpop.eup %3550  ;;  %v996_v13 = vsel %vm995_vm7, %v994_v17, %v873_v10 }
 0xa01   : > { %v984_v6 = vsub.f32 1.0, %v3551_v59  ;;  %v998_v26 = vsel %vm997_vm8, %v996_v13, %v930_v18 }
 0xa03   : > { %v985_v20 = vmul.f32 %v984_v6, %v589_v27 }
 0xa52   : > { %v981_v12 = vpop.permute.xlu1 %980 }
 0xa53   : > { %v983_v16 = vmul.f32 %v3551_v59, %v981_v12 }
 0xa55   : > { %v986_v25 = vadd.f32 %v985_v20, %v983_v16  ;;  %v1256_v16 = vrot.slane %v4161_v21, 5 }
 0xa56   : > { %v1088_v27 = vpop.permute.xlu1 %1087 }
 0xa57   : > { %v4154_v60 = vsel %vm999_vm9, %v998_v26, %v986_v25 }
 0xa58   : > { %1007 = vrot.lane.b32.xlu0 %v4154_v60, %s3731_s27 }
 0xa5c   : > { %1092 = vrot.lane.b32.xlu0 %v4161_v21, %s3729_s26 }
 0xaca   : > { %v1008_v22 = vpop.permute.xlu0 %1007 }
 0xacb   : > { %3167 = vmatmul.mubr.msk.f32.vlgmr.msra.gmra.mrb[4].mxu1 %vm463_vm2, %v1008_v22 }
 0xacc   : > { %3177 = vmatprep.mubr.msk.f32.mxu1 %vm3727_vm0, %v3728_v1 }
 0xace   : > { %v1093_v29 = vpop.permute.xlu0 %1092 }
 0xb9e   : > { %v4168_v23 = vpop.f32.mrb[4].mxu1 }
 0xb9f   : > { %1121 = vrot.lane.b32.xlu1 %v4168_v23, %s3729_s26  ;;  %v3168_v24 = vpop.f32.mrb[5].mxu1  ;;  %v1090_v28 = vadd.f32 %v1088_v27, %v4168_v23 }
 0xba1   : > { %v1095_v30 = vadd.f32 %v1093_v29, %v1090_v28 }
 0xba3   : > { %v3010_v31 = vmul.f32 -1.442695, %v1095_v30 }
 0xba5   : > { %3552 = vpow2.f32 %v3010_v31 }
 0xbaf   : > { %v3553_v32 = vpop.eup %3552 }
 0xbb0   : > { %v1099_v33 = vadd.f32 1.0, %v3553_v32 }
 0xbb2   : > { %3554 = vrcp.f32 %v1099_v33 }
 0xbbc   : > { %v3555_v34 = vpop.eup %3554 }
 0xbbd   : > { %v1119_v35 = vsub.f32 1.0, %v3555_v34  ;;  %v1118_v42 = vmul.f32 0.0, %v3555_v34 }
 0xc11   : > { %v4173_v38 = vpop.permute.xlu1 %1121 }
 0xc12   : > { %v1124_v43 = vmul.f32 %v4173_v38, %v1119_v35 }
 0xc14   : > { %v4176_v44 = vadd.f32 %v1124_v43, %v1118_v42  ;;  %v1313_v43 = vrot.slane %v4161_v21, 4 }
 0xc16   : > { %1135 = vrot.lane.b32.xlu0 %v4176_v44, %s4661_s29  ;;  %v1156_v53 = vrot.slane %v4176_v44, 7 }
 0xc1a   : > { %1146 = vrot.lane.b32.xlu0 %v1145_v45, %s3729_s26 }
 0xc88   : > { %v1136_v46 = vpop.permute.xlu0 %1135 }
 0xc89   : > { %v1138_v47 = vmul.f32 %v4140_v41, %v1136_v46 }
 0xc8b   : > { %v1140_v48 = vrot.slane %v1138_v47, 7 }
 0xc8c   : > { %v1147_v49 = vpop.permute.xlu0 %1146 }
 0xc8d   : > { %1141 = vrot.lane.b32.xlu1 %v1140_v48, %s3729_s26 }
 0xcff   : > { %v1142_v37 = vpop.permute.xlu1 %1141 }
 0xd00   : > { %v1144_v50 = vadd.f32 %v1142_v37, %v4168_v23 }
 0xd02   : > { %v1149_v51 = vadd.f32 %v1147_v49, %v1144_v50 }
 0xd04   : > { %v3012_v52 = vmul.f32 -1.442695, %v1149_v51 }
 0xd06   : > { %3556 = vpow2.f32 %v3012_v52 }
 0xd10   : > { %v3557_v54 = vpop.eup %3556 }
 0xd11   : > { %v1153_v55 = vadd.f32 1.0, %v3557_v54 }
 0xd13   : > { %3558 = vrcp.f32 %v1153_v55 }
 0xd1d   : > { %v3559_v56 = vpop.eup %3558 }
 0xd1e   : > { %v1178_v19 = vsub.f32 1.0, %v3559_v56  ;;  %v1177_v59 = vmul.f32 %v3559_v56, %v1156_v53 }
 0xd20   : > { %v1179_v15 = vmul.f32 %v1178_v19, %v4173_v38 }
 0xd22   : > { %v4191_v39 = vadd.f32 %v1179_v15, %v1177_v59 }
 0xd24   : > { %v1189_v58 = vrot.slane %v4191_v39, 1  ;;  %v1231_v10 = vrot.slane %v4191_v39, 7 }
 0xd26   : > { %1190 = vrot.lane.b32.xlu1 %v1189_v58, %s4661_s29 }
 0xd2a   : > { %1201 = vrot.lane.b32.xlu1 %v1200_v57, %s3729_s26 }
 0xd98   : > { %v1191_v36 = vpop.permute.xlu1 %1190 }
 0xd99   : > { %v1193_v61 = vmul.f32 %v4140_v41, %v1191_v36 }
 0xd9b   : > { %v1195_v62 = vrot.slane %v1193_v61, 6 }
 0xd9c   : > { %v1202_v2 = vpop.permute.xlu1 %1201 }
 0xd9d   : > { %1196 = vrot.lane.b32.xlu0 %v1195_v62, %s3729_s26  ;;  %v1370_v62 = vrot.slane %v4161_v21, 3 }
 0xe0f   : > { %v1197_v63 = vpop.permute.xlu0 %1196 }
 0xe10   : > { %v1199_v3 = vadd.f32 %v1197_v63, %v4168_v23 }
 0xe12   : > { %v1204_v4 = vadd.f32 %v1202_v2, %v1199_v3 }
 0xe14   : > { %v3014_v5 = vmul.f32 -1.442695, %v1204_v4 }
 0xe16   : > { %3560 = vpow2.f32 %v3014_v5 }
 0xe20   : > { %v3561_v6 = vpop.eup %3560 }
 0xe21   : > { %v1208_v7 = vadd.f32 1.0, %v3561_v6 }
 0xe23   : > { %3562 = vrcp.f32 %v1208_v7 }
 0xe2d   : > { %v3563_v8 = vpop.eup %3562 }
 0xe2e   : > { %v1234_v9 = vsub.f32 1.0, %v3563_v8  ;;  %v1233_v11 = vmul.f32 %v3563_v8, %v1231_v10 }
 0xe30   : > { %v1235_v18 = vmul.f32 %v1234_v9, %v4173_v38 }
 0xe32   : > { %v4204_v12 = vadd.f32 %v1235_v18, %v1233_v11 }
 0xe34   : > { %v1245_v14 = vrot.slane %v4204_v12, 2  ;;  %v1288_v32 = vrot.slane %v4204_v12, 7 }
 0xe36   : > { %1246 = vrot.lane.b32.xlu0 %v1245_v14, %s4661_s29 }
 0xe3a   : > { %1257 = vrot.lane.b32.xlu0 %v1256_v16, %s3729_s26 }
 0xea8   : > { %v1247_v20 = vpop.permute.xlu0 %1246 }
 0xea9   : > { %v1249_v17 = vmul.f32 %v4140_v41, %v1247_v20 }
 0xeab   : > { %v1251_v25 = vrot.slane %v1249_v17, 5 }
 0xeac   : > { %v1258_v26 = vpop.permute.xlu0 %1257 }
 0xead   : > { %1252 = vrot.lane.b32.xlu1 %v1251_v25, %s3729_s26 }
 0xf1f   : > { %v1253_v13 = vpop.permute.xlu1 %1252 }
 0xf20   : > { %v1255_v22 = vadd.f32 %v1253_v13, %v4168_v23 }
 0xf22   : > { %v1260_v24 = vadd.f32 %v1258_v26, %v1255_v22  ;;  %v1427_v26 = vrot.slane %v4161_v21, 2  ;;  %v1267_v22 = vrot.slane %v4204_v12, 1 }
 0xf24   : > { %v3016_v27 = vmul.f32 -1.442695, %v1260_v24 }
 0xf26   : > { %3564 = vpow2.f32 %v3016_v27 }
 0xf30   : > { %v3565_v28 = vpop.eup %3564 }
 0xf31   : > { %v1264_v29 = vadd.f32 1.0, %v3565_v28 }
 0xf33   : > { %3566 = vrcp.f32 %v1264_v29 }
 0xf3d   : > { %v3567_v30 = vpop.eup %3566 }
 0xf3e   : > { %v1291_v31 = vsub.f32 1.0, %v3567_v30  ;;  %v1290_v33 = vmul.f32 %v3567_v30, %v1288_v32 }
 0xf40   : > { %v1292_v34 = vmul.f32 %v1291_v31, %v4173_v38 }
 0xf42   : > { %v4217_v35 = vadd.f32 %v1292_v34, %v1290_v33 }
 0xf44   : > { %v1302_v42 = vrot.slane %v4217_v35, 3  ;;  %v1345_v59 = vrot.slane %v4217_v35, 7 }
 0xf46   : > { %1303 = vrot.lane.b32.xlu1 %v1302_v42, %s4661_s29 }
 0xf4a   : > { %1314 = vrot.lane.b32.xlu1 %v1313_v43, %s3729_s26 }
 0xfb8   : > { %v1304_v46 = vpop.permute.xlu1 %1303 }
 0xfb9   : > { %v1306_v47 = vmul.f32 %v4140_v41, %v1304_v46 }
 0xfbb   : > { %v1308_v48 = vrot.slane %v1306_v47, 4 }
 0xfbc   : > { %v1315_v49 = vpop.permute.xlu1 %1314 }
 0xfbd   : > { %1309 = vrot.lane.b32.xlu0 %v1308_v48, %s3729_s26 }
0x102f   : > { %v1310_v37 = vpop.permute.xlu0 %1309 }
0x1030   : > { %v1312_v50 = vadd.f32 %v1310_v37, %v4168_v23 }
0x1032   : > { %v1317_v51 = vadd.f32 %v1315_v49, %v1312_v50 }
0x1034   : > { %v3018_v52 = vmul.f32 -1.442695, %v1317_v51 }
0x1036   : > { %3568 = vpow2.f32 %v3018_v52 }
0x1040   : > { %v3569_v54 = vpop.eup %3568 }
0x1041   : > { %v1321_v55 = vadd.f32 1.0, %v3569_v54  ;;  %v1324_v54 = vrot.slane %v4217_v35, 2 }
0x1043   : > { %3570 = vrcp.f32 %v1321_v55 }
0x104d   : > { %v3571_v56 = vpop.eup %3570 }
0x104e   : > { %v1348_v19 = vsub.f32 1.0, %v3571_v56  ;;  %v1347_v15 = vmul.f32 %v3571_v56, %v1345_v59  ;;  %v1102_v59 = vrot.slane %v4143_v40, 1 }
0x1050   : > { %v1349_v58 = vmul.f32 %v1348_v19, %v4173_v38 }
0x1052   : > { %v4230_v36 = vadd.f32 %v1349_v58, %v1347_v15 }
0x1054   : > { %v1359_v61 = vrot.slane %v4230_v36, 4  ;;  %v1402_v14 = vrot.slane %v4230_v36, 7  ;;  %v1381_v24 = vrot.slane %v4230_v36, 3 }
0x1056   : > { %1360 = vrot.lane.b32.xlu0 %v1359_v61, %s4661_s29 }
0x105a   : > { %1371 = vrot.lane.b32.xlu0 %v1370_v62, %s3729_s26 }
0x10c8   : > { %v1361_v63 = vpop.permute.xlu0 %1360 }
0x10c9   : > { %v1363_v2 = vmul.f32 %v4140_v41, %v1361_v63 }
0x10cb   : > { %v1365_v3 = vrot.slane %v1363_v2, 3 }
0x10cc   : > { %v1372_v5 = vpop.permute.xlu0 %1371 }
0x10cd   : > { %1366 = vrot.lane.b32.xlu1 %v1365_v3, %s3729_s26 }
0x113f   : > { %v1367_v4 = vpop.permute.xlu1 %1366 }
0x1140   : > { %v1369_v6 = vadd.f32 %v1367_v4, %v4168_v23 }
0x1142   : > { %v1374_v7 = vadd.f32 %v1372_v5, %v1369_v6 }
0x1144   : > { %v3020_v8 = vmul.f32 -1.442695, %v1374_v7 }
0x1146   : > { %3572 = vpow2.f32 %v3020_v8 }
0x1150   : > { %v3573_v9 = vpop.eup %3572 }
0x1151   : > { %v1378_v10 = vadd.f32 1.0, %v3573_v9 }
0x1153   : > { %3574 = vrcp.f32 %v1378_v10 }
0x115d   : > { %v3575_v11 = vpop.eup %3574 }
0x115e   : > { %v1405_v18 = vsub.f32 1.0, %v3575_v11  ;;  %v1404_v20 = vmul.f32 %v3575_v11, %v1402_v14 }
0x1160   : > { %v1406_v17 = vmul.f32 %v1405_v18, %v4173_v38 }
0x1162   : > { %v4243_v25 = vadd.f32 %v1406_v17, %v1404_v20 }
0x1164   : > { %v1416_v13 = vrot.slane %v4243_v25, 5  ;;  %v1459_v48 = vrot.slane %v4243_v25, 7  ;;  %v1438_v55 = vrot.slane %v4243_v25, 4 }
0x1166   : > { %1417 = vrot.lane.b32.xlu1 %v1416_v13, %s4661_s29 }
0x116a   : > { %1428 = vrot.lane.b32.xlu1 %v1427_v26, %s3729_s26 }
0x116e   : > { %1211 = vrot.lane.b32.xlu1 %v4191_v39, %s4661_s29 }
0x1172   : > { %1268 = vrot.lane.b32.xlu1 %v1267_v22, %s4661_s29 }
0x1176   : > { %1382 = vrot.lane.b32.xlu1 %v1381_v24, %s4661_s29 }
0x11d8   : > { %v1418_v27 = vpop.permute.xlu1 %1417 }
0x11d9   : > { %v1420_v28 = vmul.f32 %v4140_v41, %v1418_v27 }
0x11db   : > { %v1422_v29 = vrot.slane %v1420_v28, 2 }
0x11dc   : > { %v1429_v32 = vpop.permute.xlu1 %1428 }
0x11dd   : > { %1423 = vrot.lane.b32.xlu0 %v1422_v29, %s3729_s26 }
0x11e0   : > { %v1212_v19 = vpop.permute.xlu1 %1211 }
0x11e1   : > { %v1214_v15 = vmul.f32 %v4140_v41, %v1212_v19 }
0x124f   : > { %v1424_v30 = vpop.permute.xlu0 %1423 }
0x1250   : > { %v1426_v31 = vadd.f32 %v1424_v30, %v4168_v23 }
0x1252   : > { %v1431_v33 = vadd.f32 %v1429_v32, %v1426_v31 }
0x1254   : > { %v3022_v34 = vmul.f32 -1.442695, %v1431_v33 }
0x1256   : > { %3576 = vpow2.f32 %v3022_v34 }
0x1260   : > { %v3577_v42 = vpop.eup %3576 }
0x1261   : > { %v1435_v46 = vadd.f32 1.0, %v3577_v42 }
0x1263   : > { %3578 = vrcp.f32 %v1435_v46 }
0x126d   : > { %v3579_v47 = vpop.eup %3578 }
0x126e   : > { %v1462_v37 = vsub.f32 1.0, %v3579_v47  ;;  %v1461_v49 = vmul.f32 %v3579_v47, %v1459_v48 }
0x1270   : > { %v1463_v50 = vmul.f32 %v1462_v37, %v4173_v38 }
0x1272   : > { %v4262_v51 = vadd.f32 %v1463_v50, %v1461_v49 }
0x1274   : > { %v1473_v52 = vrot.slane %v4262_v51, 6  ;;  %v1494_v56 = vrot.slane %v4262_v51, 5 }
0x1276   : > { %1474 = vrot.lane.b32.xlu0 %v1473_v52, %s4661_s29 }
0x127a   : > { %1157 = vrot.lane.b32.xlu0 %v1156_v53, %s4661_s29  ;;  %v1216_v53 = vrot.slane %v1214_v15, 7 }
0x127e   : > { %1325 = vrot.lane.b32.xlu0 %v1324_v54, %s4661_s29 }
0x1282   : > { %1439 = vrot.lane.b32.xlu0 %v1438_v55, %s4661_s29 }
0x1286   : > { %1495 = vrot.lane.b32.xlu0 %v1494_v56, %s4661_s29  ;;  %s2905_s29 = sshll.u32 %s365_s11, 4  ;;  %s4595_s29 = int_to_ptr.vmem [resolvable:$true] %s2905_s29 }
0x128a   : > { %1103 = vrot.lane.b32.xlu0 %v1102_v59, %s3731_s27 }
0x128e   : > { %1217 = vrot.lane.b32.xlu0 %v1216_v53, %s3731_s27 }
0x1292   : > { %1166 = vrot.lane.b32.xlu0 %v4161_v21, %s3731_s27 }
0x1296   : > { %1221 = vrot.lane.b32.xlu0 %v1145_v45, %s3731_s27 }
0x129a   : > { %1278 = vrot.lane.b32.xlu0 %v1200_v57, %s3731_s27 }
0x129e   : > { %1335 = vrot.lane.b32.xlu0 %v1256_v16, %s3731_s27 }
0x12a2   : > { %1392 = vrot.lane.b32.xlu0 %v1313_v43, %s3731_s27  ;;  %v1107_v43 = vrot.slane %v4161_v21, 1  ;;  %v4334_v21 = vmul.f32 1.7320508, %v4154_v60 }
0x12a6   : > { %1449 = vrot.lane.b32.xlu0 %v1370_v62, %s3731_s27 }
0x12aa   : > { %1127 = vrot.lane.b32.xlu0 %v4176_v44, %s3729_s26 }
0x12ae   : > { %1238 = vrot.lane.b32.xlu0 %v4204_v12, %s3729_s26  ;;  %v1269_v12 = vpop.permute.xlu1 %1268 }
0x12b2   : > { %1352 = vrot.lane.b32.xlu0 %v4230_v36, %s3729_s26  ;;  %v1271_v36 = vmul.f32 %v4140_v41, %v1269_v12  ;;  %v1383_v3 = vpop.permute.xlu1 %1382 }
0x12b3   : > { %v1385_v5 = vmul.f32 %v4140_v41, %v1383_v3 }
0x12b4   : > { %v1273_v63 = vrot.slane %v1271_v36, 6 }
0x12b5   : > { %v1387_v8 = vrot.slane %v1385_v5, 4 }
0x12b6   : > { %1466 = vrot.lane.b32.xlu0 %v4262_v51, %s3729_s26 }
0x12e8   : > { %v1475_v40 = vpop.permute.xlu0 %1474 }
0x12e9   : > { %v1477_v45 = vmul.f32 %v4140_v41, %v1475_v40 }
0x12eb   : > { %v1479_v57 = vrot.slane %v1477_v45, 1 }
0x12ec   : > { %v1158_v16 = vpop.permute.xlu0 %1157 }
0x12ed   : > { %1480 = vrot.lane.b32.xlu1 %v1479_v57, %s3729_s26  ;;  %v1160_v44 = vmul.f32 %v4140_v41, %v1158_v16 }
0x12f0   : > { %v1326_v58 = vpop.permute.xlu0 %1325 }
0x12f1   : > { %1484 = vrot.lane.b32.xlu1 %v1107_v43, %s3729_s26  ;;  %v1328_v2 = vmul.f32 %v4140_v41, %v1326_v58 }
0x12f3   : > { %v1330_v6 = vrot.slane %v1328_v2, 5 }
0x12f4   : > { %v1440_v61 = vpop.permute.xlu0 %1439 }
0x12f5   : > { %1162 = vrot.lane.b32.xlu1 %v1160_v44, %s3731_s27  ;;  %v1442_v9 = vmul.f32 %v4140_v41, %v1440_v61 }
0x12f7   : > { %v1444_v11 = vrot.slane %v1442_v9, 3 }
0x12f8   : > { %v1496_v62 = vpop.permute.xlu0 %1495 }
0x12f9   : > { %1108 = vrot.lane.b32.xlu1 %v1107_v43, %s3731_s27  ;;  %v1498_v18 = vmul.f32 %v4140_v41, %v1496_v62 }
0x12fb   : > { %v1500_v13 = vrot.slane %v1498_v18, 2 }
0x12fc   : > { %v1104_v4 = vpop.permute.xlu0 %1103 }
0x12fd   : > { %1274 = vrot.lane.b32.xlu1 %v1273_v63, %s3731_s27  ;;  %v1106_v60 = vadd.f32 %v1104_v4, %v4168_v23 }
0x1300   : > { %v1218_v7 = vpop.permute.xlu0 %1217 }
0x1301   : > { %1331 = vrot.lane.b32.xlu1 %v1330_v6, %s3731_s27  ;;  %v1220_v14 = vadd.f32 %v1218_v7, %v4168_v23  ;;  %v1560_v7 = vld [vmem:[#allocation4 + $0x68] sm:$0xff] }
0x1304   : > { %v1167_v10 = vpop.permute.xlu0 %1166 }
0x1305   : > { %1388 = vrot.lane.b32.xlu1 %v1387_v8, %s3731_s27  ;;  %v1563_v8 = vld [vmem:[#allocation4 + $0x80] sm:$0xff] }
0x1308   : > { %v1222_v20 = vpop.permute.xlu0 %1221 }
0x1309   : > { %v1224_v17 = vadd.f32 %v1222_v20, %v1220_v14  ;;  %1445 = vrot.lane.b32.xlu1 %v1444_v11, %s3731_s27  ;;  %v3267_v11 = vpack.c.bf16 %v1563_v8, %v1560_v7  ;;  %v1515_v20 = vrot.slane %v4262_v51, 7 }
0x130b   : > { %v3015_v22 = vmul.f32 -1.442695, %v1224_v17  ;;  %3268 = vmatprep.subr.bf16.mxu0 %v3267_v11 }
0x130c   : > { %v1279_v24 = vpop.permute.xlu0 %1278 }
0x130d   : > { %3580 = vpow2.f32 %v3015_v22  ;;  %1501 = vrot.lane.b32.xlu1 %v1500_v13, %s3731_s27 }
0x1310   : > { %v1336_v27 = vpop.permute.xlu0 %1335 }
0x1311   : > { %1505 = vrot.lane.b32.xlu1 %v1427_v26, %s3731_s27 }
0x1314   : > { %v1393_v28 = vpop.permute.xlu0 %1392 }
0x1315   : > { %1182 = vrot.lane.b32.xlu1 %v4191_v39, %s3729_s26 }
0x1317   : > { %v3581_v41 = vpop.eup %3580 }
0x1318   : > { %v1228_v29 = vadd.f32 1.0, %v3581_v41  ;;  %v1450_v30 = vpop.permute.xlu0 %1449 }
0x1319   : > { %1295 = vrot.lane.b32.xlu1 %v4217_v35, %s3729_s26 }
0x131a   : > { %3582 = vrcp.f32 %v1228_v29 }
0x131c   : > { %v4331_v31 = vpop.permute.xlu0 %1127 }
0x131d   : > { %1409 = vrot.lane.b32.xlu1 %v4243_v25, %s3729_s26 }
0x1320   : > { %v1239_v33 = vpop.permute.xlu0 %1238 }
0x1324   : > { %v3583_v32 = vpop.eup %3582 }
0x1325   : > { %v1242_v26 = vsub.f32 1.0, %v3583_v32  ;;  %v1241_v34 = vmul.f32 %v3583_v32, %v1239_v33 }
0x1327   : > { %v1243_v39 = vmul.f32 %v1242_v26, %v4334_v21 }
0x1329   : > { %v4337_v42 = vadd.f32 %v1243_v39, %v1241_v34 }
0x135f   : > { %v1481_v46 = vpop.permute.xlu1 %1480 }
0x1360   : > { %v1483_v35 = vadd.f32 %v1481_v46, %v4168_v23 }
0x1363   : > { %v1485_v47 = vpop.permute.xlu1 %1484 }
0x1364   : > { %v1487_v48 = vadd.f32 %v1485_v47, %v1483_v35 }
0x1366   : > { %v3024_v37 = vmul.f32 -1.442695, %v1487_v48 }
0x1367   : > { %v1163_v25 = vpop.permute.xlu1 %1162 }
0x1368   : > { %3584 = vpow2.f32 %v3024_v37  ;;  %v1165_v49 = vadd.f32 %v1163_v25, %v4168_v23 }
0x136a   : > { %v1169_v50 = vadd.f32 %v1167_v10, %v1165_v49 }
0x136b   : > { %v1109_v52 = vpop.permute.xlu1 %1108 }
0x136c   : > { %v3013_v54 = vmul.f32 -1.442695, %v1169_v50  ;;  %v1111_v55 = vadd.f32 %v1109_v52, %v1106_v60 }
0x136e   : > { %3586 = vpow2.f32 %v3013_v54  ;;  %v3011_v56 = vmul.f32 -1.442695, %v1111_v55 }
0x136f   : > { %v1275_v19 = vpop.permute.xlu1 %1274 }
0x1370   : > { %3588 = vpow2.f32 %v3011_v56  ;;  %v1277_v59 = vadd.f32 %v1275_v19, %v4168_v23 }
0x1372   : > { %v3585_v15 = vpop.eup %3584  ;;  %v1281_v53 = vadd.f32 %v1279_v24, %v1277_v59 }
0x1373   : > { %v1491_v40 = vadd.f32 1.0, %v3585_v15  ;;  %v1332_v45 = vpop.permute.xlu1 %1331 }
0x1374   : > { %v3017_v57 = vmul.f32 -1.442695, %v1281_v53  ;;  %v1334_v16 = vadd.f32 %v1332_v45, %v4168_v23 }
0x1375   : > { %3590 = vrcp.f32 %v1491_v40 }
0x1376   : > { %3592 = vpow2.f32 %v3017_v57  ;;  %v1338_v43 = vadd.f32 %v1336_v27, %v1334_v16  ;;  %v1353_v57 = vpop.permute.xlu0 %1352 }
0x1377   : > { %v1389_v58 = vpop.permute.xlu1 %1388 }
0x1378   : > { %v3587_v44 = vpop.eup %3586  ;;  %v3019_v12 = vmul.f32 -1.442695, %v1338_v43  ;;  %v1391_v61 = vadd.f32 %v1389_v58, %v4168_v23 }
0x1379   : > { %v1173_v36 = vadd.f32 1.0, %v3587_v44 }
0x137a   : > { %v3589_v62 = vpop.eup %3588  ;;  %3594 = vpow2.f32 %v3019_v12  ;;  %v1395_v63 = vadd.f32 %v1393_v28, %v1391_v61 }
0x137b   : > { %3596 = vrcp.f32 %v1173_v36  ;;  %v1115_v2 = vadd.f32 1.0, %v3589_v62  ;;  %v1446_v3 = vpop.permute.xlu1 %1445 }
0x137c   : > { %v3021_v4 = vmul.f32 -1.442695, %v1395_v63  ;;  %v1448_v5 = vadd.f32 %v1446_v3, %v4168_v23 }
0x137d   : > { %3598 = vrcp.f32 %v1115_v2 }
0x137e   : > { %3600 = vpow2.f32 %v3021_v4  ;;  %v1452_v6 = vadd.f32 %v1450_v30, %v1448_v5 }
0x137f   : > { %v3591_v9 = vpop.eup %3590  ;;  %v1502_v10 = vpop.permute.xlu1 %1501 }
0x1380   : > { %v3593_v18 = vpop.eup %3592  ;;  %v3023_v14 = vmul.f32 -1.442695, %v1452_v6  ;;  %v1518_v17 = vsub.f32 1.0, %v3591_v9  ;;  %v1504_v22 = vadd.f32 %v1502_v10, %v4168_v23  ;;  %v1517_v24 = vmul.f32 %v3591_v9, %v1515_v20  ;;  %v1467_v6 = vpop.permute.xlu0 %1466 }
0x1381   : > { %v1285_v13 = vadd.f32 1.0, %v3593_v18 }
0x1382   : > { %3602 = vpow2.f32 %v3023_v14  ;;  %v1519_v27 = vmul.f32 %v1518_v17, %v4173_v38  ;;  %v1561_v17 = vld [vmem:[#allocation4 + $0x70] sm:$0xff] }
0x1383   : > { %3604 = vrcp.f32 %v1285_v13  ;;  %v1506_v28 = vpop.permute.xlu1 %1505  ;;  %v1564_v13 = vld [vmem:[#allocation4 + $0x88] sm:$0xff] }
0x1384   : > { %v3595_v41 = vpop.eup %3594  ;;  %v1508_v29 = vadd.f32 %v1506_v28, %v1504_v22  ;;  %v1520_v30 = vadd.f32 %v1519_v27, %v1517_v24  ;;  %v1559_v22 = vld [vmem:[#allocation4 + $0x60] sm:$0xff]  ;;  %v1562_v24 = vld [vmem:[#allocation4 + $0x78] sm:$0xff]  ;;  %v3276_v27 = vpack.c.bf16 %v1564_v13, %v1561_v17 }
0x1385   : > { %v3597_v32 = vpop.eup %3596  ;;  %v1342_v26 = vadd.f32 1.0, %v3595_v41  ;;  %v3269_v28 = vpack.c.bf16 %v1562_v24, %v1559_v22  ;;  %v1566_v41 = vld [vmem:[#allocation4 + $0x98] sm:$0xff]  ;;  %v2022_v17 = vld [vmem:[#allocation4 + $0x120] sm:$0xff]  ;;  %v2027_v22 = vld [vmem:[#allocation4 + $0x148] sm:$0xff] }
0x1386   : > { %v3025_v33 = vmul.f32 -1.442695, %v1508_v29  ;;  %1522 = vrot.lane.b32.xlu1 %v1520_v30, %s3729_s26  ;;  %v1186_v51 = vsub.f32 1.0, %v3597_v32  ;;  %v1569_v29 = vld [vmem:[#allocation4 + $0xb0] sm:$0xff]  ;;  %3277 = vmatpush3.bf16.msra.mxu1 %v3276_v27  ;;  %v2025_v13 = vld [vmem:[#allocation4 + $0x138] sm:$0xff] }
0x1387   : > { %v3599_v39 = vpop.eup %3598  ;;  %3606 = vrcp.f32 %v1342_v26  ;;  %v1183_v34 = vpop.permute.xlu1 %1182  ;;  %v1565_v30 = vld [vmem:[#allocation4 + $0x90] sm:$0xff]  ;;  %v1568_v26 = vld [vmem:[#allocation4 + $0xa8] sm:$0xff]  ;;  %3270 = vmatpush1.bf16.msra.mxu0 %v3269_v28  ;;  %3278 = vmatprep.subr.bf16.mxu1 %v3726_v0  ;;  %v2029_v24 = vld [vmem:[#allocation4 + $0x158] sm:$0xff]  ;;  %v3311_v28 = vpack.c.bf16 %v2025_v13, %v2022_v17 }
0x1388   : > { %v3601_v46 = vpop.eup %3600  ;;  %3608 = vpow2.f32 %v3025_v33  ;;  %v1131_v23 = vsub.f32 1.0, %v3599_v39  ;;  %v1187_v35 = vmul.f32 %v1186_v51, %v4334_v21  ;;  %v1185_v47 = vmul.f32 %v3597_v32, %v1183_v34  ;;  %v1567_v33 = vld [vmem:[#allocation4 + $0xa0] sm:$0xff]  ;;  %v1570_v51 = vld [vmem:[#allocation4 + $0xb8] sm:$0xff]  ;;  %v2032_v27 = vld [vmem:[#allocation4 + $0x170] sm:$0xff] }
0x1389   : > { %v1399_v38 = vadd.f32 1.0, %v3601_v46  ;;  %v1130_v48 = vmul.f32 %v3599_v39, %v4331_v31  ;;  %v3271_v32 = vpack.c.bf16 %v1569_v29, %v1566_v41  ;;  %v3273_v39 = vpack.c.bf16 %v1568_v26, %v1565_v30  ;;  %v1549_v46 = vld [vmem:[#allocation4 + $0x20] sm:$0xff]  ;;  %v2028_v29 = vld [vmem:[#allocation4 + $0x150] sm:$0xff] }
0x138a   : > { %v1133_v37 = vmul.f32 %v4334_v21, %v1131_v23  ;;  %v1188_v25 = vadd.f32 %v1187_v35, %v1185_v47  ;;  %v3279_v34 = vpack.c.bf16 %v1570_v51, %v1567_v33  ;;  %v3313_v30 = vpack.c.bf16 %v2032_v27, %v2029_v24  ;;  %v2030_v26 = vld [vmem:[#allocation4 + $0x160] sm:$0xff]  ;;  %v2033_v33 = vld [vmem:[#allocation4 + $0x178] sm:$0xff] }
0x138b   : > { %3610 = vrcp.f32 %v1399_v38  ;;  %v1296_v19 = vpop.permute.xlu1 %1295  ;;  %3272 = vmatprep.subr.bf16.mxu0 %v3271_v32  ;;  %v2031_v32 = vld [vmem:[#allocation4 + $0x168] sm:$0xff]  ;;  %v2505_v27 = vlaneseq }
0x138c   : > { %v3603_v49 = vpop.eup %3602  ;;  %v1134_v60 = vadd.f32 %v1133_v37, %v1130_v48  ;;  %3280 = vmatpush3.bf16.msra.mxu1 %v3279_v34  ;;  %3274 = vmatpush1.bf16.msra.mxu0 %v3273_v39  ;;  %v2184_v39 = vld [vmem:[#allocation4 + $0x188] sm:$0xff]  ;;  %v2187_v34 = vld [vmem:[#allocation4 + $0x1a0] sm:$0xff] }
0x138d   : > { %v3605_v50 = vpop.eup %3604  ;;  %v1456_v52 = vadd.f32 1.0, %v3603_v49  ;;  %3289 = vmatprep.subr.bf16.mxu1 %v3726_v0  ;;  %v1545_v49 = vld [vmem:[#allocation4] sm:$0xff] }
0x138e   : > { %v1529_v54 = vsel %vm987_vm3, %v1134_v60, %v1188_v25  ;;  %v1299_v55 = vsub.f32 1.0, %v3605_v50  ;;  %v1298_v15 = vmul.f32 %v3605_v50, %v1296_v19  ;;  %v1547_v25 = vld [vmem:[#allocation4 + $0x10] sm:$0xff]  ;;  %v1548_v60 = vld [vmem:[#allocation4 + $0x18] sm:$0xff]  ;;  %v1550_v50 = vld [vmem:[#allocation4 + $0x28] sm:$0xff]  ;;  %vm2560_vm3 = vcmask 327680  }
0x138f   : > { %3612 = vrcp.f32 %v1456_v52  ;;  %v1530_v56 = vsel %vm989_vm4, %v1529_v54, %v4337_v42  ;;  %v1410_v42 = vpop.permute.xlu1 %1409  ;;  %v1552_v52 = vld [vmem:[#allocation4 + $0x38] sm:$0xff]  ;;  %v1555_v54 = vld [vmem:[#allocation4 + $0x50] sm:$0xff]  ;;  %vm2577_vm4 = vcmask 973824  }
0x1390   : > { %v1300_v59 = vmul.f32 %v1299_v55, %v4334_v21  ;;  %v3283_v55 = vpack.c.bf16 %v1548_v60, %v1545_v49  ;;  %v1551_v19 = vld [vmem:[#allocation4 + $0x30] sm:$0xff] }
0x1391   : > { %v3607_v31 = vpop.eup %3606 }
0x1392   : > { %v3609_v53 = vpop.eup %3608  ;;  %v1301_v40 = vadd.f32 %v1300_v59, %v1298_v15  ;;  %v1356_v45 = vsub.f32 1.0, %v3607_v31  ;;  %v1355_v58 = vmul.f32 %v3607_v31, %v1353_v57  ;;  %v3285_v59 = vpack.c.bf16 %v1555_v54, %v1552_v52  ;;  %v1554_v15 = vld [vmem:[#allocation4 + $0x48] sm:$0xff]  ;;  %v1553_v31 = vld [vmem:[#allocation4 + $0x40] sm:$0xff] }
0x1393   : > { %v1512_v16 = vadd.f32 1.0, %v3609_v53  ;;  %v1556_v53 = vld [vmem:[#allocation4 + $0x58] sm:$0xff]  ;;  %v1865_v57 = vld [vmem:[#allocation4 + $0xe0] sm:$0xff]  ;;  %v2192_v54 = vld [vmem:[#allocation4 + $0x1c8] sm:$0xff] }
0x1394   : > { %v1531_v43 = vsel %vm991_vm5, %v1530_v56, %v1301_v40  ;;  %v1357_v44 = vmul.f32 %v1356_v45, %v4334_v21  ;;  %v3290_v56 = vpack.c.bf16 %v1550_v50, %v1547_v25  ;;  %v1862_v45 = vld [vmem:[#allocation4 + $0xc8] sm:$0xff]  ;;  %v2193_v25 = vld [vmem:[#allocation4 + $0x1d0] sm:$0xff]  ;;  %vm2592_vm5 = vcmask 900096  }
0x1395   : > { %v3611_v12 = vpop.eup %3610  ;;  %3614 = vrcp.f32 %v1512_v16  ;;  %v3287_v16 = vpack.c.bf16 %v1554_v15, %v1551_v19  ;;  %v2189_v50 = vld [vmem:[#allocation4 + $0x1b0] sm:$0xff]  ;;  %v2348_v15 = vld [vmem:[#allocation4 + $0x200] sm:$0xff] }
0x1396   : > { %v1358_v61 = vadd.f32 %v1357_v44, %v1355_v58  ;;  %v1413_v36 = vsub.f32 1.0, %v3611_v12  ;;  %v1412_v2 = vmul.f32 %v3611_v12, %v1410_v42  ;;  %v1863_v58 = vld [vmem:[#allocation4 + $0xd0] sm:$0xff]  ;;  %v3295_v44 = vpack.c.bf16 %v1865_v57, %v1862_v45  ;;  %v1861_v12 = vld [vmem:[#allocation4 + $0xc0] sm:$0xff]  ;;  %v1868_v42 = vld [vmem:[#allocation4 + $0xf8] sm:$0xff] }
0x1397   : > { %v2344_v57 = vld [vmem:[#allocation4 + $0x1e0] sm:$0xff] }
0x1398   : > { %v1414_v62 = vmul.f32 %v1413_v36, %v4334_v21  ;;  %v1532_v63 = vsel %vm993_vm6, %v1531_v43, %v1358_v61  ;;  %v3293_v43 = vpack.c.bf16 %v1556_v53, %v1553_v31  ;;  %v1864_v61 = vld [vmem:[#allocation4 + $0xd8] sm:$0xff]  ;;  %v1866_v36 = vld [vmem:[#allocation4 + $0xe8] sm:$0xff]  ;;  %v3329_v31 = vpack.c.bf16 %v2192_v54, %v2189_v50 }
0x1399   : > { %v3613_v3 = vpop.eup %3612 }
0x139a   : > { %v1415_v4 = vadd.f32 %v1414_v62, %v1412_v2  ;;  %v1470_v5 = vsub.f32 1.0, %v3613_v3  ;;  %v1469_v8 = vmul.f32 %v3613_v3, %v1467_v6  ;;  %v1871_v62 = vld [vmem:[#allocation4 + $0x110] sm:$0xff]  ;;  %v3304_v2 = vpack.c.bf16 %v1866_v36, %v1863_v58  ;;  %v1869_v6 = vld [vmem:[#allocation4 + $0x100] sm:$0xff]  ;;  %v2351_v58 = vld [vmem:[#allocation4 + $0x218] sm:$0xff] }
0x139b   : > { %v1867_v3 = vld [vmem:[#allocation4 + $0xf0] sm:$0xff] }
0x139c   : > { %v1533_v7 = vsel %vm995_vm7, %v1532_v63, %v1415_v4  ;;  %v1471_v9 = vmul.f32 %v1470_v5, %v4334_v21  ;;  %v3297_v63 = vpack.c.bf16 %v1864_v61, %v1861_v12  ;;  %v3299_v4 = vpack.c.bf16 %v1871_v62, %v1868_v42  ;;  %v1870_v5 = vld [vmem:[#allocation4 + $0x108] sm:$0xff]  ;;  %v2350_v36 = vld [vmem:[#allocation4 + $0x210] sm:$0xff] }
0x139d   : > { %v2353_v62 = vld [vmem:[#allocation4 + $0x228] sm:$0xff] }
0x139e   : > { %v1472_v10 = vadd.f32 %v1471_v9, %v1469_v8  ;;  %v2023_v9 = vld [vmem:[#allocation4 + $0x128] sm:$0xff] }
0x139f   : > { %v3615_v11 = vpop.eup %3614 }
0x13a0   : > { %v1526_v18 = vsub.f32 1.0, %v3615_v11  ;;  %v1534_v14 = vsel %vm997_vm8, %v1533_v7, %v1472_v10  ;;  %v1872_v7 = vld [vmem:[#allocation4 + $0x118] sm:$0xff]  ;;  %v2026_v10 = vld [vmem:[#allocation4 + $0x140] sm:$0xff] }
0x13a2   : > { %v1527_v20 = vmul.f32 %v1526_v18, %v4334_v21  ;;  %v1546_v21 = vld [vmem:[#allocation4 + $0x8] sm:$0xff]  ;;  %v3307_v18 = vpack.c.bf16 %v1872_v7, %v1869_v6  ;;  %v3732_v7 = vmov -inf  }
0x13a3   : > { %v3281_v23 = vpack.c.bf16 %v1549_v46, %v1546_v21  ;;  %v3315_v21 = vpack.c.bf16 %v2031_v32, %v2028_v29  ;;  %v3321_v46 = vpack.c.bf16 %v2033_v33, %v2030_v26  ;;  %2526 = vst [vmem:[#allocation3] sm:$0xff] %v3732_v7  ;;  %2530 = vst [vmem:[#allocation3 + $0x18] sm:$0x3] %v3732_v7  ;;  %v2503_v32 = vld [vmem:[%s4643_s7] sm:$0x7] }
0x13a4   : > { %2527 = vst [vmem:[#allocation3 + $0x8] sm:$0xff] %v3732_v7  ;;  %2531 = vst [vmem:[#allocation3 + $0x20] sm:$0x3] %v3732_v7 }
0x13a5   : > { %3282 = vmatprep.subr.bf16.mxu0 %v3281_v23  ;;  %v2185_v23 = vld [vmem:[#allocation4 + $0x190] sm:$0xff]  ;;  %2529 = vst.msk [vmem:[#allocation3 + $0x10] sm:$0xff] %vm2528_vm11, %v3732_v7 }
0x13a6   : > { %2533 = vst.msk [vmem:[#allocation3 + $0x28] sm:$0x3] %vm2532_vm12, %v3732_v7  ;;  %v2704_v7 = vld [vmem:[%s4644_s8 + $0x38] sm:$0xff] }
0x13f8   : > { %v1523_v35 = vpop.permute.xlu1 %1522 }
0x13f9   : > { %v1525_v38 = vmul.f32 %v3615_v11, %v1523_v35  ;;  %v3301_v11 = vpack.c.bf16 %v1870_v5, %v1867_v3  ;;  %v3323_v35 = vpack.c.bf16 %v2187_v34, %v2184_v39 }
0x13fb   : > { %v1528_v47 = vadd.f32 %v1527_v20, %v1525_v38  ;;  %v3309_v20 = vpack.c.bf16 %v2026_v10, %v2023_v9  ;;  %v2183_v38 = vld [vmem:[#allocation4 + $0x180] sm:$0xff] }
0x13fd   : > { %v1535_v48 = vsel %vm999_vm9, %v1534_v14, %v1528_v47  ;;  %v2024_v14 = vld [vmem:[#allocation4 + $0x130] sm:$0xff]  ;;  %v2186_v47 = vld [vmem:[#allocation4 + $0x198] sm:$0xff] }
0x13fe   : > { %1540 = vrot.lane.b32.xlu0 %v1535_v48, %s3731_s27  ;;  %v3318_v41 = vpack.c.bf16 %v2027_v22, %v2024_v14  ;;  %v2188_v48 = vld [vmem:[#allocation4 + $0x1a8] sm:$0xff]  ;;  %v3325_v49 = vpack.c.bf16 %v2186_v47, %v2183_v38  ;;  %s4593_s27 = scalar_lea.hbm %s4646_s10, %s3042_s28 }
0x13ff   : > { %v3332_v60 = vpack.c.bf16 %v2188_v48, %v2185_v23 }
0x1470   : > { %v1541_v37 = vpop.permute.xlu0 %1540 }
0x1471   : > { %1543 = vst.msk [vmem:[#allocation2 + $0x2] sm:$0xff] %vm463_vm2, %v1541_v37  ;;  %v2190_v37 = vld [vmem:[#allocation4 + $0x1b8] sm:$0xff] }
0x1472   : > { %v3327_v52 = vpack.c.bf16 %v2193_v25, %v2190_v37 }
0x1478   : > { %v1557_v40 = vld [vmem:[#allocation2 + $0x1] sm:$0xff] }
0x1479   : > { %3026 = vmatmul.mubr.msk.f32.vlgmr.msra.gmra.mrb[0].mxu0 %vm463_vm2, %v1557_v40  ;;  %3178 = vmatmul.mubr.msk.f32.vlgmr.msra.gmra.mrb[6].mxu1 %vm463_vm2, %v1557_v40  ;;  %v1544_v8 = vld [vmem:[#allocation2] sm:$0xff]  ;;  %v2346_v40 = vld [vmem:[#allocation4 + $0x1f0] sm:$0xff] }
0x147a   : > { %3284 = vmatpush1.bf16.msra.mxu0 %v3283_v55  ;;  %3291 = vmatpush3.bf16.msra.mxu1 %v3290_v56  ;;  %v1859_v51 = vld [vmem:[#allocation2 + $0x2] sm:$0xff]  ;;  %v2194_v56 = vld [vmem:[#allocation4 + $0x1d8] sm:$0xff] }
0x147b   : > { %3286 = vmatprep.subr.bf16.mxu0 %v3285_v59  ;;  %3292 = vmatprep.subr.bf16.mxu1 %v3726_v0  ;;  %v2191_v55 = vld [vmem:[#allocation4 + $0x1c0] sm:$0xff]  ;;  %v2345_v59 = vld [vmem:[#allocation4 + $0x1e8] sm:$0xff] }
0x147c   : > { %3188 = vmatprep.mubr.msk.f32.mxu1 %vm3727_vm0, %v3728_v1  ;;  %1782 = vmatprep.mubr.f32.mxu0 %v3728_v1  ;;  %v2020_v19 = vld [vmem:[#allocation2 + $0x3] sm:$0xff]  ;;  %v3335_v53 = vpack.c.bf16 %v2194_v56, %v2191_v55  ;;  %v3337_v45 = vpack.c.bf16 %v2348_v15, %v2345_v59 }
0x147d   : > { %v2181_v3 = vld [vmem:[#allocation2 + $0x4] sm:$0xff] }
0x147e   : > { %3288 = vmatpush1.bf16.msra.mxu0 %v3287_v16  ;;  %3294 = vmatpush3.bf16.msra.mxu1 %v3293_v43  ;;  %v2347_v16 = vld [vmem:[#allocation4 + $0x1f8] sm:$0xff]  ;;  %v2349_v43 = vld [vmem:[#allocation4 + $0x208] sm:$0xff]  ;;  %v2713_v55 = vld [vmem:[%s4644_s8 + $0x80] sm:$0xff] }
0x147f   : > { %3296 = vmatprep.subr.bf16.mxu0 %v3295_v44  ;;  %3303 = vmatprep.subr.bf16.mxu1 %v3726_v0  ;;  %v2354_v44 = vld [vmem:[#allocation4 + $0x230] sm:$0xff]  ;;  %v3339_v12 = vpack.c.bf16 %v2347_v16, %v2344_v57  ;;  %v3346_v61 = vpack.c.bf16 %v2349_v43, %v2346_v40  ;;  %v2342_v6 = vld [vmem:[#allocation2 + $0x5] sm:$0xff]  ;;  %v2700_v16 = vld [vmem:[%s4644_s8 + $0x18] sm:$0xff] }
0x1480   : > { %v3341_v42 = vpack.c.bf16 %v2354_v44, %v2351_v58  ;;  %v2714_v56 = vld [vmem:[%s4644_s8 + $0x88] sm:$0xff]  ;;  %v2699_v57 = vld [vmem:[%s4644_s8 + $0x10] sm:$0xff]  ;;  %v2717_v43 = vld [vmem:[%s4644_s8 + $0xa0] sm:$0xff] }
0x1481   : > { %3189 = vmatmul.mubr.msk.f32.vlgmr.msra.gmra.mrb[8].mxu1 %vm463_vm2, %v1544_v8  ;;  %3028 = vmatmul.mubr.msk.f32.vlgmr.msra.gmra.mrb[0].mxu0 %vm463_vm2, %v1544_v8  ;;  %v3351_v59 = vpack.c.bf16 %v2714_v56, %v2713_v55  ;;  %v2698_v15 = vld [vmem:[%s4644_s8 + $0x8] sm:$0xff]  ;;  %v3357_v44 = vpack.c.bf16 %v2700_v16, %v2699_v57 }
0x1482   : > { %3298 = vmatpush1.bf16.msra.mxu0 %v3297_v63  ;;  %3305 = vmatpush3.bf16.msra.mxu1 %v3304_v2  ;;  %v2352_v63 = vld [vmem:[#allocation4 + $0x220] sm:$0xff]  ;;  %v2355_v2 = vld [vmem:[#allocation4 + $0x238] sm:$0xff]  ;;  %v2718_v58 = vld [vmem:[%s4644_s8 + $0xa8] sm:$0xff] }
0x1483   : > { %3300 = vmatprep.subr.bf16.mxu0 %v3299_v4  ;;  %3306 = vmatprep.subr.bf16.mxu1 %v3726_v0  ;;  %v3343_v4 = vpack.c.bf16 %v2353_v62, %v2350_v36  ;;  %v3349_v5 = vpack.c.bf16 %v2355_v2, %v2352_v63  ;;  %v2702_v36 = vld [vmem:[%s4644_s8 + $0x28] sm:$0xff] }
0x1484   : > { %3199 = vmatprep.mubr.msk.f32.mxu1 %vm3727_vm0, %v3728_v1  ;;  %1940 = vmatprep.mubr.f32.mxu0 %v3728_v1 }
0x1486   : > { %3302 = vmatpush1.bf16.msra.mxu0 %v3301_v11  ;;  %3308 = vmatpush3.bf16.msra.mxu1 %v3307_v18 }
0x1487   : > { %3310 = vmatprep.subr.bf16.mxu0 %v3309_v20  ;;  %3317 = vmatprep.subr.bf16.mxu1 %v3726_v0 }
0x1489   : > { %3200 = vmatmul.mubr.msk.f32.vlgmr.msra.gmra.mrb[10].mxu1 %vm463_vm2, %v1859_v51  ;;  %3030 = vmatmul.mubr.msk.f32.vlgmr.msra.gmra.mrb[0].mxu0 %vm463_vm2, %v1859_v51 }
0x148a   : > { %3312 = vmatpush1.bf16.msra.mxu0 %v3311_v28  ;;  %3319 = vmatpush3.bf16.msra.mxu1 %v3318_v41  ;;  %v2506_v28 = vshrl.u32 %v2505_v27, 7 }
0x148b   : > { %3314 = vmatprep.subr.bf16.mxu0 %v3313_v30  ;;  %3320 = vmatprep.subr.bf16.mxu1 %v3726_v0 }
0x148c   : > { %3210 = vmatprep.mubr.msk.f32.mxu1 %vm3727_vm0, %v3728_v1  ;;  %2101 = vmatprep.mubr.f32.mxu0 %v3728_v1  ;;  %v2507_v30 = vsub.s32 0, %v2506_v28  ;;  %v2511_v26 = vsub.s32 1, %v2506_v28  ;;  %v2515_v33 = vsub.s32 2, %v2506_v28 }
0x148e   : > { %3316 = vmatpush1.bf16.msra.mxu0 %v3315_v21  ;;  %3322 = vmatpush3.bf16.msra.mxu1 %v3321_v46  ;;  %v2508_v51 = vrot.slane %v2503_v32, %v2507_v30  ;;  %v2512_v39 = vrot.slane %v2503_v32, %v2511_v26  ;;  %v2516_v34 = vrot.slane %v2503_v32, %v2515_v33  ;;  %v2723_v30 = vld [vmem:[%s4644_s8 + $0xd0] sm:$0xff] }
0x148f   : > { %3324 = vmatprep.subr.bf16.mxu0 %v3323_v35  ;;  %3331 = vmatprep.subr.bf16.mxu1 %v3726_v0 }
0x1491   : > { %3211 = vmatmul.mubr.msk.f32.vlgmr.msra.gmra.mrb[12].mxu1 %vm463_vm2, %v2020_v19  ;;  %3032 = vmatmul.mubr.msk.f32.vlgmr.msra.gmra.mrb[0].mxu0 %vm463_vm2, %v2020_v19  ;;  %v2697_v19 = vld [vmem:[%s4644_s8] sm:$0xff] }
0x1492   : > { %3326 = vmatpush1.bf16.msra.mxu0 %v3325_v49  ;;  %3333 = vmatpush3.bf16.msra.mxu1 %v3332_v60  ;;  %v3353_v40 = vpack.c.bf16 %v2698_v15, %v2697_v19 }
0x1493   : > { %3328 = vmatprep.subr.bf16.mxu0 %v3327_v52  ;;  %3334 = vmatprep.subr.bf16.mxu1 %v3726_v0 }
0x1494   : > { %3221 = vmatprep.mubr.msk.f32.mxu1 %vm3727_vm0, %v3728_v1  ;;  %2262 = vmatprep.mubr.f32.mxu0 %v3728_v1 }
0x1496   : > { %3330 = vmatpush1.bf16.msra.mxu0 %v3329_v31  ;;  %3336 = vmatpush3.bf16.msra.mxu1 %v3335_v53  ;;  %v2715_v31 = vld [vmem:[%s4644_s8 + $0x90] sm:$0xff]  ;;  %v2716_v53 = vld [vmem:[%s4644_s8 + $0x98] sm:$0xff] }
0x1497   : > { %3338 = vmatprep.subr.bf16.mxu0 %v3337_v45  ;;  %3345 = vmatprep.subr.bf16.mxu1 %v3726_v0  ;;  %v3355_v45 = vpack.c.bf16 %v2716_v53, %v2715_v31  ;;  %v2725_v31 = vld [vmem:[%s4644_s8 + $0xe0] sm:$0xff]  ;;  %v2726_v53 = vld [vmem:[%s4644_s8 + $0xe8] sm:$0xff] }
0x1499   : > { %3222 = vmatmul.mubr.msk.f32.vlgmr.msra.gmra.mrb[14].mxu1 %vm463_vm2, %v2181_v3  ;;  %3034 = vmatmul.mubr.msk.f32.vlgmr.msra.gmra.mrb[0].mxu0 %vm463_vm2, %v2181_v3  ;;  %v2719_v3 = vld [vmem:[%s4644_s8 + $0xb0] sm:$0xff] }
0x149a   : > { %3340 = vmatpush1.bf16.msra.mxu0 %v3339_v12  ;;  %3347 = vmatpush3.bf16.msra.mxu1 %v3346_v61  ;;  %v3359_v12 = vpack.c.bf16 %v2718_v58, %v2717_v43  ;;  %v2701_v61 = vld [vmem:[%s4644_s8 + $0x20] sm:$0xff]  ;;  %v3375_v43 = vpack.c.bf16 %v2726_v53, %v2725_v31  ;;  %v2710_v58 = vld [vmem:[%s4644_s8 + $0x68] sm:$0xff] }
0x149b   : > { %3342 = vmatprep.subr.bf16.mxu0 %v3341_v42  ;;  %3348 = vmatprep.subr.bf16.mxu1 %v3726_v0  ;;  %v3361_v42 = vpack.c.bf16 %v2702_v36, %v2701_v61 }
0x149c   : > { %3232 = vmatprep.mubr.msk.f32.mxu1 %vm3727_vm0, %v3728_v1  ;;  %2423 = vmatprep.mubr.f32.mxu0 %v3728_v1 }
0x149e   : > { %3344 = vmatpush1.bf16.msra.mxu0 %v3343_v4  ;;  %3350 = vmatpush3.bf16.msra.mxu1 %v3349_v5  ;;  %v2720_v4 = vld [vmem:[%s4644_s8 + $0xb8] sm:$0xff] }
0x149f   : > { %3383 = vmatprep.subr.bf16.mxu1 %v3726_v0  ;;  %3352 = vmatprep.subr.bf16.mxu0 %v3351_v59  ;;  %v3363_v5 = vpack.c.bf16 %v2720_v4, %v2719_v3 }
0x14a1   : > { %3233 = vmatmul.mubr.msk.f32.vlgmr.msra.gmra.mrb[16].mxu1 %vm463_vm2, %v2342_v6  ;;  %3036 = vmatmul.mubr.msk.f32.vlgmr.msra.gmra.mrb[0].mxu0 %vm463_vm2, %v2342_v6  ;;  %v2703_v6 = vld [vmem:[%s4644_s8 + $0x30] sm:$0xff] }
0x14a2   : > { %3243 = vmatprep.mubr.msk.f32.mxu1 %vm3727_vm0, %v3728_v1  ;;  %3354 = vmatpush3.bf16.msra.mxu0 %v3353_v40  ;;  %vm2555_vm0 = vcmask 334849   ;;  %v2709_v40 = vld [vmem:[%s4644_s8 + $0x60] sm:$0xff] }
0x14a3   : > { %3356 = vmatprep.subr.bf16.mxu0 %v3355_v45  ;;  %v3377_v4 = vpack.c.bf16 %v2710_v58, %v2709_v40 }
0x14a6   : > { %3358 = vmatpush3.bf16.msra.mxu0 %v3357_v44  ;;  %v2731_v44 = vld [vmem:[%s4644_s8 + $0x110] sm:$0xff] }
0x14a7   : > { %3360 = vmatprep.subr.bf16.mxu0 %v3359_v12  ;;  %v2732_v12 = vld [vmem:[%s4644_s8 + $0x118] sm:$0xff] }
0x14aa   : > { %3362 = vmatpush3.bf16.msra.mxu0 %v3361_v42 }
0x14ab   : > { %3364 = vmatprep.subr.bf16.mxu0 %v3363_v5  ;;  %v3387_v5 = vpack.c.bf16 %v2732_v12, %v2731_v44 }
0x154c   : > { %v1711_v8 = vpop.f32.mrb[6].mxu1 }
0x154d   : > { %v3179_v9 = vpop.f32.mrb[7].mxu1 }
0x154e   : > { %v3365_v9 = vpack.c.bf16 %v2704_v7, %v2703_v6 }
0x1550   : > { %3366 = vmatpush3.bf16.msra.mxu0 %v3365_v9  ;;  %v2712_v9 = vld [vmem:[%s4644_s8 + $0x78] sm:$0xff] }
0x1554   : > { %v1855_v10 = vpop.f32.mrb[8].mxu1 }
0x1555   : > { %v1856_v11 = vadd.f32 %v1855_v10, %v1711_v8  ;;  %v3190_v18 = vpop.f32.mrb[9].mxu1 }
0x1556   : > { %v2722_v18 = vld [vmem:[%s4644_s8 + $0xc8] sm:$0xff] }
0x155c   : > { %v2013_v14 = vpop.f32.mrb[10].mxu1 }
0x155d   : > { %v2019_v20 = vadd.f32 %v2013_v14, %v1856_v11  ;;  %v3201_v17 = vpop.f32.mrb[11].mxu1  ;;  %v2721_v11 = vld [vmem:[%s4644_s8 + $0xc0] sm:$0xff] }
0x155e   : > { %v3367_v14 = vpack.c.bf16 %v2722_v18, %v2721_v11  ;;  %v2706_v17 = vld [vmem:[%s4644_s8 + $0x48] sm:$0xff] }
0x1560   : > { %3368 = vmatprep.subr.bf16.mxu0 %v3367_v14 }
0x1564   : > { %v2174_v13 = vpop.f32.mrb[12].mxu1 }
0x1565   : > { %v2180_v22 = vadd.f32 %v2174_v13, %v2019_v20  ;;  %v3212_v24 = vpop.f32.mrb[13].mxu1  ;;  %v2705_v20 = vld [vmem:[%s4644_s8 + $0x40] sm:$0xff] }
0x1566   : > { %v3369_v13 = vpack.c.bf16 %v2706_v17, %v2705_v20 }
0x1568   : > { %3370 = vmatpush3.bf16.msra.mxu0 %v3369_v13 }
0x156c   : > { %v2335_v41 = vpop.f32.mrb[14].mxu1 }
0x156d   : > { %v2341_v1 = vadd.f32 %v2335_v41, %v2180_v22  ;;  %v3223_v29 = vpop.f32.mrb[15].mxu1 }
0x1574   : > { %v2496_v21 = vpop.f32.mrb[16].mxu1  ;;  %v2425_v46 = vpop.f32.mrb[0].mxu0 }
0x1575   : > { %v2502_v23 = vadd.f32 %v2496_v21, %v2341_v1  ;;  %v2520_v35 = vadd.f32 %v2508_v51, %v2425_v46  ;;  %v3234_v38 = vpop.f32.mrb[17].mxu1  ;;  %v2427_v47 = vpop.f32.mrb[1].mxu0  ;;  %v2724_v51 = vld [vmem:[%s4644_s8 + $0xd8] sm:$0xff] }
0x1576   : > { %v2521_v48 = vadd.f32 %v2512_v39, %v2427_v47 }
0x1577   : > { %v2522_v37 = vadd.f32 %v2516_v34, %v2502_v23  ;;  %3616 = vtanh.f32 %v2520_v35  ;;  %v3371_v35 = vpack.c.bf16 %v2724_v51, %v2723_v30 }
0x1578   : > { %3618 = vtanh.f32 %v2521_v48 }
0x1579   : > { %3620 = vtanh.f32 %v2522_v37  ;;  %v2707_v37 = vld [vmem:[%s4644_s8 + $0x50] sm:$0xff]  ;;  %3372 = vmatprep.subr.bf16.mxu0 %v3371_v35 }
0x1581   : > { %v4413_v25 = vpop.eup %3616 }
0x1582   : > { %v4415_v49 = vpop.eup %3618  ;;  %v2537_v60 = vrot.slane %v4413_v25, 7 }
0x1583   : > { %v4418_v50 = vpop.eup %3620  ;;  %v2538_v52 = vrot.slane %v4415_v49, 7 }
0x1584   : > { %2540 = vrot.lane.b32.xlu1 %v2537_v60, %s3733_s30  ;;  %v2539_v54 = vrot.slane %v4418_v50, 7  ;;  %v2708_v60 = vld [vmem:[%s4644_s8 + $0x58] sm:$0xff] }
0x1585   : > { %2542 = vrot.lane.b32.xlu0 %v2538_v52, %s3733_s30  ;;  %v2729_v52 = vld [vmem:[%s4644_s8 + $0x100] sm:$0xff]  ;;  %v3373_v57 = vpack.c.bf16 %v2708_v60, %v2707_v37 }
0x1587   : > { %3374 = vmatpush3.bf16.msra.mxu0 %v3373_v57 }
0x1588   : > { %2544 = vrot.lane.b32.xlu1 %v2539_v54, %s3733_s30  ;;  %v2730_v54 = vld [vmem:[%s4644_s8 + $0x108] sm:$0xff]  ;;  %3376 = vmatprep.subr.bf16.mxu0 %v3375_v43  ;;  %s2892_s30 = scalar_lea.sflag [#allocation6], %s363_s18 }
0x1589   : > { %v3384_v16 = vpack.c.bf16 %v2730_v54, %v2729_v52 }
0x158b   : > { %3385 = vmatpush3.bf16.msra.mxu1 %v3384_v16  ;;  %3378 = vmatpush3.bf16.msra.mxu0 %v3377_v4 }
0x158c   : > { %3386 = vmatprep.subr.bf16.mxu1 %v3726_v0 }
0x158f   : > { %3388 = vmatpush3.bf16.msra.mxu1 %v3387_v5 }
0x15f6   : > { %v2541_v62 = vpop.permute.xlu1 %2540 }
0x15f7   : > { %2553 = vst.msk [vmem:[#allocation3] sm:$0xfe] %vm2552_vm13, %v2541_v62  ;;  %v2543_v63 = vpop.permute.xlu0 %2542 }
0x15f8   : > { %2558 = vst.msk [vmem:[#allocation3 + $0x18] sm:$0x1] %vm2557_vm14, %v2541_v62  ;;  %v2547_v2 = vsel %vm2546_vm15, %v2541_v62, %v2543_v63 }
0x15f9   : > { %2554 = vst [vmem:[#allocation3 + $0x8] sm:$0xfe] %v2547_v2  ;;  %2559 = vst [vmem:[#allocation3 + $0x20] sm:$0x1] %v2547_v2  ;;  %v2728_v2 = vld [vmem:[%s4644_s8 + $0xf8] sm:$0xff] }
0x15fa   : > { %v2545_v8 = vpop.permute.xlu1 %2544 }
0x15fb   : > { %v2548_v10 = vsel %vm2546_vm15, %v2543_v63, %v2545_v8  ;;  %v2727_v63 = vld [vmem:[%s4644_s8 + $0xf0] sm:$0xff] }
0x15fc   : > { %2556 = vst.msk [vmem:[#allocation3 + $0x10] sm:$0xfe] %vm2555_vm0, %v2548_v10  ;;  %v3379_v7 = vpack.c.bf16 %v2728_v2, %v2727_v63  ;;  %v2711_v8 = vld [vmem:[%s4644_s8 + $0x70] sm:$0xff] }
0x15fd   : > { %2561 = vst.msk [vmem:[#allocation3 + $0x28] sm:$0x1] %vm2560_vm3, %v2548_v10  ;;  %v3381_v20 = vpack.c.bf16 %v2712_v9, %v2711_v8 }
0x15fe   : > { %v4484_v22 = vld [vmem:[#allocation3] sm:$0xff]  ;;  %3380 = vmatprep.subr.bf16.mxu0 %v3379_v7 }
0x15ff   : > { %v2601_v24 = vld [vmem:[#allocation3] sm:$0xfe]  ;;  %v2604_v29 = vld [vmem:[#allocation3 + $0x18] sm:$0x1]  ;;  %3382 = vmatpush3.bf16.msra.mxu0 %v3381_v20 }
0x1600   : > { %v4486_v27 = vld [vmem:[#allocation3 + $0x8] sm:$0xff]  ;;  %v2605_v41 = vld [vmem:[#allocation3 + $0x20] sm:$0x1]  ;;  %v2613_v34 = vrot.slane %v2601_v24, 1  ;;  %v2642_v46 = vld [vmem:[#allocation3] sm:$0xfc] }
0x1601   : > { %v2602_v28 = vld [vmem:[#allocation3 + $0x8] sm:$0xfe]  ;;  %v3461_v1 = vpack.i.bf16 %v4484_v22, %v4486_v27  ;;  %v2617_v26 = vrot.slane %v2605_v41, 1  ;;  %v2646_v23 = vld [vmem:[#allocation3 + $0x20] sm:$0x3]  ;;  %v2614_v38 = vrot.slane %v2604_v29, 1 }
0x1602   : > { %v2616_v32 = vrot.slane %v2602_v28, 1  ;;  %v2643_v33 = vld [vmem:[#allocation3 + $0x8] sm:$0xfc]  ;;  %v2645_v48 = vld [vmem:[#allocation3 + $0x18] sm:$0x3]  ;;  %v2658_v59 = vrot.slane %v2646_v23, 2 }
0x1603   : > { %3462 = vrot.lane.b32.xlu0 %v3461_v1, %s3734_s12  ;;  %v4497_v39 = vld [vmem:[#allocation3 + $0x10] sm:$0xff]  ;;  %v2657_v19 = vrot.slane %v2643_v33, 2  ;;  %v2615_v61 = vsel %vm999_vm9, %v2613_v34, %v2614_v38  ;;  %v2654_v36 = vrot.slane %v2642_v46, 2  ;;  %v2655_v42 = vrot.slane %v2645_v48, 2 }
0x1604   : > { %v2603_v21 = vld [vmem:[#allocation3 + $0x10] sm:$0xfe]  ;;  %2575 = vrot.lane.b32.xlu1 %v4497_v39, %s3734_s12  ;;  %v2606_v47 = vld [vmem:[#allocation3 + $0x28] sm:$0x1]  ;;  %v4514_v55 = vsel %vm999_vm9, %v2616_v32, %v2617_v26  ;;  %v2566_v32 = vmax.f32 %v4415_v49, %v4486_v27  ;;  %v2565_v33 = vmax.f32 %v4413_v25, %v4484_v22 }
0x1605   : > { %v2619_v56 = vrot.slane %v2603_v21, 1  ;;  %v2644_v15 = vld [vmem:[#allocation3 + $0x10] sm:$0xfc]  ;;  %v2620_v45 = vrot.slane %v2606_v47, 1  ;;  %v2647_v62 = vld [vmem:[#allocation3 + $0x28] sm:$0x3]  ;;  %v3471_v3 = vpack.i.bf16 %v2615_v61, %v4514_v55  ;;  %v4546_v6 = vsel %vm997_vm8, %v2657_v19, %v2658_v59 }
0x1606   : > { %v2660_v11 = vrot.slane %v2644_v15, 2  ;;  %v2661_v18 = vrot.slane %v2647_v62, 2  ;;  %v2656_v14 = vsel %vm997_vm8, %v2654_v36, %v2655_v42 }
0x1607   : > { %3467 = vrot.lane.b32.xlu0 %v3461_v1, %s3735_s20  ;;  %v2621_v10 = vsel %vm999_vm9, %v2619_v56, %v2620_v45  ;;  %v3476_v0 = vpack.i.bf16 %v2656_v14, %v4546_v6  ;;  %v2567_v1 = vmax.f32 %v4418_v50, %v4497_v39 }
0x1608   : > { %2590 = vrot.lane.b32.xlu1 %v4497_v39, %s3735_s20  ;;  %v2662_v17 = vsel %vm997_vm8, %v2660_v11, %v2661_v18 }
0x160b   : > { %3472 = vrot.lane.b32.xlu0 %v3471_v3, %s3735_s20 }
0x160c   : > { %2632 = vrot.lane.b32.xlu1 %v2621_v10, %s3735_s20 }
0x160f   : > { %3477 = vrot.lane.b32.xlu0 %v3476_v0, %s3734_s12 }
0x1610   : > { %2673 = vrot.lane.b32.xlu1 %v2662_v17, %s3734_s12  ;;  %s3655_s12 = scalar_lea.vmem %s4595_s29, 128 }
0x1611   : > { %p3656_p6 = scmp.ne.s32.totalorder %s4595_s29, %s3655_s12 }
0x1613   : > { %3482 = vrot.lane.b32.xlu0 %v3476_v0, %s3735_s20  ;;  %p3657_p10 = pnand %p3656_p6, %p4662_p9 }
0x1614   : > { %2687 = vrot.lane.b32.xlu1 %v2662_v17, %s3735_s20 }
0x1615   : > { %p3658_p12 = pneg %p3657_p10 }
0x1675   : > { %v3463_v13 = vpop.permute.xlu0 %3462 }
0x1676   : > { %v3465_v24 = vunpack.i.h.bf16 %v3463_v13  ;;  %v3464_v28 = vunpack.i.l.bf16 %v3463_v13  ;;  %v2576_v41 = vpop.permute.xlu1 %2575 }
0x1677   : > { %v2585_v26 = vmax.f32 %v2567_v1, %v2576_v41 }
0x1678   : > { %v2578_v29 = vsel %vm2577_vm4, %v3465_v24, %v3464_v28  ;;  %v2579_v30 = vsel %vm2577_vm4, %v3464_v28, %v2576_v41  ;;  %v3626_v28 = vld [vmem:[%s3904_s21] sm:$0xff]  ;;  %s3659_s21 = sshll.u32 %s3736_s17, 4  ;;  %s3660_s21 = int_to_ptr.vmem [resolvable:$false] %s3659_s21 }
0x1679   : > { %v3468_v51 = vpop.permute.xlu0 %3467  ;;  %v2584_v23 = vmax.f32 %v2566_v32, %v2579_v30  ;;  %v2583_v35 = vmax.f32 %v2565_v33, %v2578_v29  ;;  %s3661_s20 = scalar_lea.vmem %s3660_s21, 256  ;;  %p3662_p2 = scmp.lt.s32.totalorder %s4595_s29, %s3660_s21 }
0x167a   : > { %v3470_v34 = vunpack.i.h.bf16 %v3468_v51  ;;  %v3469_v21 = vunpack.i.l.bf16 %v3468_v51  ;;  %v2591_v46 = vpop.permute.xlu1 %2590  ;;  %p3663_p3 = scmp.lt.s32.totalorder %s3661_s20, %s3655_s12 }
0x167b   : > { %v2600_v38 = vmax.f32 %v2585_v26, %v2591_v46 }
0x167c   : > { %v2593_v50 = vsel %vm2592_vm5, %v3470_v34, %v3469_v21  ;;  %v2594_v39 = vsel %vm2592_vm5, %v3469_v21, %v2591_v46  ;;  %p3664_p4 = por %p3663_p3, %p3662_p2 }
0x167d   : > { %v2598_v47 = vmax.f32 %v2583_v35, %v2593_v50  ;;  %v2599_v48 = vmax.f32 %v2584_v23, %v2594_v39  ;;  %v3473_v37 = vpop.permute.xlu0 %3472  ;;  %v2627_v49 = vmax.f32 %v2600_v38, %v2621_v10  ;;  %v3038_v10 = vld [vmem:[%s4645_s9] ss:$0 sm:$0xff] }
0x167e   : > { %v3475_v27 = vunpack.i.h.bf16 %v3473_v37  ;;  %v3474_v60 = vunpack.i.l.bf16 %v3473_v37  ;;  %v2633_v52 = vpop.permute.xlu1 %2632  ;;  %p3665_p7 = pnand %p3664_p4, %p3658_p12 }
0x167f   : > { %v2625_v25 = vmax.f32 %v2598_v47, %v2615_v61  ;;  %v2626_v22 = vmax.f32 %v2599_v48, %v4514_v55  ;;  %v2641_v54 = vmax.f32 %v2627_v49, %v2633_v52 }
0x1680   : > { %v2634_v56 = vsel %vm2592_vm5, %v3475_v27, %v3474_v60  ;;  %v2635_v19 = vsel %vm2592_vm5, %v3474_v60, %v2633_v52 }
0x1681   : > { %v2639_v59 = vmax.f32 %v2625_v25, %v2634_v56  ;;  %v2640_v15 = vmax.f32 %v2626_v22, %v2635_v19  ;;  %v3478_v31 = vpop.permute.xlu0 %3477  ;;  %v2668_v53 = vmax.f32 %v2641_v54, %v2662_v17 }
0x1682   : > { %v3480_v40 = vunpack.i.h.bf16 %v3478_v31  ;;  %v3479_v45 = vunpack.i.l.bf16 %v3478_v31  ;;  %v2674_v57 = vpop.permute.xlu1 %2673 }
0x1683   : > { %v2666_v16 = vmax.f32 %v2639_v59, %v2656_v14  ;;  %v2667_v43 = vmax.f32 %v2640_v15, %v4546_v6  ;;  %v2682_v55 = vmax.f32 %v2668_v53, %v2674_v57 }
0x1684   : > { %v2675_v58 = vsel %vm2577_vm4, %v3480_v40, %v3479_v45  ;;  %v2676_v44 = vsel %vm2577_vm4, %v3479_v45, %v2674_v57 }
0x1685   : > { %v3483_v12 = vpop.permute.xlu0 %3482  ;;  %v2680_v62 = vmax.f32 %v2666_v16, %v2675_v58  ;;  %v2681_v63 = vmax.f32 %v2667_v43, %v2676_v44 }
0x1686   : > { %v3485_v61 = vunpack.i.h.bf16 %v3483_v12  ;;  %v3484_v36 = vunpack.i.l.bf16 %v3483_v12  ;;  %v2688_v42 = vpop.permute.xlu1 %2687 }
0x1687   : > { %v2696_v2 = vmax.f32 %v2682_v55, %v2688_v42 }
0x1688   : > { %v2689_v3 = vsel %vm2592_vm5, %v3485_v61, %v3484_v36  ;;  %v2690_v4 = vsel %vm2592_vm5, %v3484_v36, %v2688_v42 }
0x1689   : > { %v2694_v5 = vmax.f32 %v2680_v62, %v2689_v3  ;;  %v2695_v7 = vmax.f32 %v2681_v63, %v2690_v4  ;;  %3244 = vmatmul.mubr.msk.f32.vlgmr.msra.gmra.mrb[18].mxu1 %vm463_vm2, %v2696_v2 }
0x168b   : > { %2807 = vmatprep.mubr.f32.mxu0 %v2695_v7 }
0x168c   : > { %2808 = vmatmul.mubr.f32.vlgmr.msra.gmra.mrb[2].mxu0 %v2694_v5 }
0x175c   : > { %v2879_v6 = vpop.f32.mrb[18].mxu1 }
0x175d   : > { %v3245_v8 = vpop.f32.mrb[19].mxu1 }
0x175f   : > { %v3124_v9 = vpop.f32.mrb[2].mxu0 }
0x1760   : > { %v3125_v11 = vpop.f32.mrb[3].mxu0 }
0x1761   : > { %v3126_v18 = vadd.f32 %v3125_v11, %v3124_v9 }
0x1763   : > { %v2810_v14 = vadd.f32 %v3126_v18, %v3038_v10 }
0x1765   : > { %v2880_v0 = vadd.f32 %v2879_v6, %v2810_v14 }
0x1767   : > { %v3040_v20 = vmul.f32 -1.442695, %v2880_v0 }
0x1769   : > { %3622 = vpow2.f32 %v3040_v20 }
0x1773   : > { %v3623_v17 = vpop.eup %3622 }
0x1774   : > { %v2886_v13 = vadd.f32 1.0, %v3623_v17 }
0x1776   : > { %3624 = vrcp.f32 %v2886_v13 }
0x1780   : > { %v3625_v24 = vpop.eup %3624 }
0x1781   : > { %v2889_v41 = vmul.f32 %v3626_v28, %v3625_v24 }
0x1783   : > { %2890 = vst.msk [vmem:[%s365_s11] sm:$0xff] %vm384_vm1, %v2889_v41 }
0x1784   : > { %3668 = shalt.err (!%p3665_p7)
}
0x1785   : > { %s3669_s18 = scalar_lea.hbm %s4593_s27, 128  ;;  %s3673_s11 = scalar_lea.hbm %s4646_s10, 256 }
0x1786   : > { %p3670_p8 = scmp.ne.s32.totalorder %s4593_s27, %s3669_s18  ;;  %p3674_p1 = scmp.lt.u32.totalorder %s4593_s27, %s4646_s10 }
0x1787   : > { %p3675_p0 = scmp.lt.u32.totalorder %s3673_s11, %s3669_s18  ;;  %p3677_p6 = scmp.lt.u32.totalorder %s3669_s18, %s4593_s27 }
0x1788   : > { %p3671_p11 = pnand %p3670_p8, %p4662_p9 }
0x1789   : > { %p3676_p5 = por %p3675_p0, %p3674_p1 }
0x178a   : > { %p3672_p13 = pneg %p3671_p11 }
0x178b   : > { %p3678_p10 = por %p3677_p6, %p3676_p5 }
0x178d   : > { %p3679_p12 = pnand %p3678_p10, %p3672_p13 }
0x178f   : > { %3682 = shalt.err (!%p3679_p12)
}
0x1790   : > { %3403 = dma.vmem_to_hbm [thread:$0]  (%p4662_p9), %s4595_s29, 128, %s4593_s27, %s2892_s30  }
0x1791 PF: > { %p3415_p2 = scmp.ge.s32.totalorder %s3721_s16, 2  ;;  %s2917_s12 = sand.u32 1, %s3709_s13  }
0x1792   : > { %p4663_p3 = scmp.ne.s32.totalorder %s4654_s24, 0  ;;  %s2918_s17 = scalar_lea.sflag [#allocation6], %s2917_s12 }
0x1794   : > { %p3410_p4 = pnand %p3415_p2, %p4663_p3 }
0x1796   : > { %3704 = dma.done.wait (!%p3410_p4), %s2918_s17, 128  }
0x1797   : > { %3706 = vsyncadd (!%p3410_p4), %s2918_s17, 4294967168  ;;  %p21_p7 = scmp.ge.s32.totalorder %s3817_s19, 4   ;;  %s4664_s13 = smov %s3713_s14 }
0x1798   : > { %s4665_s14 = smov %s3717_s15  ;;  %s4666_s15 = smov %s3828_s22 }
0x1799   : > { %s4667_s16 = smov %s3817_s19  ;;  %23 = sbr.rel (!%p21_p7) target bundleno = 6 (0x6), region = 108 }
0x17a0   :  { %2923 = vsyncpa [#allocation5], 1 }
0x17a1   :  { %2925 = vsyncpa [#allocation5 + $0x1], 1 }
0x17a2   :  { %2926 = vsyncpa [#allocation6], 1 }
0x17a3   :  { %2928 = vsyncpa [#allocation6 + $0x1], 1 }

</bundles_post_ra>
